<compile_context>
chip_gen: v7x
topology: tpu7x:2x2x1
jax: 0.10.0
libtpu: 0.0.40
codegen_flags: <defaults>
</compile_context>

<pallas_src>
import jax
import jax.numpy as jnp
from jax.experimental import pallas as pl
from jax.experimental.pallas import tpu as pltpu

# Logical (PyTorch) dims.
D_IN, D_HID, D_OUT = 28 * 28, 800, 10
# Lane-aligned padded dims used inside the kernel (multiples of 128).
P_IN, P_HID, P_OUT = 896, 896, 128


def _round_up(n, m):
    return ((n + m - 1) // m) * m


def _pad2(a, rows, cols, dtype):
    """Zero-pad a 2D array to (rows, cols) and cast to dtype."""
    out = jnp.zeros((rows, cols), dtype)
    return out.at[: a.shape[0], : a.shape[1]].set(a.astype(dtype))


def _choose_tiling(batch, max_tm):
    """Pick (tm, padded_batch): tm is a multiple of 8, <= max_tm.

    - If the whole batch fits in one tile and is big enough, split into two
      equal tiles so the 'parallel' batch axis shards across both TensorCores
      on v7x (cost on single-TC chips: one extra ~0.35us grid step).
    - Otherwise pick the tile size that minimizes padded rows (avoids an
      almost-entirely-padded trailing tile), preferring larger tiles on ties.
    """
    b8 = _round_up(batch, 8)
    max_tm = max(8, _round_up(max_tm, 8))
    if b8 <= max_tm:
        if b8 >= 16:
            tm = _round_up((b8 + 1) // 2, 8)
            return tm, 2 * tm
        return b8, b8
    best = None
    for tm in (max_tm, 896, 768, 640, 512, 384, 256, 128):
        if tm > max_tm or tm < 8:
            continue
        bp = _round_up(batch, tm)
        key = (bp - batch, -tm)  # minimize padding, then maximize tile size
        if best is None or key < best[0]:
            best = (key, tm, bp)
    return best[1], best[2]


def _mlp_kernel(x_ref, w1_ref, b1_ref, w2_ref, b2_ref, w3_ref, b3_ref, o_ref):
    # fc1: bf16 x bf16 matmul, f32 accumulate; bias + ReLU in f32 on accumulator.
    h1 = jnp.dot(x_ref[...], w1_ref[...], preferred_element_type=jnp.float32)
    h1 = jnp.maximum(h1 + b1_ref[...], 0.0).astype(jnp.bfloat16)
    # fc2
    h2 = jnp.dot(h1, w2_ref[...], preferred_element_type=jnp.float32)
    h2 = jnp.maximum(h2 + b2_ref[...], 0.0).astype(jnp.bfloat16)
    # fc3 (logits, no activation); lane-dense (TM, 128) f32 store.
    o_ref[...] = (
        jnp.dot(h2, w3_ref[...], preferred_element_type=jnp.float32) + b3_ref[...]
    )


def prepare_params(params):
    """One-time padding + bf16 cast of weights (f32 biases). Call once, reuse."""
    w1, b1, w2, b2, w3, b3 = params
    return (
        _pad2(w1, P_IN, P_HID, jnp.bfloat16),
        _pad2(b1, 1, P_HID, jnp.float32),
        _pad2(w2, P_HID, P_HID, jnp.bfloat16),
        _pad2(b2, 1, P_HID, jnp.float32),
        _pad2(w3, P_HID, P_OUT, jnp.bfloat16),
        _pad2(b3, 1, P_OUT, jnp.float32),
    )


def student_net_forward(x, padded_params, *, max_tm=1024):
    """x: any array whose trailing dims flatten to 784 (e.g. (B, 1, 28, 28)).

    padded_params: output of prepare_params().
    max_tm: per-generation cap on the batch tile. 1024 is safe everywhere
    (v7x 64 MiB VMEM); on v5e/v6e you may pass 2048 for large batches.
    """
    w1p, b1p, w2p, b2p, w3p, b3p = padded_params

    x2d = x.reshape(-1, D_IN)
    batch = x2d.shape[0]

    tm, bp = _choose_tiling(batch, max_tm)
    n_tiles = bp // tm

    # Single bf16 cast + single pad of the activations (no extra f32 pass).
    # TODO(synk): optionally keep K=784 unpadded (full-extent block) and benchmark.
    xp = jnp.pad(x2d.astype(jnp.bfloat16), ((0, bp - batch), (0, P_IN - D_IN)))

    flops = 2 * bp * (P_IN * P_HID + P_HID * P_HID + P_HID * P_OUT)
    bytes_accessed = (
        xp.size * 2
        + (w1p.size + w2p.size + w3p.size) * 2
        + (b1p.size + b2p.size + b3p.size) * 4
        + bp * P_OUT * 4
    )

    out = pl.pallas_call(
        _mlp_kernel,
        out_shape=jax.ShapeDtypeStruct((bp, P_OUT), jnp.float32),
        grid=(n_tiles,),
        in_specs=[
            pl.BlockSpec((tm, P_IN), lambda i: (i, 0)),      # x tile (pipelined)
            pl.BlockSpec((P_IN, P_HID), lambda i: (0, 0)),   # w1 resident
            pl.BlockSpec((1, P_HID), lambda i: (0, 0)),      # b1 resident
            pl.BlockSpec((P_HID, P_HID), lambda i: (0, 0)),  # w2 resident
            pl.BlockSpec((1, P_HID), lambda i: (0, 0)),      # b2 resident
            pl.BlockSpec((P_HID, P_OUT), lambda i: (0, 0)),  # w3 resident
            pl.BlockSpec((1, P_OUT), lambda i: (0, 0)),      # b3 resident
        ],
        out_specs=pl.BlockSpec((tm, P_OUT), lambda i: (i, 0)),
        compiler_params=pltpu.CompilerParams(
            dimension_semantics=("parallel",),
            vmem_limit_bytes=48 * 1024 * 1024,  # headroom for TM=1024; < v7x 64 MiB physical
        ),
        cost_estimate=pl.CostEstimate(
            flops=flops, transcendentals=0, bytes_accessed=bytes_accessed
        ),
    )(xp, w1p, b1p, w2p, b2p, w3p, b3p)

    return out[:batch, :D_OUT]


def init_params(key):
    """Deterministic synthetic parameters with PyTorch Linear init-style scaling."""
    def linear(key, fan_in, fan_out):
        kw, kb = jax.random.split(key)
        bound = 1.0 / jnp.sqrt(fan_in)
        # stored as (in, out) so the kernel can do x @ W
        w = jax.random.uniform(kw, (fan_in, fan_out), jnp.float32, -bound, bound)
        b = jax.random.uniform(kb, (1, fan_out), jnp.float32, -bound, bound)
        return w, b

    k1, k2, k3 = jax.random.split(key, 3)
    w1, b1 = linear(k1, D_IN, D_HID)
    w2, b2 = linear(k2, D_HID, D_HID)
    w3, b3 = linear(k3, D_HID, D_OUT)
    return (w1, b1, w2, b2, w3, b3)


def reference_forward_f32(x, params):
    """Pure-f32 JAX reference of the original PyTorch forward."""
    w1, b1, w2, b2, w3, b3 = params
    h = x.reshape(-1, D_IN).astype(jnp.float32)
    h = jnp.maximum(h @ w1 + b1, 0.0)
    h = jnp.maximum(h @ w2 + b2, 0.0)
    return h @ w3 + b3


def reference_forward_bf16(x, params):
    """Pure-JAX reference mirroring the kernel's bf16-matmul / f32-accumulate math."""
    w1, b1, w2, b2, w3, b3 = params
    h = x.reshape(-1, D_IN).astype(jnp.bfloat16)
    h = jnp.dot(h, w1.astype(jnp.bfloat16), preferred_element_type=jnp.float32)
    h = jnp.maximum(h + b1, 0.0).astype(jnp.bfloat16)
    h = jnp.dot(h, w2.astype(jnp.bfloat16), preferred_element_type=jnp.float32)
    h = jnp.maximum(h + b2, 0.0).astype(jnp.bfloat16)
    return jnp.dot(h, w3.astype(jnp.bfloat16), preferred_element_type=jnp.float32) + b3


if __name__ == "__main__":
    key = jax.random.PRNGKey(0)
    kx, kp, kx2 = jax.random.split(key, 3)

    params = init_params(kp)
    padded_params = prepare_params(params)   # one-time padding/bf16 cast

    fwd = jax.jit(student_net_forward)

    # Small MNIST-like batch: (B=2, C=1, H=28, W=28), NCHW like the PyTorch module.
    x = jax.random.normal(kx, (2, 1, 28, 28), jnp.float32)
    out = jax.block_until_ready(fwd(x, padded_params))
    assert out.shape == (2, 10)

    # Tight check vs a reference using identical bf16 quantization.
    ref_bf16 = reference_forward_bf16(x, params)
    assert jnp.allclose(out, ref_bf16, atol=2e-3, rtol=2e-3), "mismatch vs bf16 reference"
    # Looser check vs the pure-f32 PyTorch-equivalent forward.
    ref_f32 = reference_forward_f32(x, params)
    assert jnp.allclose(out, ref_f32, atol=5e-2, rtol=5e-2), "mismatch vs f32 reference"

    # Slightly larger batch to exercise the 2-tile grid path (megacore sharding).
    x2 = jax.random.normal(kx2, (48, 1, 28, 28), jnp.float32)
    out2 = jax.block_until_ready(fwd(x2, padded_params))
    assert out2.shape == (48, 10)
    ref2 = reference_forward_bf16(x2, params)
    assert jnp.allclose(out2, ref2, atol=2e-3, rtol=2e-3), "mismatch (multi-tile)"

    print("KERNEL_OK")
</pallas_src>

<mosaic_0001>
module attributes {stable_mosaic.version = 11 : i64} {
  func.func @_mlp_kernel(%arg0: i32, %arg1: memref<8x896xbf16, #tpu.memory_space<vmem>>, %arg2: memref<896x896xbf16, #tpu.memory_space<vmem>>, %arg3: memref<1x896xf32, #tpu.memory_space<vmem>>, %arg4: memref<896x896xbf16, #tpu.memory_space<vmem>>, %arg5: memref<1x896xf32, #tpu.memory_space<vmem>>, %arg6: memref<896x128xbf16, #tpu.memory_space<vmem>>, %arg7: memref<1x128xf32, #tpu.memory_space<vmem>>, %arg8: memref<8x128xf32, #tpu.memory_space<vmem>>) attributes {dimension_semantics = [#tpu.dimension_semantics<parallel>], iteration_bounds = array<i64: 1>, scalar_prefetch = 0 : i64, scratch_operands = 0 : i64, tpu.core_type = #tpu.core_type<tc>, window_params = [{transform_indices = @transform_0, window_bounds = array<i64: 8, 896>}, {pipeline_mode = #tpu.pipeline_mode<synchronous>, transform_indices = @transform_1, window_bounds = array<i64: 896, 896>}, {pipeline_mode = #tpu.pipeline_mode<synchronous>, transform_indices = @transform_2, window_bounds = array<i64: 1, 896>}, {pipeline_mode = #tpu.pipeline_mode<synchronous>, transform_indices = @transform_3, window_bounds = array<i64: 896, 896>}, {pipeline_mode = #tpu.pipeline_mode<synchronous>, transform_indices = @transform_4, window_bounds = array<i64: 1, 896>}, {pipeline_mode = #tpu.pipeline_mode<synchronous>, transform_indices = @transform_5, window_bounds = array<i64: 896, 128>}, {pipeline_mode = #tpu.pipeline_mode<synchronous>, transform_indices = @transform_6, window_bounds = array<i64: 1, 128>}, {transform_indices = @transform_7, window_bounds = array<i64: 8, 128>}]} {
    %c0 = arith.constant 0 : index
    %c0_0 = arith.constant 0 : index
    %0 = vector.load %arg1[%c0, %c0_0] : memref<8x896xbf16, #tpu.memory_space<vmem>>, vector<8x896xbf16>
    %c0_1 = arith.constant 0 : index
    %c0_2 = arith.constant 0 : index
    %1 = vector.load %arg2[%c0_1, %c0_2] : memref<896x896xbf16, #tpu.memory_space<vmem>>, vector<896x896xbf16>
    %cst = arith.constant dense<0.000000e+00> : vector<8x896xf32>
    %2 = tpu.matmul %0, %1, %cst {dimension_numbers = #tpu.dot_dimension_numbers<[1], [0], [0], [1], [0, 0, 1, 1], [], []>} : vector<8x896xbf16>, vector<896x896xbf16>, vector<8x896xf32> -> vector<8x896xf32>
    %c0_3 = arith.constant 0 : index
    %c0_4 = arith.constant 0 : index
    %3 = vector.load %arg3[%c0_3, %c0_4] : memref<1x896xf32, #tpu.memory_space<vmem>>, vector<1x896xf32>
    %4 = vector.broadcast %3 : vector<1x896xf32> to vector<8x896xf32>
    %5 = arith.addf %2, %4 : vector<8x896xf32>
    %cst_5 = arith.constant 0.000000e+00 : f32
    %6 = vector.broadcast %cst_5 : f32 to vector<8x896xf32>
    %7 = arith.maximumf %5, %6 : vector<8x896xf32>
    %8 = arith.truncf %7 : vector<8x896xf32> to vector<8x896xbf16>
    %c0_6 = arith.constant 0 : index
    %c0_7 = arith.constant 0 : index
    %9 = vector.load %arg4[%c0_6, %c0_7] : memref<896x896xbf16, #tpu.memory_space<vmem>>, vector<896x896xbf16>
    %cst_8 = arith.constant dense<0.000000e+00> : vector<8x896xf32>
    %10 = tpu.matmul %8, %9, %cst_8 {dimension_numbers = #tpu.dot_dimension_numbers<[1], [0], [0], [1], [0, 0, 1, 1], [], []>} : vector<8x896xbf16>, vector<896x896xbf16>, vector<8x896xf32> -> vector<8x896xf32>
    %c0_9 = arith.constant 0 : index
    %c0_10 = arith.constant 0 : index
    %11 = vector.load %arg5[%c0_9, %c0_10] : memref<1x896xf32, #tpu.memory_space<vmem>>, vector<1x896xf32>
    %12 = vector.broadcast %11 : vector<1x896xf32> to vector<8x896xf32>
    %13 = arith.addf %10, %12 : vector<8x896xf32>
    %cst_11 = arith.constant 0.000000e+00 : f32
    %14 = vector.broadcast %cst_11 : f32 to vector<8x896xf32>
    %15 = arith.maximumf %13, %14 : vector<8x896xf32>
    %16 = arith.truncf %15 : vector<8x896xf32> to vector<8x896xbf16>
    %c0_12 = arith.constant 0 : index
    %c0_13 = arith.constant 0 : index
    %17 = vector.load %arg6[%c0_12, %c0_13] : memref<896x128xbf16, #tpu.memory_space<vmem>>, vector<896x128xbf16>
    %cst_14 = arith.constant dense<0.000000e+00> : vector<8x128xf32>
    %18 = tpu.matmul %16, %17, %cst_14 {dimension_numbers = #tpu.dot_dimension_numbers<[1], [0], [0], [1], [0, 0, 1, 1], [], []>} : vector<8x896xbf16>, vector<896x128xbf16>, vector<8x128xf32> -> vector<8x128xf32>
    %c0_15 = arith.constant 0 : index
    %c0_16 = arith.constant 0 : index
    %19 = vector.load %arg7[%c0_15, %c0_16] : memref<1x128xf32, #tpu.memory_space<vmem>>, vector<1x128xf32>
    %20 = vector.broadcast %19 : vector<1x128xf32> to vector<8x128xf32>
    %21 = arith.addf %18, %20 : vector<8x128xf32>
    %c0_17 = arith.constant 0 : index
    %c0_18 = arith.constant 0 : index
    %22 = vector.load %arg8[%c0_17, %c0_18] : memref<8x128xf32, #tpu.memory_space<vmem>>, vector<8x128xf32>
    tpu.vector_store %arg8[%c0_17, %c0_18], %21 {strides = array<i32>} : memref<8x128xf32, #tpu.memory_space<vmem>>, vector<8x128xf32>,
    return
  }
  func.func @transform_0(%arg0: i32) -> (i32, i32) {
    %c0_i32 = arith.constant 0 : i32
    %c0_i32_0 = arith.constant 0 : i32
    return %arg0, %c0_i32 : i32, i32
  }
  func.func @transform_1(%arg0: i32) -> (i32, i32) {
    %c0_i32 = arith.constant 0 : i32
    %c0_i32_0 = arith.constant 0 : i32
    %c0_i32_1 = arith.constant 0 : i32
    return %c0_i32, %c0_i32_0 : i32, i32
  }
  func.func @transform_2(%arg0: i32) -> (i32, i32) {
    %c0_i32 = arith.constant 0 : i32
    %c0_i32_0 = arith.constant 0 : i32
    %c0_i32_1 = arith.constant 0 : i32
    return %c0_i32, %c0_i32_0 : i32, i32
  }
  func.func @transform_3(%arg0: i32) -> (i32, i32) {
    %c0_i32 = arith.constant 0 : i32
    %c0_i32_0 = arith.constant 0 : i32
    %c0_i32_1 = arith.constant 0 : i32
    return %c0_i32, %c0_i32_0 : i32, i32
  }
  func.func @transform_4(%arg0: i32) -> (i32, i32) {
    %c0_i32 = arith.constant 0 : i32
    %c0_i32_0 = arith.constant 0 : i32
    %c0_i32_1 = arith.constant 0 : i32
    return %c0_i32, %c0_i32_0 : i32, i32
  }
  func.func @transform_5(%arg0: i32) -> (i32, i32) {
    %c0_i32 = arith.constant 0 : i32
    %c0_i32_0 = arith.constant 0 : i32
    %c0_i32_1 = arith.constant 0 : i32
    return %c0_i32, %c0_i32_0 : i32, i32
  }
  func.func @transform_6(%arg0: i32) -> (i32, i32) {
    %c0_i32 = arith.constant 0 : i32
    %c0_i32_0 = arith.constant 0 : i32
    %c0_i32_1 = arith.constant 0 : i32
    return %c0_i32, %c0_i32_0 : i32, i32
  }
  func.func @transform_7(%arg0: i32) -> (i32, i32) {
    %c0_i32 = arith.constant 0 : i32
    %c0_i32_0 = arith.constant 0 : i32
    return %arg0, %c0_i32 : i32, i32
  }
}

</mosaic_0001>

<bundles_post_ra>
// kernel: student_net_forward.1
= control target key start
LH: loop header
LB: loop body
LE: loop exit
PB: predicated region body
PF: predicated region fallthrough
CT: control target
= control target key end

     0   :  { %12 = vsyncpa [#allocation3], 0  ;;  %s9986_s0 = inlined_call_operand.vmem [shape: bf16[8,896], index: 0, kind: input, shape index: {}]   ;;  %s9987_s1 = inlined_call_operand.hbm [shape: bf16[896,896], index: 1, kind: input, shape index: {}]   ;;  %s9988_s2 = inlined_call_operand.hbm [shape: f32[1,896], index: 2, kind: input, shape index: {}]   ;;  %s9989_s3 = inlined_call_operand.hbm [shape: bf16[896,896], index: 3, kind: input, shape index: {}]   ;;  %s9990_s4 = inlined_call_operand.hbm [shape: f32[1,896], index: 4, kind: input, shape index: {}]   ;;  %s9991_s5 = inlined_call_operand.hbm [shape: bf16[896,128], index: 5, kind: input, shape index: {}]   ;;  %s9992_s6 = inlined_call_operand.hbm [shape: f32[1,128], index: 6, kind: input, shape index: {}]   ;;  %s9993_s7 = inlined_call_operand.vmem [shape: f32[8,128], index: 7, kind: output, shape index: {}]  }
   0x1   :  { %13 = vsyncpa [#allocation5], 0 }
   0x2   :  { %14 = vsyncpa [#allocation8], 0 }
   0x3   :  { %15 = vsyncpa [#allocation11], 0  ;;  %s9645_s24 = smov [#allocation4]   ;;  %s9646_s26 = smov [#allocation7]  }
   0x4   :  { %s36_s25 = sshll.u32 %s9645_s24, 4  ;;  %s58_s27 = sshll.u32 %s9646_s26, 4  ;;  %s37_s25 = int_to_ptr.vmem [resolvable:$true] %s36_s25  ;;  %s59_s27 = int_to_ptr.vmem [resolvable:$true] %s58_s27 }
   0x5   :  { %s9505_s30 = scalar_lea.hbm %s9988_s2, 112 }
   0x6   :  { %p9506_p0 = scmp.ne.s32.totalorder %s9988_s2, %s9505_s30  ;;  %p9509_p1 = scmp.lt.u32.totalorder %s9505_s30, %s9988_s2 }
   0x8   :  { %p9511_p2 = pnand %p9509_p1, %p9506_p0 }
   0xa   :  { %9514 = shalt.err (!%p9511_p2)
}
   0xb   :  { %s9515_s12 = scalar_lea.vmem %s37_s25, 112  ;;  %s9519_s13 = scalar_lea.vmem %s37_s25, 128 }
   0xc   :  { %p9516_p3 = scmp.ne.s32.totalorder %s37_s25, %s9515_s12  ;;  %p9520_p4 = scmp.lt.s32.totalorder %s37_s25, %s37_s25 }
   0xd   :  { %p9521_p5 = scmp.lt.s32.totalorder %s9519_s13, %s9515_s12 }
   0xf   :  { %p9522_p6 = por %p9521_p5, %p9520_p4 }
  0x11   :  { %p9523_p7 = pnand %p9522_p6, %p9516_p3 }
  0x13   :  { %9526 = shalt.err (!%p9523_p7)
}
  0x14   :  { %39 = dma.hbm_to_vmem [thread:$0]  %s9988_s2, 112, %s37_s25, [#allocation5]  }
  0x15   :  { %s9527_s18 = scalar_lea.hbm %s9990_s4, 112 }
  0x16   :  { %p9528_p8 = scmp.ne.s32.totalorder %s9990_s4, %s9527_s18  ;;  %p9531_p9 = scmp.lt.u32.totalorder %s9527_s18, %s9990_s4 }
  0x18   :  { %p9533_p10 = pnand %p9531_p9, %p9528_p8 }
  0x1a   :  { %9536 = shalt.err (!%p9533_p10)
}
  0x1b   :  { %s9537_s23 = scalar_lea.vmem %s59_s27, 112  ;;  %s9541_s24 = scalar_lea.vmem %s59_s27, 128 }
  0x1c   :  { %p9538_p11 = scmp.ne.s32.totalorder %s59_s27, %s9537_s23  ;;  %p9542_p12 = scmp.lt.s32.totalorder %s59_s27, %s59_s27 }
  0x1d   :  { %p9543_p13 = scmp.lt.s32.totalorder %s9541_s24, %s9537_s23 }
  0x1f   :  { %p9544_p0 = por %p9543_p13, %p9542_p12 }
  0x21   :  { %p9545_p1 = pnand %p9544_p0, %p9538_p11 }
  0x23   :  { %9548 = shalt.err (!%p9545_p1)
}
  0x24   :  { %61 = dma.hbm_to_vmem [thread:$0]  %s9990_s4, 112, %s59_s27, [#allocation8]  }
  0x25   :  { %s9647_s26 = smov [#allocation2]   ;;  %s9549_s8 = scalar_lea.hbm %s9987_s1, 50176 }
  0x26   :  { %s23_s28 = sshll.u32 %s9647_s26, 4  ;;  %p9550_p2 = scmp.ne.s32.totalorder %s9987_s1, %s9549_s8  ;;  %s24_s28 = int_to_ptr.vmem [resolvable:$true] %s23_s28 }
  0x27   :  { %p9553_p3 = scmp.lt.u32.totalorder %s9549_s8, %s9987_s1 }
  0x29   :  { %p9555_p4 = pnand %p9553_p3, %p9550_p2 }
  0x2b   :  { %9558 = shalt.err (!%p9555_p4)
}
  0x2c   :  { %s9559_s13 = scalar_lea.vmem %s24_s28, 50176  ;;  %p9564_p6 = scmp.lt.s32.totalorder %s24_s28, %s24_s28 }
  0x2d   :  { %p9560_p5 = scmp.ne.s32.totalorder %s24_s28, %s9559_s13  ;;  %p9565_p7 = scmp.lt.s32.totalorder %s9559_s13, %s9559_s13 }
  0x2f   :  { %p9566_p8 = por %p9565_p7, %p9564_p6 }
  0x31   :  { %p9567_p9 = pnand %p9566_p8, %p9560_p5 }
  0x33   :  { %9570 = shalt.err (!%p9567_p9)
}
  0x34   :  { %s9648_s4 = smov 448   ;;  %s9649_s27 = smov 28  }
  0x35   :  { %29 = dma.hbm_to_vmem [thread:$0]  %s9987_s1, 50176, %s24_s28, [#allocation3], %s9648_s4, %s9648_s4, %s9649_s27  }
  0x36   :  { %s9650_s16 = smov [#allocation6]   ;;  %s9651_s18 = smov [#allocation9]  }
  0x37   :  { %s45_s17 = sshll.u32 %s9650_s16, 4  ;;  %s67_s19 = sshll.u32 %s9651_s18, 4  ;;  %s46_s17 = int_to_ptr.vmem [resolvable:$true] %s45_s17  ;;  %s68_s19 = int_to_ptr.vmem [resolvable:$true] %s67_s19 }
  0x38   :  { %s9571_s22 = scalar_lea.hbm %s9989_s3, 50176 }
  0x39   :  { %p9572_p10 = scmp.ne.s32.totalorder %s9989_s3, %s9571_s22  ;;  %p9575_p11 = scmp.lt.u32.totalorder %s9571_s22, %s9989_s3 }
  0x3b   :  { %p9577_p12 = pnand %p9575_p11, %p9572_p10 }
  0x3d   :  { %9580 = shalt.err (!%p9577_p12)
}
  0x3e   :  { %s9581_s1 = scalar_lea.vmem %s46_s17, 50176  ;;  %p9586_p0 = scmp.lt.s32.totalorder %s46_s17, %s46_s17 }
  0x3f   :  { %p9582_p13 = scmp.ne.s32.totalorder %s46_s17, %s9581_s1  ;;  %p9587_p1 = scmp.lt.s32.totalorder %s9581_s1, %s9581_s1 }
  0x41   :  { %p9588_p2 = por %p9587_p1, %p9586_p0 }
  0x43   :  { %p9589_p3 = pnand %p9588_p2, %p9582_p13 }
  0x45   :  { %9592 = shalt.err (!%p9589_p3)
}
  0x46   :  { %51 = dma.hbm_to_vmem [thread:$0]  %s9989_s3, 50176, %s46_s17, [#allocation5], %s9648_s4, %s9648_s4, %s9649_s27  }
  0x47   :  { %s9593_s8 = scalar_lea.hbm %s9991_s5, 7168 }
  0x48   :  { %p9594_p4 = scmp.ne.s32.totalorder %s9991_s5, %s9593_s8  ;;  %p9597_p5 = scmp.lt.u32.totalorder %s9593_s8, %s9991_s5 }
  0x4a   :  { %p9599_p6 = pnand %p9597_p5, %p9594_p4 }
  0x4c   :  { %9602 = shalt.err (!%p9599_p6)
}
  0x4d   :  { %s9603_s13 = scalar_lea.vmem %s68_s19, 7168  ;;  %p9608_p8 = scmp.lt.s32.totalorder %s68_s19, %s68_s19 }
  0x4e   :  { %p9604_p7 = scmp.ne.s32.totalorder %s68_s19, %s9603_s13  ;;  %p9609_p9 = scmp.lt.s32.totalorder %s9603_s13, %s9603_s13 }
  0x50   :  { %p9610_p10 = por %p9609_p9, %p9608_p8 }
  0x52   :  { %p9611_p11 = pnand %p9610_p10, %p9604_p7 }
  0x54   :  { %9614 = shalt.err (!%p9611_p11)
}
  0x55   :  { %s9652_s3 = smov 64   ;;  %s9653_s4 = smov 4  }
  0x56   :  { %73 = dma.hbm_to_vmem [thread:$0]  %s9991_s5, 7168, %s68_s19, [#allocation8], %s9652_s3, %s9652_s3, %s9653_s4  }
  0x57   :  { %s9654_s15 = smov [#allocation10]   ;;  %s9615_s20 = scalar_lea.hbm %s9992_s6, 16 }
  0x58   :  { %s80_s16 = sshll.u32 %s9654_s15, 4  ;;  %p9616_p12 = scmp.ne.s32.totalorder %s9992_s6, %s9615_s20  ;;  %s81_s16 = int_to_ptr.vmem [resolvable:$true] %s80_s16 }
  0x59   :  { %p9619_p13 = scmp.lt.u32.totalorder %s9615_s20, %s9992_s6 }
  0x5b   :  { %p9621_p0 = pnand %p9619_p13, %p9616_p12 }
  0x5d   :  { %9624 = shalt.err (!%p9621_p0)
}
  0x5e   :  { %s9625_s2 = scalar_lea.vmem %s81_s16, 16  ;;  %s9629_s5 = scalar_lea.vmem %s81_s16, 32 }
  0x5f   :  { %p9626_p1 = scmp.ne.s32.totalorder %s81_s16, %s9625_s2  ;;  %p9630_p2 = scmp.lt.s32.totalorder %s81_s16, %s81_s16 }
  0x60   :  { %p9631_p3 = scmp.lt.s32.totalorder %s9629_s5, %s9625_s2 }
  0x62   :  { %p9632_p4 = por %p9631_p3, %p9630_p2 }
  0x64   :  { %p9633_p5 = pnand %p9632_p4, %p9626_p1 }
  0x66   :  { %9636 = shalt.err (!%p9633_p5)
}
  0x67   :  { %83 = dma.hbm_to_vmem [thread:$0]  %s9992_s6, 16, %s81_s16, [#allocation11]  }
  0x68   :  { %9637 = dma.done.wait [#allocation3], 50176  }
  0x69   :  { %9638 = vsyncadd [#allocation3], 4294917120 }
  0x6a   :  { %9639 = dma.done.wait [#allocation5], 50288  }
  0x6b   :  { %9640 = vsyncadd [#allocation5], 4294917008 }
  0x6c   :  { %9641 = dma.done.wait [#allocation8], 7280  }
  0x6d   :  { %9642 = vsyncadd [#allocation8], 4294960016 }
  0x6e   :  { %9643 = dma.done.wait [#allocation11], 16  }
  0x6f   :  { %9644 = vsyncadd [#allocation11], 4294967280  ;;  %v8320_v0 = vld [vmem:[#allocation2 + $0x4] ss:$28 sps:$4 sm:$0xff]   ;;  %v8322_v1 = vld [vmem:[#allocation2 + $0xc] ss:$28 sps:$4 sm:$0xff]  }
  0x70   :  { %2633 = vmatprep.subr.bf16.mxu0 %v8320_v0  ;;  %v8324_v2 = vld [vmem:[#allocation2] ss:$28 sps:$4 sm:$0xff]   ;;  %v8325_v3 = vld [vmem:[#allocation2 + $0x8] ss:$28 sps:$4 sm:$0xff]   ;;  %2797 = vmatprep.subr.bf16.mxu1 %v8322_v1  ;;  %v8330_v6 = vld [vmem:[#allocation2 + $0x38] ss:$28 sps:$4 sm:$0xff]  }
  0x71   :  { %v8326_v4 = vld [vmem:[#allocation2 + $0x3c] ss:$28 sps:$4 sm:$0xff]   ;;  %2634 = vmatpush1.bf16.msra.mxu0 %v8324_v2  ;;  %2798 = vmatpush1.bf16.msra.mxu1 %v8325_v3  ;;  %v8328_v5 = vld [vmem:[#allocation2 + $0x44] ss:$28 sps:$4 sm:$0xff]   ;;  %v8332_v8 = vld [vmem:[#allocation2 + $0x74] ss:$28 sps:$4 sm:$0xff]  }
  0x72   :  { %2635 = vmatprep.subr.bf16.mxu0 %v8326_v4  ;;  %v8331_v7 = vld [vmem:[#allocation2 + $0x40] ss:$28 sps:$4 sm:$0xff]   ;;  %2799 = vmatprep.subr.bf16.mxu1 %v8328_v5  ;;  %v8336_v10 = vld [vmem:[#allocation2 + $0x70] ss:$28 sps:$4 sm:$0xff]   ;;  %v8337_v11 = vld [vmem:[#allocation2 + $0x78] ss:$28 sps:$4 sm:$0xff]  }
  0x73   :  { %v8334_v9 = vld [vmem:[#allocation2 + $0x7c] ss:$28 sps:$4 sm:$0xff]   ;;  %v8338_v12 = vld [vmem:[#allocation2 + $0xac] ss:$28 sps:$4 sm:$0xff]   ;;  %v8340_v13 = vld [vmem:[#allocation2 + $0xb4] ss:$28 sps:$4 sm:$0xff]  }
  0x74   :  { %v8342_v14 = vld [vmem:[#allocation2 + $0xa8] ss:$28 sps:$4 sm:$0xff]   ;;  %v8343_v15 = vld [vmem:[#allocation2 + $0xb0] ss:$28 sps:$4 sm:$0xff]   ;;  %v8348_v18 = vld [vmem:[#allocation2 + $0xe0] ss:$28 sps:$4 sm:$0xff]  }
  0x75   :  { %2636 = vmatpush1.bf16.msra.mxu0 %v8330_v6  ;;  %2800 = vmatpush1.bf16.msra.mxu1 %v8331_v7  ;;  %v8344_v16 = vld [vmem:[#allocation2 + $0xe4] ss:$28 sps:$4 sm:$0xff]   ;;  %v8346_v17 = vld [vmem:[#allocation2 + $0xec] ss:$28 sps:$4 sm:$0xff]   ;;  %v8350_v20 = vld [vmem:[#allocation2 + $0x11c] ss:$28 sps:$4 sm:$0xff]  }
  0x76   :  { %2637 = vmatprep.subr.bf16.mxu0 %v8332_v8  ;;  %2801 = vmatprep.subr.bf16.mxu1 %v8334_v9  ;;  %v8349_v19 = vld [vmem:[#allocation2 + $0xe8] ss:$28 sps:$4 sm:$0xff]   ;;  %v8354_v22 = vld [vmem:[#allocation2 + $0x118] ss:$28 sps:$4 sm:$0xff]   ;;  %v8355_v23 = vld [vmem:[#allocation2 + $0x120] ss:$28 sps:$4 sm:$0xff]  }
  0x77   :  { %v8352_v21 = vld [vmem:[#allocation2 + $0x124] ss:$28 sps:$4 sm:$0xff]   ;;  %v8356_v24 = vld [vmem:[#allocation2 + $0x154] ss:$28 sps:$4 sm:$0xff]   ;;  %v8358_v25 = vld [vmem:[#allocation2 + $0x15c] ss:$28 sps:$4 sm:$0xff]  }
  0x78   :  { %v8360_v26 = vld [vmem:[#allocation2 + $0x150] ss:$28 sps:$4 sm:$0xff]   ;;  %v8361_v27 = vld [vmem:[#allocation2 + $0x158] ss:$28 sps:$4 sm:$0xff]   ;;  %v8366_v30 = vld [vmem:[#allocation2 + $0x188] ss:$28 sps:$4 sm:$0xff]  }
  0x79   :  { %2638 = vmatpush1.bf16.msra.mxu0 %v8336_v10  ;;  %2802 = vmatpush1.bf16.msra.mxu1 %v8337_v11  ;;  %v8362_v28 = vld [vmem:[#allocation2 + $0x18c] ss:$28 sps:$4 sm:$0xff]   ;;  %v8364_v29 = vld [vmem:[#allocation2 + $0x194] ss:$28 sps:$4 sm:$0xff]   ;;  %v8368_v32 = vld [vmem:[#allocation2 + $0x1c4] ss:$28 sps:$4 sm:$0xff]  }
  0x7a   :  { %2639 = vmatprep.subr.bf16.mxu0 %v8338_v12  ;;  %2803 = vmatprep.subr.bf16.mxu1 %v8340_v13  ;;  %v8367_v31 = vld [vmem:[#allocation2 + $0x190] ss:$28 sps:$4 sm:$0xff]   ;;  %v8372_v34 = vld [vmem:[#allocation2 + $0x1c0] ss:$28 sps:$4 sm:$0xff]   ;;  %v8373_v35 = vld [vmem:[#allocation2 + $0x1c8] ss:$28 sps:$4 sm:$0xff]  }
  0x7b   :  { %v8370_v33 = vld [vmem:[#allocation2 + $0x1cc] ss:$28 sps:$4 sm:$0xff]   ;;  %v8374_v36 = vld [vmem:[#allocation2 + $0x1fc] ss:$28 sps:$4 sm:$0xff]   ;;  %v8376_v37 = vld [vmem:[#allocation2 + $0x204] ss:$28 sps:$4 sm:$0xff]  }
  0x7c   :  { %v8378_v38 = vld [vmem:[#allocation2 + $0x1f8] ss:$28 sps:$4 sm:$0xff]   ;;  %v8379_v39 = vld [vmem:[#allocation2 + $0x200] ss:$28 sps:$4 sm:$0xff]   ;;  %v8384_v42 = vld [vmem:[#allocation2 + $0x230] ss:$28 sps:$4 sm:$0xff]  }
  0x7d   :  { %2640 = vmatpush1.bf16.msra.mxu0 %v8342_v14  ;;  %2804 = vmatpush1.bf16.msra.mxu1 %v8343_v15  ;;  %v8380_v40 = vld [vmem:[#allocation2 + $0x234] ss:$28 sps:$4 sm:$0xff]   ;;  %v8382_v41 = vld [vmem:[#allocation2 + $0x23c] ss:$28 sps:$4 sm:$0xff]   ;;  %v8386_v44 = vld [vmem:[#allocation2 + $0x26c] ss:$28 sps:$4 sm:$0xff]  }
  0x7e   :  { %2641 = vmatprep.subr.bf16.mxu0 %v8344_v16  ;;  %2805 = vmatprep.subr.bf16.mxu1 %v8346_v17  ;;  %v8385_v43 = vld [vmem:[#allocation2 + $0x238] ss:$28 sps:$4 sm:$0xff]   ;;  %v103_v46 = vld [vmem:[%s9986_s0] sm:$0xff]  ;;  %v8391_v49 = vld [vmem:[#allocation2 + $0x270] ss:$28 sps:$4 sm:$0xff]   ;;  %vm9657_vm0 = vmmov 0  }
  0x7f   :  { %v8388_v45 = vld [vmem:[#allocation2 + $0x274] ss:$28 sps:$4 sm:$0xff]   ;;  %v8390_v47 = vld [vmem:[#allocation2 + $0x268] ss:$28 sps:$4 sm:$0xff]   ;;  %v9773_v48 = vcombine.high %v103_v46, %v103_v46  ;;  %v8396_v52 = vld [vmem:[#allocation2 + $0x2a0] ss:$28 sps:$4 sm:$0xff]   ;;  %v9777_v5 = vcombine.low %v103_v46, %v103_v46 }
  0x80   :  { %v8392_v50 = vld [vmem:[#allocation2 + $0x2a4] ss:$28 sps:$4 sm:$0xff]   ;;  %v8394_v51 = vld [vmem:[#allocation2 + $0x2ac] ss:$28 sps:$4 sm:$0xff]   ;;  %v8398_v54 = vld [vmem:[#allocation2 + $0x2dc] ss:$28 sps:$4 sm:$0xff]  }
  0x81   :  { %2642 = vmatpush1.bf16.msra.mxu0 %v8348_v18  ;;  %2806 = vmatpush1.bf16.msra.mxu1 %v8349_v19  ;;  %v8397_v53 = vld [vmem:[#allocation2 + $0x2a8] ss:$28 sps:$4 sm:$0xff]   ;;  %v8402_v56 = vld [vmem:[#allocation2 + $0x2d8] ss:$28 sps:$4 sm:$0xff]   ;;  %v8403_v57 = vld [vmem:[#allocation2 + $0x2e0] ss:$28 sps:$4 sm:$0xff]  }
  0x82   :  { %2643 = vmatprep.subr.bf16.mxu0 %v8350_v20  ;;  %2807 = vmatprep.subr.bf16.mxu1 %v8352_v21  ;;  %v8400_v55 = vld [vmem:[#allocation2 + $0x2e4] ss:$28 sps:$4 sm:$0xff]   ;;  %v8404_v58 = vld [vmem:[#allocation2 + $0x314] ss:$28 sps:$4 sm:$0xff]   ;;  %v8406_v59 = vld [vmem:[#allocation2 + $0x31c] ss:$28 sps:$4 sm:$0xff]  }
  0x83   :  { %2665 = vmatprep.mubr.bf16.mxu0 %v9773_v48  ;;  %2829 = vmatprep.mubr.bf16.mxu1 %v9773_v48  ;;  %v8408_v60 = vld [vmem:[#allocation2 + $0x310] ss:$28 sps:$4 sm:$0xff]   ;;  %v8409_v61 = vld [vmem:[#allocation2 + $0x318] ss:$28 sps:$4 sm:$0xff]   ;;  %v8414_v0 = vld [vmem:[#allocation2 + $0x348] ss:$28 sps:$4 sm:$0xff]  }
  0x84   :  { %v8410_v62 = vld [vmem:[#allocation2 + $0x34c] ss:$28 sps:$4 sm:$0xff]   ;;  %v8412_v63 = vld [vmem:[#allocation2 + $0x354] ss:$28 sps:$4 sm:$0xff]   ;;  %v8419_v2 = vld [vmem:[#allocation2 + $0x384] ss:$28 sps:$4 sm:$0xff]  }
  0x85   :  { %2644 = vmatpush1.bf16.msra.mxu0 %v8354_v22  ;;  %2808 = vmatpush1.bf16.msra.mxu1 %v8355_v23  ;;  %v8415_v1 = vld [vmem:[#allocation2 + $0x350] ss:$28 sps:$4 sm:$0xff]   ;;  %v8417_v4 = vld [vmem:[#allocation2 + $0x380] ss:$28 sps:$4 sm:$0xff]   ;;  %v8420_v6 = vld [vmem:[#allocation2 + $0x388] ss:$28 sps:$4 sm:$0xff]  }
  0x86   :  { %2645 = vmatprep.subr.bf16.mxu0 %v8356_v24  ;;  %2809 = vmatprep.subr.bf16.mxu1 %v8358_v25  ;;  %v8422_v3 = vld [vmem:[#allocation2 + $0x38c] ss:$28 sps:$4 sm:$0xff]   ;;  %v8426_v7 = vld [vmem:[#allocation2 + $0x3bc] ss:$28 sps:$4 sm:$0xff]   ;;  %v8429_v8 = vld [vmem:[#allocation2 + $0x3c4] ss:$28 sps:$4 sm:$0xff]  }
  0x87   :  { %v8424_v9 = vld [vmem:[#allocation2 + $0x3b8] ss:$28 sps:$4 sm:$0xff]   ;;  %v8427_v10 = vld [vmem:[#allocation2 + $0x3c0] ss:$28 sps:$4 sm:$0xff]   ;;  %v8430_v13 = vld [vmem:[#allocation2 + $0x3f0] ss:$28 sps:$4 sm:$0xff]  }
  0x88   :  { %v8432_v11 = vld [vmem:[#allocation2 + $0x3f4] ss:$28 sps:$4 sm:$0xff]   ;;  %v8435_v12 = vld [vmem:[#allocation2 + $0x3fc] ss:$28 sps:$4 sm:$0xff]   ;;  %v8438_v15 = vld [vmem:[#allocation2 + $0x42c] ss:$28 sps:$4 sm:$0xff]  }
  0x89   :  { %2646 = vmatpush1.bf16.msra.mxu0 %v8360_v26  ;;  %2810 = vmatpush1.bf16.msra.mxu1 %v8361_v27  ;;  %v8433_v14 = vld [vmem:[#allocation2 + $0x3f8] ss:$28 sps:$4 sm:$0xff]   ;;  %v8436_v17 = vld [vmem:[#allocation2 + $0x428] ss:$28 sps:$4 sm:$0xff]   ;;  %v8439_v18 = vld [vmem:[#allocation2 + $0x430] ss:$28 sps:$4 sm:$0xff]  }
  0x8a   :  { %2647 = vmatprep.subr.bf16.mxu0 %v8362_v28  ;;  %2811 = vmatprep.subr.bf16.mxu1 %v8364_v29  ;;  %v8441_v16 = vld [vmem:[#allocation2 + $0x434] ss:$28 sps:$4 sm:$0xff]   ;;  %v8444_v19 = vld [vmem:[#allocation2 + $0x464] ss:$28 sps:$4 sm:$0xff]   ;;  %v8447_v20 = vld [vmem:[#allocation2 + $0x46c] ss:$28 sps:$4 sm:$0xff]  }
  0x8b   :  { %v8442_v21 = vld [vmem:[#allocation2 + $0x460] ss:$28 sps:$4 sm:$0xff]   ;;  %v8445_v22 = vld [vmem:[#allocation2 + $0x468] ss:$28 sps:$4 sm:$0xff]   ;;  %v8448_v25 = vld [vmem:[#allocation2 + $0x498] ss:$28 sps:$4 sm:$0xff]  }
  0x8c   :  { %v8450_v23 = vld [vmem:[#allocation2 + $0x49c] ss:$28 sps:$4 sm:$0xff]   ;;  %v8453_v24 = vld [vmem:[#allocation2 + $0x4a4] ss:$28 sps:$4 sm:$0xff]   ;;  %v8456_v27 = vld [vmem:[#allocation2 + $0x4d4] ss:$28 sps:$4 sm:$0xff]  }
  0x8d   :  { %2648 = vmatpush1.bf16.msra.mxu0 %v8366_v30  ;;  %2812 = vmatpush1.bf16.msra.mxu1 %v8367_v31  ;;  %v8451_v26 = vld [vmem:[#allocation2 + $0x4a0] ss:$28 sps:$4 sm:$0xff]   ;;  %v9784_v29 = vld [vmem:[%s9986_s0 + $0x8] sm:$0xff] }
  0x8e   :  { %2649 = vmatprep.subr.bf16.mxu0 %v8368_v32  ;;  %2813 = vmatprep.subr.bf16.mxu1 %v8370_v33  ;;  %v8459_v28 = vld [vmem:[#allocation2 + $0x4dc] ss:$28 sps:$4 sm:$0xff]   ;;  %v9788_v30 = vcombine.high %v9784_v29, %v9784_v29  ;;  %v8454_v31 = vld [vmem:[#allocation2 + $0x4d0] ss:$28 sps:$4 sm:$0xff]  }
  0x8f   :  { %v8457_v32 = vld [vmem:[#allocation2 + $0x4d8] ss:$28 sps:$4 sm:$0xff]   ;;  %v8462_v33 = vld [vmem:[#allocation2 + $0x50c] ss:$28 sps:$4 sm:$0xff]  }
  0x90   :  { %v8483_v46 = vld [vmem:[#allocation2 + $0x5bc] ss:$28 sps:$4 sm:$0xff]  }
  0x91   :  { %2650 = vmatpush1.bf16.msra.mxu0 %v8372_v34  ;;  %2814 = vmatpush1.bf16.msra.mxu1 %v8373_v35  ;;  %v8465_v34 = vld [vmem:[#allocation2 + $0x514] ss:$28 sps:$4 sm:$0xff]   ;;  %v8460_v35 = vld [vmem:[#allocation2 + $0x508] ss:$28 sps:$4 sm:$0xff]  }
  0x92   :  { %2651 = vmatprep.subr.bf16.mxu0 %v8374_v36  ;;  %2815 = vmatprep.subr.bf16.mxu1 %v8376_v37  ;;  %v8463_v36 = vld [vmem:[#allocation2 + $0x510] ss:$28 sps:$4 sm:$0xff]   ;;  %v8468_v37 = vld [vmem:[#allocation2 + $0x544] ss:$28 sps:$4 sm:$0xff]  }
  0x95   :  { %2652 = vmatpush1.bf16.msra.mxu0 %v8378_v38  ;;  %2816 = vmatpush1.bf16.msra.mxu1 %v8379_v39  ;;  %v8471_v38 = vld [vmem:[#allocation2 + $0x54c] ss:$28 sps:$4 sm:$0xff]   ;;  %v8466_v39 = vld [vmem:[#allocation2 + $0x540] ss:$28 sps:$4 sm:$0xff]  }
  0x96   :  { %2653 = vmatprep.subr.bf16.mxu0 %v8380_v40  ;;  %2817 = vmatprep.subr.bf16.mxu1 %v8382_v41  ;;  %v8469_v40 = vld [vmem:[#allocation2 + $0x548] ss:$28 sps:$4 sm:$0xff]   ;;  %v8474_v41 = vld [vmem:[#allocation2 + $0x57c] ss:$28 sps:$4 sm:$0xff]  }
  0x99   :  { %2654 = vmatpush1.bf16.msra.mxu0 %v8384_v42  ;;  %2818 = vmatpush1.bf16.msra.mxu1 %v8385_v43  ;;  %v8477_v42 = vld [vmem:[#allocation2 + $0x584] ss:$28 sps:$4 sm:$0xff]   ;;  %v8472_v43 = vld [vmem:[#allocation2 + $0x578] ss:$28 sps:$4 sm:$0xff]  }
  0x9a   :  { %2655 = vmatprep.subr.bf16.mxu0 %v8386_v44  ;;  %2819 = vmatprep.subr.bf16.mxu1 %v8388_v45  ;;  %v8475_v44 = vld [vmem:[#allocation2 + $0x580] ss:$28 sps:$4 sm:$0xff]   ;;  %v8480_v45 = vld [vmem:[#allocation2 + $0x5b4] ss:$28 sps:$4 sm:$0xff]  }
  0x9d   :  { %2656 = vmatpush1.bf16.msra.mxu0 %v8390_v47  ;;  %2820 = vmatpush1.bf16.msra.mxu1 %v8391_v49  ;;  %v8478_v47 = vld [vmem:[#allocation2 + $0x5b0] ss:$28 sps:$4 sm:$0xff]   ;;  %v8481_v49 = vld [vmem:[#allocation2 + $0x5b8] ss:$28 sps:$4 sm:$0xff]  }
  0x9e   :  { %2657 = vmatprep.subr.bf16.mxu0 %v8392_v50  ;;  %2821 = vmatprep.subr.bf16.mxu1 %v8394_v51  ;;  %v8486_v50 = vld [vmem:[#allocation2 + $0x5ec] ss:$28 sps:$4 sm:$0xff]   ;;  %v8489_v51 = vld [vmem:[#allocation2 + $0x5f4] ss:$28 sps:$4 sm:$0xff]  }
  0xa1   :  { %2658 = vmatpush1.bf16.msra.mxu0 %v8396_v52  ;;  %2822 = vmatpush1.bf16.msra.mxu1 %v8397_v53  ;;  %v8484_v52 = vld [vmem:[#allocation2 + $0x5e8] ss:$28 sps:$4 sm:$0xff]   ;;  %v8487_v53 = vld [vmem:[#allocation2 + $0x5f0] ss:$28 sps:$4 sm:$0xff]  }
  0xa2   :  { %2659 = vmatprep.subr.bf16.mxu0 %v8398_v54  ;;  %2823 = vmatprep.subr.bf16.mxu1 %v8400_v55  ;;  %v8492_v54 = vld [vmem:[#allocation2 + $0x624] ss:$28 sps:$4 sm:$0xff]   ;;  %v8495_v55 = vld [vmem:[#allocation2 + $0x62c] ss:$28 sps:$4 sm:$0xff]  }
  0xa5   :  { %2660 = vmatpush1.bf16.msra.mxu0 %v8402_v56  ;;  %2824 = vmatpush1.bf16.msra.mxu1 %v8403_v57  ;;  %v8490_v56 = vld [vmem:[#allocation2 + $0x620] ss:$28 sps:$4 sm:$0xff]   ;;  %v8493_v57 = vld [vmem:[#allocation2 + $0x628] ss:$28 sps:$4 sm:$0xff]  }
  0xa6   :  { %2661 = vmatprep.subr.bf16.mxu0 %v8404_v58  ;;  %2825 = vmatprep.subr.bf16.mxu1 %v8406_v59  ;;  %v8498_v58 = vld [vmem:[#allocation2 + $0x65c] ss:$28 sps:$4 sm:$0xff]   ;;  %v8501_v59 = vld [vmem:[#allocation2 + $0x664] ss:$28 sps:$4 sm:$0xff]  }
  0xa9   :  { %2662 = vmatpush1.bf16.msra.mxu0 %v8408_v60  ;;  %2826 = vmatpush1.bf16.msra.mxu1 %v8409_v61  ;;  %v8496_v60 = vld [vmem:[#allocation2 + $0x658] ss:$28 sps:$4 sm:$0xff]   ;;  %v8499_v61 = vld [vmem:[#allocation2 + $0x660] ss:$28 sps:$4 sm:$0xff]  }
  0xaa   :  { %2663 = vmatprep.subr.bf16.mxu0 %v8410_v62  ;;  %2827 = vmatprep.subr.bf16.mxu1 %v8412_v63  ;;  %v8504_v62 = vld [vmem:[#allocation2 + $0x694] ss:$28 sps:$4 sm:$0xff]   ;;  %v8507_v63 = vld [vmem:[#allocation2 + $0x69c] ss:$28 sps:$4 sm:$0xff]  }
  0xad   :  { %2664 = vmatpush1.bf16.msra.mxu0 %v8414_v0  ;;  %2828 = vmatpush1.bf16.msra.mxu1 %v8415_v1  ;;  %v8502_v0 = vld [vmem:[#allocation2 + $0x690] ss:$28 sps:$4 sm:$0xff]   ;;  %v8505_v1 = vld [vmem:[#allocation2 + $0x698] ss:$28 sps:$4 sm:$0xff]  }
  0xae   :  { %2674 = vmatprep.subr.bf16.mxu0 %v8419_v2  ;;  %2838 = vmatprep.subr.bf16.mxu1 %v8422_v3  ;;  %v8510_v2 = vld [vmem:[#allocation2 + $0x6cc] ss:$28 sps:$4 sm:$0xff]   ;;  %v8513_v3 = vld [vmem:[#allocation2 + $0x6d4] ss:$28 sps:$4 sm:$0xff]  }
  0xb0   :  { %2666 = vmatmul.mubr.bf16.vlgmr.msra.gmra.mrb[0].mxu0 %v9777_v5  ;;  %2830 = vmatmul.mubr.bf16.vlgmr.msra.gmra.mrb[0].mxu1 %v9777_v5 }
  0xb1   :  { %2675 = vmatpush1.bf16.msra.mxu0 %v8417_v4  ;;  %2839 = vmatpush1.bf16.msra.mxu1 %v8420_v6  ;;  %v8508_v4 = vld [vmem:[#allocation2 + $0x6c8] ss:$28 sps:$4 sm:$0xff]   ;;  %v8511_v6 = vld [vmem:[#allocation2 + $0x6d0] ss:$28 sps:$4 sm:$0xff]  }
  0xb2   :  { %2676 = vmatprep.subr.bf16.mxu0 %v8426_v7  ;;  %2840 = vmatprep.subr.bf16.mxu1 %v8429_v8  ;;  %v8517_v7 = vld [vmem:[#allocation2 + $0x704] ss:$28 sps:$4 sm:$0xff]   ;;  %v8520_v8 = vld [vmem:[#allocation2 + $0x70c] ss:$28 sps:$4 sm:$0xff]  }
  0xb3   :  { %2706 = vmatprep.mubr.bf16.mxu0 %v9788_v30  ;;  %2870 = vmatprep.mubr.bf16.mxu1 %v9788_v30 }
  0xb5   :  { %2677 = vmatpush1.bf16.msra.mxu0 %v8424_v9  ;;  %2841 = vmatpush1.bf16.msra.mxu1 %v8427_v10  ;;  %v8515_v9 = vld [vmem:[#allocation2 + $0x700] ss:$28 sps:$4 sm:$0xff]   ;;  %v9794_v10 = vcombine.low %v9784_v29, %v9784_v29  ;;  %v8543_v29 = vld [vmem:[#allocation2 + $0x7e8] ss:$28 sps:$4 sm:$0xff]  }
  0xb6   :  { %2678 = vmatprep.subr.bf16.mxu0 %v8432_v11  ;;  %2842 = vmatprep.subr.bf16.mxu1 %v8435_v12  ;;  %v8518_v11 = vld [vmem:[#allocation2 + $0x708] ss:$28 sps:$4 sm:$0xff]   ;;  %v8524_v12 = vld [vmem:[#allocation2 + $0x73c] ss:$28 sps:$4 sm:$0xff]  }
  0xb9   :  { %2679 = vmatpush1.bf16.msra.mxu0 %v8430_v13  ;;  %2843 = vmatpush1.bf16.msra.mxu1 %v8433_v14  ;;  %v9799_v13 = vld [vmem:[%s9986_s0 + $0x10] sm:$0xff]  ;;  %v8527_v14 = vld [vmem:[#allocation2 + $0x744] ss:$28 sps:$4 sm:$0xff]  }
  0xba   :  { %2680 = vmatprep.subr.bf16.mxu0 %v8438_v15  ;;  %2844 = vmatprep.subr.bf16.mxu1 %v8441_v16  ;;  %v9803_v15 = vcombine.high %v9799_v13, %v9799_v13  ;;  %v8522_v16 = vld [vmem:[#allocation2 + $0x738] ss:$28 sps:$4 sm:$0xff]  }
  0xbd   :  { %2681 = vmatpush1.bf16.msra.mxu0 %v8436_v17  ;;  %2845 = vmatpush1.bf16.msra.mxu1 %v8439_v18  ;;  %v8525_v17 = vld [vmem:[#allocation2 + $0x740] ss:$28 sps:$4 sm:$0xff]   ;;  %v8530_v18 = vld [vmem:[#allocation2 + $0x774] ss:$28 sps:$4 sm:$0xff]  }
  0xbe   :  { %2682 = vmatprep.subr.bf16.mxu0 %v8444_v19  ;;  %2846 = vmatprep.subr.bf16.mxu1 %v8447_v20  ;;  %v8533_v19 = vld [vmem:[#allocation2 + $0x77c] ss:$28 sps:$4 sm:$0xff]   ;;  %v8528_v20 = vld [vmem:[#allocation2 + $0x770] ss:$28 sps:$4 sm:$0xff]  }
  0xc1   :  { %2683 = vmatpush1.bf16.msra.mxu0 %v8442_v21  ;;  %2847 = vmatpush1.bf16.msra.mxu1 %v8445_v22  ;;  %v8531_v21 = vld [vmem:[#allocation2 + $0x778] ss:$28 sps:$4 sm:$0xff]   ;;  %v8536_v22 = vld [vmem:[#allocation2 + $0x7ac] ss:$28 sps:$4 sm:$0xff]  }
  0xc2   :  { %2684 = vmatprep.subr.bf16.mxu0 %v8450_v23  ;;  %2848 = vmatprep.subr.bf16.mxu1 %v8453_v24  ;;  %v8539_v23 = vld [vmem:[#allocation2 + $0x7b4] ss:$28 sps:$4 sm:$0xff]   ;;  %v8534_v24 = vld [vmem:[#allocation2 + $0x7a8] ss:$28 sps:$4 sm:$0xff]  }
  0xc5   :  { %2685 = vmatpush1.bf16.msra.mxu0 %v8448_v25  ;;  %2849 = vmatpush1.bf16.msra.mxu1 %v8451_v26  ;;  %v8537_v25 = vld [vmem:[#allocation2 + $0x7b0] ss:$28 sps:$4 sm:$0xff]   ;;  %v8542_v26 = vld [vmem:[#allocation2 + $0x7e4] ss:$28 sps:$4 sm:$0xff]  }
  0xc6   :  { %2686 = vmatprep.subr.bf16.mxu0 %v8456_v27  ;;  %2850 = vmatprep.subr.bf16.mxu1 %v8459_v28  ;;  %v8545_v27 = vld [vmem:[#allocation2 + $0x7ec] ss:$28 sps:$4 sm:$0xff]   ;;  %v8540_v28 = vld [vmem:[#allocation2 + $0x7e0] ss:$28 sps:$4 sm:$0xff]  }
  0xc9   :  { %2687 = vmatpush1.bf16.msra.mxu0 %v8454_v31  ;;  %2851 = vmatpush1.bf16.msra.mxu1 %v8457_v32  ;;  %v8548_v31 = vld [vmem:[#allocation2 + $0x81c] ss:$28 sps:$4 sm:$0xff]   ;;  %v8551_v32 = vld [vmem:[#allocation2 + $0x824] ss:$28 sps:$4 sm:$0xff]  }
  0xca   :  { %2688 = vmatprep.subr.bf16.mxu0 %v8462_v33  ;;  %2852 = vmatprep.subr.bf16.mxu1 %v8465_v34  ;;  %v8546_v33 = vld [vmem:[#allocation2 + $0x818] ss:$28 sps:$4 sm:$0xff]   ;;  %v8549_v34 = vld [vmem:[#allocation2 + $0x820] ss:$28 sps:$4 sm:$0xff]  }
  0xcd   :  { %2689 = vmatpush1.bf16.msra.mxu0 %v8460_v35  ;;  %2853 = vmatpush1.bf16.msra.mxu1 %v8463_v36  ;;  %v8554_v35 = vld [vmem:[#allocation2 + $0x854] ss:$28 sps:$4 sm:$0xff]   ;;  %v8557_v36 = vld [vmem:[#allocation2 + $0x85c] ss:$28 sps:$4 sm:$0xff]  }
  0xce   :  { %2690 = vmatprep.subr.bf16.mxu0 %v8468_v37  ;;  %2854 = vmatprep.subr.bf16.mxu1 %v8471_v38  ;;  %v8552_v37 = vld [vmem:[#allocation2 + $0x850] ss:$28 sps:$4 sm:$0xff]   ;;  %v8555_v38 = vld [vmem:[#allocation2 + $0x858] ss:$28 sps:$4 sm:$0xff]  }
  0xd1   :  { %2691 = vmatpush1.bf16.msra.mxu0 %v8466_v39  ;;  %2855 = vmatpush1.bf16.msra.mxu1 %v8469_v40  ;;  %v8560_v39 = vld [vmem:[#allocation2 + $0x88c] ss:$28 sps:$4 sm:$0xff]   ;;  %v8563_v40 = vld [vmem:[#allocation2 + $0x894] ss:$28 sps:$4 sm:$0xff]  }
  0xd2   :  { %2692 = vmatprep.subr.bf16.mxu0 %v8474_v41  ;;  %2856 = vmatprep.subr.bf16.mxu1 %v8477_v42  ;;  %v8558_v41 = vld [vmem:[#allocation2 + $0x888] ss:$28 sps:$4 sm:$0xff]   ;;  %v8561_v42 = vld [vmem:[#allocation2 + $0x890] ss:$28 sps:$4 sm:$0xff]  }
  0xd5   :  { %2693 = vmatpush1.bf16.msra.mxu0 %v8472_v43  ;;  %2857 = vmatpush1.bf16.msra.mxu1 %v8475_v44  ;;  %v8566_v43 = vld [vmem:[#allocation2 + $0x8c4] ss:$28 sps:$4 sm:$0xff]   ;;  %v8569_v44 = vld [vmem:[#allocation2 + $0x8cc] ss:$28 sps:$4 sm:$0xff]  }
  0xd6   :  { %2694 = vmatprep.subr.bf16.mxu0 %v8480_v45  ;;  %2858 = vmatprep.subr.bf16.mxu1 %v8483_v46  ;;  %v8564_v45 = vld [vmem:[#allocation2 + $0x8c0] ss:$28 sps:$4 sm:$0xff]   ;;  %v8567_v46 = vld [vmem:[#allocation2 + $0x8c8] ss:$28 sps:$4 sm:$0xff]  }
  0xd9   :  { %2695 = vmatpush1.bf16.msra.mxu0 %v8478_v47  ;;  %2859 = vmatpush1.bf16.msra.mxu1 %v8481_v49  ;;  %v8572_v47 = vld [vmem:[#allocation2 + $0x8fc] ss:$28 sps:$4 sm:$0xff]   ;;  %v8575_v49 = vld [vmem:[#allocation2 + $0x904] ss:$28 sps:$4 sm:$0xff]  }
  0xda   :  { %2696 = vmatprep.subr.bf16.mxu0 %v8486_v50  ;;  %2860 = vmatprep.subr.bf16.mxu1 %v8489_v51  ;;  %v8570_v50 = vld [vmem:[#allocation2 + $0x8f8] ss:$28 sps:$4 sm:$0xff]   ;;  %v8573_v51 = vld [vmem:[#allocation2 + $0x900] ss:$28 sps:$4 sm:$0xff]  }
  0xdd   :  { %2697 = vmatpush1.bf16.msra.mxu0 %v8484_v52  ;;  %2861 = vmatpush1.bf16.msra.mxu1 %v8487_v53  ;;  %v8578_v52 = vld [vmem:[#allocation2 + $0x934] ss:$28 sps:$4 sm:$0xff]   ;;  %v8581_v53 = vld [vmem:[#allocation2 + $0x93c] ss:$28 sps:$4 sm:$0xff]  }
  0xde   :  { %2698 = vmatprep.subr.bf16.mxu0 %v8492_v54  ;;  %2862 = vmatprep.subr.bf16.mxu1 %v8495_v55  ;;  %v8576_v54 = vld [vmem:[#allocation2 + $0x930] ss:$28 sps:$4 sm:$0xff]   ;;  %v8579_v55 = vld [vmem:[#allocation2 + $0x938] ss:$28 sps:$4 sm:$0xff]  }
  0xe1   :  { %2699 = vmatpush1.bf16.msra.mxu0 %v8490_v56  ;;  %2863 = vmatpush1.bf16.msra.mxu1 %v8493_v57  ;;  %v8584_v56 = vld [vmem:[#allocation2 + $0x96c] ss:$28 sps:$4 sm:$0xff]   ;;  %v8587_v57 = vld [vmem:[#allocation2 + $0x974] ss:$28 sps:$4 sm:$0xff]  }
  0xe2   :  { %2700 = vmatprep.subr.bf16.mxu0 %v8498_v58  ;;  %2864 = vmatprep.subr.bf16.mxu1 %v8501_v59  ;;  %v8582_v58 = vld [vmem:[#allocation2 + $0x968] ss:$28 sps:$4 sm:$0xff]   ;;  %v8585_v59 = vld [vmem:[#allocation2 + $0x970] ss:$28 sps:$4 sm:$0xff]  }
  0xe5   :  { %2701 = vmatpush1.bf16.msra.mxu0 %v8496_v60  ;;  %2865 = vmatpush1.bf16.msra.mxu1 %v8499_v61  ;;  %v8590_v60 = vld [vmem:[#allocation2 + $0x9a4] ss:$28 sps:$4 sm:$0xff]   ;;  %v8593_v61 = vld [vmem:[#allocation2 + $0x9ac] ss:$28 sps:$4 sm:$0xff]  }
  0xe6   :  { %2702 = vmatprep.subr.bf16.mxu0 %v8504_v62  ;;  %2866 = vmatprep.subr.bf16.mxu1 %v8507_v63  ;;  %v8588_v62 = vld [vmem:[#allocation2 + $0x9a0] ss:$28 sps:$4 sm:$0xff]   ;;  %v8591_v63 = vld [vmem:[#allocation2 + $0x9a8] ss:$28 sps:$4 sm:$0xff]  }
  0xe9   :  { %2703 = vmatpush1.bf16.msra.mxu0 %v8502_v0  ;;  %2867 = vmatpush1.bf16.msra.mxu1 %v8505_v1  ;;  %v8596_v0 = vld [vmem:[#allocation2 + $0x9dc] ss:$28 sps:$4 sm:$0xff]   ;;  %v8599_v1 = vld [vmem:[#allocation2 + $0x9e4] ss:$28 sps:$4 sm:$0xff]  }
  0xea   :  { %2704 = vmatprep.subr.bf16.mxu0 %v8510_v2  ;;  %2868 = vmatprep.subr.bf16.mxu1 %v8513_v3  ;;  %v8594_v2 = vld [vmem:[#allocation2 + $0x9d8] ss:$28 sps:$4 sm:$0xff]   ;;  %v8597_v3 = vld [vmem:[#allocation2 + $0x9e0] ss:$28 sps:$4 sm:$0xff]  }
  0xed   :  { %2705 = vmatpush1.bf16.msra.mxu0 %v8508_v4  ;;  %2869 = vmatpush1.bf16.msra.mxu1 %v8511_v6  ;;  %v8602_v4 = vld [vmem:[#allocation2 + $0xa14] ss:$28 sps:$4 sm:$0xff]   ;;  %v8605_v6 = vld [vmem:[#allocation2 + $0xa1c] ss:$28 sps:$4 sm:$0xff]  }
  0xee   :  { %2715 = vmatprep.subr.bf16.mxu0 %v8517_v7  ;;  %2879 = vmatprep.subr.bf16.mxu1 %v8520_v8  ;;  %v8600_v7 = vld [vmem:[#allocation2 + $0xa10] ss:$28 sps:$4 sm:$0xff]   ;;  %v8603_v8 = vld [vmem:[#allocation2 + $0xa18] ss:$28 sps:$4 sm:$0xff]  }
  0xf0   :  { %2707 = vmatmul.mubr.bf16.vlgmr.msra.gmra.mrb[0].mxu0 %v9794_v10  ;;  %2871 = vmatmul.mubr.bf16.vlgmr.msra.gmra.mrb[0].mxu1 %v9794_v10 }
  0xf1   :  { %2716 = vmatpush1.bf16.msra.mxu0 %v8515_v9  ;;  %2880 = vmatpush1.bf16.msra.mxu1 %v8518_v11  ;;  %v8608_v9 = vld [vmem:[#allocation2 + $0xa4c] ss:$28 sps:$4 sm:$0xff]   ;;  %v8611_v11 = vld [vmem:[#allocation2 + $0xa54] ss:$28 sps:$4 sm:$0xff]  }
  0xf2   :  { %2717 = vmatprep.subr.bf16.mxu0 %v8524_v12  ;;  %2881 = vmatprep.subr.bf16.mxu1 %v8527_v14  ;;  %v8606_v12 = vld [vmem:[#allocation2 + $0xa48] ss:$28 sps:$4 sm:$0xff]   ;;  %v8609_v14 = vld [vmem:[#allocation2 + $0xa50] ss:$28 sps:$4 sm:$0xff]  }
  0xf3   :  { %2747 = vmatprep.mubr.bf16.mxu0 %v9803_v15  ;;  %2911 = vmatprep.mubr.bf16.mxu1 %v9803_v15 }
  0xf5   :  { %2718 = vmatpush1.bf16.msra.mxu0 %v8522_v16  ;;  %2882 = vmatpush1.bf16.msra.mxu1 %v8525_v17  ;;  %v8615_v16 = vld [vmem:[#allocation2 + $0xa84] ss:$28 sps:$4 sm:$0xff]   ;;  %v8618_v17 = vld [vmem:[#allocation2 + $0xa8c] ss:$28 sps:$4 sm:$0xff]  }
  0xf6   :  { %2719 = vmatprep.subr.bf16.mxu0 %v8530_v18  ;;  %2883 = vmatprep.subr.bf16.mxu1 %v8533_v19  ;;  %v8613_v18 = vld [vmem:[#allocation2 + $0xa80] ss:$28 sps:$4 sm:$0xff]   ;;  %v9811_v19 = vcombine.low %v9799_v13, %v9799_v13 }
  0xf7   :  { %v8631_v13 = vld [vmem:[#allocation2 + $0xafc] ss:$28 sps:$4 sm:$0xff]  }
  0xf9   :  { %2720 = vmatpush1.bf16.msra.mxu0 %v8528_v20  ;;  %2884 = vmatpush1.bf16.msra.mxu1 %v8531_v21  ;;  %v8616_v20 = vld [vmem:[#allocation2 + $0xa88] ss:$28 sps:$4 sm:$0xff]   ;;  %v8622_v21 = vld [vmem:[#allocation2 + $0xabc] ss:$28 sps:$4 sm:$0xff]  }
  0xfa   :  { %2721 = vmatprep.subr.bf16.mxu0 %v8536_v22  ;;  %2885 = vmatprep.subr.bf16.mxu1 %v8539_v23  ;;  %v8625_v22 = vld [vmem:[#allocation2 + $0xac4] ss:$28 sps:$4 sm:$0xff]   ;;  %v8620_v23 = vld [vmem:[#allocation2 + $0xab8] ss:$28 sps:$4 sm:$0xff]  }
  0xfd   :  { %2722 = vmatpush1.bf16.msra.mxu0 %v8534_v24  ;;  %2886 = vmatpush1.bf16.msra.mxu1 %v8537_v25  ;;  %v8623_v24 = vld [vmem:[#allocation2 + $0xac0] ss:$28 sps:$4 sm:$0xff]   ;;  %v8628_v25 = vld [vmem:[#allocation2 + $0xaf4] ss:$28 sps:$4 sm:$0xff]  }
  0xfe   :  { %2723 = vmatprep.subr.bf16.mxu0 %v8542_v26  ;;  %2887 = vmatprep.subr.bf16.mxu1 %v8545_v27  ;;  %v8626_v26 = vld [vmem:[#allocation2 + $0xaf0] ss:$28 sps:$4 sm:$0xff]   ;;  %v9655_v27 = vmov 0  }
 0x101   :  { %2724 = vmatpush1.bf16.msra.mxu0 %v8540_v28  ;;  %2888 = vmatpush1.bf16.msra.mxu1 %v8543_v29  ;;  %v8629_v28 = vld [vmem:[#allocation2 + $0xaf8] ss:$28 sps:$4 sm:$0xff]   ;;  %v8634_v29 = vld [vmem:[#allocation2 + $0xb2c] ss:$28 sps:$4 sm:$0xff]  }
 0x102   :  { %2725 = vmatprep.subr.bf16.mxu0 %v8548_v31  ;;  %2889 = vmatprep.subr.bf16.mxu1 %v8551_v32  ;;  %v8637_v31 = vld [vmem:[#allocation2 + $0xb34] ss:$28 sps:$4 sm:$0xff]   ;;  %v8632_v32 = vld [vmem:[#allocation2 + $0xb28] ss:$28 sps:$4 sm:$0xff]  }
 0x105   :  { %2726 = vmatpush1.bf16.msra.mxu0 %v8546_v33  ;;  %2890 = vmatpush1.bf16.msra.mxu1 %v8549_v34  ;;  %v8635_v33 = vld [vmem:[#allocation2 + $0xb30] ss:$28 sps:$4 sm:$0xff]   ;;  %v8640_v34 = vld [vmem:[#allocation2 + $0xb64] ss:$28 sps:$4 sm:$0xff]  }
 0x106   :  { %2727 = vmatprep.subr.bf16.mxu0 %v8554_v35  ;;  %2891 = vmatprep.subr.bf16.mxu1 %v8557_v36  ;;  %v8643_v35 = vld [vmem:[#allocation2 + $0xb6c] ss:$28 sps:$4 sm:$0xff]   ;;  %v8638_v36 = vld [vmem:[#allocation2 + $0xb60] ss:$28 sps:$4 sm:$0xff]  }
 0x109   :  { %2728 = vmatpush1.bf16.msra.mxu0 %v8552_v37  ;;  %2892 = vmatpush1.bf16.msra.mxu1 %v8555_v38  ;;  %v8641_v37 = vld [vmem:[#allocation2 + $0xb68] ss:$28 sps:$4 sm:$0xff]   ;;  %v8646_v38 = vld [vmem:[#allocation2 + $0xb9c] ss:$28 sps:$4 sm:$0xff]  }
 0x10a   :  { %2729 = vmatprep.subr.bf16.mxu0 %v8560_v39  ;;  %2893 = vmatprep.subr.bf16.mxu1 %v8563_v40  ;;  %v8649_v39 = vld [vmem:[#allocation2 + $0xba4] ss:$28 sps:$4 sm:$0xff]   ;;  %v8644_v40 = vld [vmem:[#allocation2 + $0xb98] ss:$28 sps:$4 sm:$0xff]  }
 0x10d   :  { %2730 = vmatpush1.bf16.msra.mxu0 %v8558_v41  ;;  %2894 = vmatpush1.bf16.msra.mxu1 %v8561_v42  ;;  %v8647_v41 = vld [vmem:[#allocation2 + $0xba0] ss:$28 sps:$4 sm:$0xff]   ;;  %v8652_v42 = vld [vmem:[#allocation2 + $0xbd4] ss:$28 sps:$4 sm:$0xff]  }
 0x10e   :  { %2731 = vmatprep.subr.bf16.mxu0 %v8566_v43  ;;  %2895 = vmatprep.subr.bf16.mxu1 %v8569_v44  ;;  %v8655_v43 = vld [vmem:[#allocation2 + $0xbdc] ss:$28 sps:$4 sm:$0xff]   ;;  %v8650_v44 = vld [vmem:[#allocation2 + $0xbd0] ss:$28 sps:$4 sm:$0xff]  }
 0x111   :  { %2732 = vmatpush1.bf16.msra.mxu0 %v8564_v45  ;;  %2896 = vmatpush1.bf16.msra.mxu1 %v8567_v46  ;;  %v8653_v45 = vld [vmem:[#allocation2 + $0xbd8] ss:$28 sps:$4 sm:$0xff]   ;;  %v8658_v46 = vld [vmem:[#allocation2 + $0xc0c] ss:$28 sps:$4 sm:$0xff]  }
 0x112   :  { %2733 = vmatprep.subr.bf16.mxu0 %v8572_v47  ;;  %2897 = vmatprep.subr.bf16.mxu1 %v8575_v49  ;;  %v8661_v47 = vld [vmem:[#allocation2 + $0xc14] ss:$28 sps:$4 sm:$0xff]   ;;  %v8656_v49 = vld [vmem:[#allocation2 + $0xc08] ss:$28 sps:$4 sm:$0xff]  }
 0x115   :  { %2734 = vmatpush1.bf16.msra.mxu0 %v8570_v50  ;;  %2898 = vmatpush1.bf16.msra.mxu1 %v8573_v51  ;;  %v8659_v50 = vld [vmem:[#allocation2 + $0xc10] ss:$28 sps:$4 sm:$0xff]  }
 0x116   :  { %2735 = vmatprep.subr.bf16.mxu0 %v8578_v52  ;;  %2899 = vmatprep.subr.bf16.mxu1 %v8581_v53  ;;  %v8665_v51 = vld [vmem:[#allocation2 + $0x14] ss:$28 sps:$4 sm:$0xff]   ;;  %v8662_v53 = vld [vmem:[%s9986_s0 + $0x18] ss:$0 sps:$4 sm:$0xff]  }
 0x117   :  { %v8684_v52 = vld [vmem:[#allocation2 + $0x1d8] ss:$28 sps:$4 sm:$0xff]  }
 0x119   :  { %2736 = vmatpush1.bf16.msra.mxu0 %v8576_v54  ;;  %2900 = vmatpush1.bf16.msra.mxu1 %v8579_v55  ;;  %v8663_v54 = vld [vmem:[#allocation2 + $0x10] ss:$28 sps:$4 sm:$0xff]   ;;  %v8688_v55 = vld [vmem:[#allocation2 + $0x18] ss:$28 sps:$4 sm:$0xff]  }
 0x11a   :  { %2737 = vmatprep.subr.bf16.mxu0 %v8584_v56  ;;  %2901 = vmatprep.subr.bf16.mxu1 %v8587_v57  ;;  %v8668_v56 = vld [vmem:[#allocation2 + $0x4c] ss:$28 sps:$4 sm:$0xff]  }
 0x11b   :  { %v8689_v57 = vld [vmem:[#allocation2 + $0x210] ss:$28 sps:$4 sm:$0xff]  }
 0x11d   :  { %2738 = vmatpush1.bf16.msra.mxu0 %v8582_v58  ;;  %2902 = vmatpush1.bf16.msra.mxu1 %v8585_v59  ;;  %v8666_v58 = vld [vmem:[#allocation2 + $0x48] ss:$28 sps:$4 sm:$0xff]  }
 0x11e   :  { %2739 = vmatprep.subr.bf16.mxu0 %v8590_v60  ;;  %2903 = vmatprep.subr.bf16.mxu1 %v8593_v61  ;;  %v8671_v59 = vld [vmem:[#allocation2 + $0x84] ss:$28 sps:$4 sm:$0xff]   ;;  %v8693_v60 = vld [vmem:[#allocation2 + $0x50] ss:$28 sps:$4 sm:$0xff]  }
 0x11f   :  { %v8694_v61 = vld [vmem:[#allocation2 + $0x248] ss:$28 sps:$4 sm:$0xff]  }
 0x121   :  { %2740 = vmatpush1.bf16.msra.mxu0 %v8588_v62  ;;  %2904 = vmatpush1.bf16.msra.mxu1 %v8591_v63  ;;  %v8669_v62 = vld [vmem:[#allocation2 + $0x80] ss:$28 sps:$4 sm:$0xff]  }
 0x122   :  { %2741 = vmatprep.subr.bf16.mxu0 %v8596_v0  ;;  %2905 = vmatprep.subr.bf16.mxu1 %v8599_v1  ;;  %v8674_v63 = vld [vmem:[#allocation2 + $0xbc] ss:$28 sps:$4 sm:$0xff]   ;;  %v8698_v0 = vld [vmem:[#allocation2 + $0x88] ss:$28 sps:$4 sm:$0xff]  }
 0x123   :  { %v8699_v1 = vld [vmem:[#allocation2 + $0x280] ss:$28 sps:$4 sm:$0xff]  }
 0x125   :  { %2742 = vmatpush1.bf16.msra.mxu0 %v8594_v2  ;;  %2906 = vmatpush1.bf16.msra.mxu1 %v8597_v3  ;;  %v8672_v2 = vld [vmem:[#allocation2 + $0xb8] ss:$28 sps:$4 sm:$0xff]  }
 0x126   :  { %2743 = vmatprep.subr.bf16.mxu0 %v8602_v4  ;;  %2907 = vmatprep.subr.bf16.mxu1 %v8605_v6  ;;  %v8677_v3 = vld [vmem:[#allocation2 + $0xf4] ss:$28 sps:$4 sm:$0xff]   ;;  %v8703_v4 = vld [vmem:[#allocation2 + $0xc0] ss:$28 sps:$4 sm:$0xff]  }
 0x127   :  { %v8704_v6 = vld [vmem:[#allocation2 + $0x2b8] ss:$28 sps:$4 sm:$0xff]  }
 0x129   :  { %2744 = vmatpush1.bf16.msra.mxu0 %v8600_v7  ;;  %2908 = vmatpush1.bf16.msra.mxu1 %v8603_v8  ;;  %v8675_v7 = vld [vmem:[#allocation2 + $0xf0] ss:$28 sps:$4 sm:$0xff]  }
 0x12a   :  { %2745 = vmatprep.subr.bf16.mxu0 %v8608_v9  ;;  %2909 = vmatprep.subr.bf16.mxu1 %v8611_v11  ;;  %v8680_v8 = vld [vmem:[#allocation2 + $0x12c] ss:$28 sps:$4 sm:$0xff]  }
 0x12b   :  { %v8709_v9 = vld [vmem:[#allocation2 + $0x2f0] ss:$28 sps:$4 sm:$0xff]   ;;  %v8678_v11 = vld [vmem:[#allocation2 + $0x128] ss:$28 sps:$4 sm:$0xff]  }
 0x12d   :  { %2746 = vmatpush1.bf16.msra.mxu0 %v8606_v12  ;;  %2910 = vmatpush1.bf16.msra.mxu1 %v8609_v14  ;;  %v8683_v12 = vld [vmem:[#allocation2 + $0x164] ss:$28 sps:$4 sm:$0xff]   ;;  %v8713_v14 = vld [vmem:[#allocation2 + $0x130] ss:$28 sps:$4 sm:$0xff]  }
 0x12e   :  { %2756 = vmatprep.subr.bf16.mxu0 %v8615_v16  ;;  %2920 = vmatprep.subr.bf16.mxu1 %v8618_v17  ;;  %v8714_v16 = vld [vmem:[#allocation2 + $0x328] ss:$28 sps:$4 sm:$0xff]   ;;  %v8681_v17 = vld [vmem:[#allocation2 + $0x160] ss:$28 sps:$4 sm:$0xff]  }
 0x130   :  { %2748 = vmatmul.mubr.bf16.vlgmr.msra.gmra.mrb[0].mxu0 %v9811_v19  ;;  %2912 = vmatmul.mubr.bf16.vlgmr.msra.gmra.mrb[0].mxu1 %v9811_v19 }
 0x131   :  { %2757 = vmatpush1.bf16.msra.mxu0 %v8613_v18  ;;  %2921 = vmatpush1.bf16.msra.mxu1 %v8616_v20  ;;  %v8687_v18 = vld [vmem:[#allocation2 + $0x19c] ss:$28 sps:$4 sm:$0xff]   ;;  %v8718_v20 = vld [vmem:[#allocation2 + $0x168] ss:$28 sps:$4 sm:$0xff]  }
 0x132   :  { %2758 = vmatprep.subr.bf16.mxu0 %v8622_v21  ;;  %2922 = vmatprep.subr.bf16.mxu1 %v8625_v22  ;;  %v8719_v21 = vld [vmem:[#allocation2 + $0x360] ss:$28 sps:$4 sm:$0xff]   ;;  %v8685_v22 = vld [vmem:[#allocation2 + $0x198] ss:$28 sps:$4 sm:$0xff]  }
 0x133   :  { %2788 = vmatprep.mubr.bf16.mxu0 %v9655_v27  ;;  %2952 = vmatprep.mubr.bf16.mxu1 %v9655_v27 }
 0x135   :  { %2759 = vmatpush1.bf16.msra.mxu0 %v8620_v23  ;;  %2923 = vmatpush1.bf16.msra.mxu1 %v8623_v24  ;;  %v8692_v23 = vld [vmem:[#allocation2 + $0x1d4] ss:$28 sps:$4 sm:$0xff]   ;;  %v8723_v24 = vld [vmem:[#allocation2 + $0x1a0] ss:$28 sps:$4 sm:$0xff]  }
 0x136   :  { %2760 = vmatprep.subr.bf16.mxu0 %v8628_v25  ;;  %2924 = vmatprep.subr.bf16.mxu1 %v8631_v13  ;;  %v8724_v25 = vld [vmem:[#allocation2 + $0x558] ss:$28 sps:$4 sm:$0xff]   ;;  %v8690_v13 = vld [vmem:[#allocation2 + $0x1d0] ss:$28 sps:$4 sm:$0xff]  }
 0x139   :  { %2761 = vmatpush1.bf16.msra.mxu0 %v8626_v26  ;;  %2925 = vmatpush1.bf16.msra.mxu1 %v8629_v28  ;;  %v8728_v26 = vld [vmem:[#allocation2 + $0x398] ss:$28 sps:$4 sm:$0xff]   ;;  %v8697_v28 = vld [vmem:[#allocation2 + $0x20c] ss:$28 sps:$4 sm:$0xff]  }
 0x13a   :  { %2762 = vmatprep.subr.bf16.mxu0 %v8634_v29  ;;  %2926 = vmatprep.subr.bf16.mxu1 %v8637_v31  ;;  %v8729_v29 = vld [vmem:[#allocation2 + $0x590] ss:$28 sps:$4 sm:$0xff]   ;;  %v8695_v31 = vld [vmem:[#allocation2 + $0x208] ss:$28 sps:$4 sm:$0xff]  }
 0x13d   :  { %2763 = vmatpush1.bf16.msra.mxu0 %v8632_v32  ;;  %2927 = vmatpush1.bf16.msra.mxu1 %v8635_v33  ;;  %v8733_v32 = vld [vmem:[#allocation2 + $0x3d0] ss:$28 sps:$4 sm:$0xff]   ;;  %v8702_v33 = vld [vmem:[#allocation2 + $0x244] ss:$28 sps:$4 sm:$0xff]  }
 0x13e   :  { %2764 = vmatprep.subr.bf16.mxu0 %v8640_v34  ;;  %2928 = vmatprep.subr.bf16.mxu1 %v8643_v35  ;;  %v8734_v34 = vld [vmem:[#allocation2 + $0x5c8] ss:$28 sps:$4 sm:$0xff]   ;;  %v8700_v35 = vld [vmem:[#allocation2 + $0x240] ss:$28 sps:$4 sm:$0xff]  }
 0x141   :  { %2765 = vmatpush1.bf16.msra.mxu0 %v8638_v36  ;;  %2929 = vmatpush1.bf16.msra.mxu1 %v8641_v37  ;;  %v8738_v36 = vld [vmem:[#allocation2 + $0x408] ss:$28 sps:$4 sm:$0xff]   ;;  %v8707_v37 = vld [vmem:[#allocation2 + $0x27c] ss:$28 sps:$4 sm:$0xff]  }
 0x142   :  { %2766 = vmatprep.subr.bf16.mxu0 %v8646_v38  ;;  %2930 = vmatprep.subr.bf16.mxu1 %v8649_v39  ;;  %v8739_v38 = vld [vmem:[#allocation2 + $0x600] ss:$28 sps:$4 sm:$0xff]   ;;  %v8705_v39 = vld [vmem:[#allocation2 + $0x278] ss:$28 sps:$4 sm:$0xff]  }
 0x145   :  { %2767 = vmatpush1.bf16.msra.mxu0 %v8644_v40  ;;  %2931 = vmatpush1.bf16.msra.mxu1 %v8647_v41  ;;  %v8743_v40 = vld [vmem:[#allocation2 + $0x440] ss:$28 sps:$4 sm:$0xff]   ;;  %v8712_v41 = vld [vmem:[#allocation2 + $0x2b4] ss:$28 sps:$4 sm:$0xff]  }
 0x146   :  { %2768 = vmatprep.subr.bf16.mxu0 %v8652_v42  ;;  %2932 = vmatprep.subr.bf16.mxu1 %v8655_v43  ;;  %v8744_v42 = vld [vmem:[#allocation2 + $0x638] ss:$28 sps:$4 sm:$0xff]   ;;  %v8710_v43 = vld [vmem:[#allocation2 + $0x2b0] ss:$28 sps:$4 sm:$0xff]  }
 0x149   :  { %2769 = vmatpush1.bf16.msra.mxu0 %v8650_v44  ;;  %2933 = vmatpush1.bf16.msra.mxu1 %v8653_v45  ;;  %v8748_v44 = vld [vmem:[#allocation2 + $0x478] ss:$28 sps:$4 sm:$0xff]   ;;  %v8717_v45 = vld [vmem:[#allocation2 + $0x2ec] ss:$28 sps:$4 sm:$0xff]  }
 0x14a   :  { %2770 = vmatprep.subr.bf16.mxu0 %v8658_v46  ;;  %2934 = vmatprep.subr.bf16.mxu1 %v8661_v47  ;;  %v8749_v46 = vld [vmem:[#allocation2 + $0x670] ss:$28 sps:$4 sm:$0xff]   ;;  %v8715_v47 = vld [vmem:[#allocation2 + $0x2e8] ss:$28 sps:$4 sm:$0xff]  }
 0x14d   :  { %2771 = vmatpush1.bf16.msra.mxu0 %v8656_v49  ;;  %2935 = vmatpush1.bf16.msra.mxu1 %v8659_v50  ;;  %v8753_v49 = vld [vmem:[#allocation2 + $0x4b0] ss:$28 sps:$4 sm:$0xff]   ;;  %v8722_v50 = vld [vmem:[#allocation2 + $0x324] ss:$28 sps:$4 sm:$0xff]  }
 0x14e   :  { %2961 = vmatprep.subr.bf16.mxu0 %v8665_v51  ;;  %7938 = vmatprep.subr.bf16.mxu1 %v8684_v52  ;;  %v8754_v51 = vld [vmem:[#allocation2 + $0x6a8] ss:$28 sps:$4 sm:$0xff]   ;;  %v8720_v52 = vld [vmem:[#allocation2 + $0x320] ss:$28 sps:$4 sm:$0xff]  }
 0x150   :  { %2789 = vmatmul.mubr.bf16.vlgmr.msra.gmra.mrb[0].mxu0 %v8662_v53  ;;  %2953 = vmatmul.mubr.bf16.vlgmr.msra.gmra.mrb[0].mxu1 %v8662_v53  ;;  %v8727_v53 = vld [vmem:[#allocation2 + $0x35c] ss:$28 sps:$4 sm:$0xff]  }
 0x151   :  { %2962 = vmatpush1.bf16.msra.mxu0 %v8663_v54  ;;  %7939 = vmatpush3.bf16.msra.mxu1 %v8688_v55  ;;  %v8758_v54 = vld [vmem:[#allocation2 + $0x4e8] ss:$28 sps:$4 sm:$0xff]   ;;  %v8759_v55 = vld [vmem:[#allocation2 + $0x6e0] ss:$28 sps:$4 sm:$0xff]  }
 0x152   :  { %2963 = vmatprep.subr.bf16.mxu0 %v8668_v56  ;;  %7940 = vmatprep.subr.bf16.mxu1 %v8689_v57  ;;  %v8725_v56 = vld [vmem:[#allocation2 + $0x358] ss:$28 sps:$4 sm:$0xff]  }
 0x153   :  { %3157 = vmatprep.mubr.bf16.mxu1 %v9773_v48  ;;  %2993 = vmatprep.mubr.bf16.mxu0 %v9773_v48  ;;  %v8708_v48 = vld [vmem:[#allocation2 + $0xf8] ss:$28 sps:$4 sm:$0xff]  }
 0x154   :  { %v8732_v57 = vld [vmem:[#allocation2 + $0x394] ss:$28 sps:$4 sm:$0xff]  }
 0x155   :  { %2964 = vmatpush1.bf16.msra.mxu0 %v8666_v58  ;;  %7941 = vmatpush3.bf16.msra.mxu1 %v8693_v60  ;;  %v8763_v58 = vld [vmem:[#allocation2 + $0x520] ss:$28 sps:$4 sm:$0xff]   ;;  %v8730_v60 = vld [vmem:[#allocation2 + $0x390] ss:$28 sps:$4 sm:$0xff]  }
 0x156   :  { %2965 = vmatprep.subr.bf16.mxu0 %v8671_v59  ;;  %7942 = vmatprep.subr.bf16.mxu1 %v8694_v61  ;;  %v8764_v59 = vld [vmem:[#allocation2 + $0x8d8] ss:$28 sps:$4 sm:$0xff]   ;;  %v8737_v61 = vld [vmem:[#allocation2 + $0x3cc] ss:$28 sps:$4 sm:$0xff]  }
 0x159   :  { %2966 = vmatpush1.bf16.msra.mxu0 %v8669_v62  ;;  %7943 = vmatpush3.bf16.msra.mxu1 %v8698_v0  ;;  %v8768_v62 = vld [vmem:[#allocation2 + $0x718] ss:$28 sps:$4 sm:$0xff]   ;;  %v8735_v0 = vld [vmem:[#allocation2 + $0x3c8] ss:$28 sps:$4 sm:$0xff]  }
 0x15a   :  { %2967 = vmatprep.subr.bf16.mxu0 %v8674_v63  ;;  %7944 = vmatprep.subr.bf16.mxu1 %v8699_v1  ;;  %v8769_v63 = vld [vmem:[#allocation2 + $0x910] ss:$28 sps:$4 sm:$0xff]   ;;  %v8742_v1 = vld [vmem:[#allocation2 + $0x404] ss:$28 sps:$4 sm:$0xff]  }
 0x15d   :  { %2968 = vmatpush1.bf16.msra.mxu0 %v8672_v2  ;;  %7945 = vmatpush3.bf16.msra.mxu1 %v8703_v4  ;;  %v8773_v2 = vld [vmem:[#allocation2 + $0x750] ss:$28 sps:$4 sm:$0xff]   ;;  %v8740_v4 = vld [vmem:[#allocation2 + $0x400] ss:$28 sps:$4 sm:$0xff]  }
 0x15e   :  { %2969 = vmatprep.subr.bf16.mxu0 %v8677_v3  ;;  %7946 = vmatprep.subr.bf16.mxu1 %v8704_v6  ;;  %v8774_v3 = vld [vmem:[#allocation2 + $0x948] ss:$28 sps:$4 sm:$0xff]   ;;  %v8747_v6 = vld [vmem:[#allocation2 + $0x43c] ss:$28 sps:$4 sm:$0xff]  }
 0x161   :  { %2970 = vmatpush1.bf16.msra.mxu0 %v8675_v7  ;;  %7947 = vmatpush3.bf16.msra.mxu1 %v8708_v48  ;;  %v8778_v7 = vld [vmem:[#allocation2 + $0x788] ss:$28 sps:$4 sm:$0xff]   ;;  %v8745_v48 = vld [vmem:[#allocation2 + $0x438] ss:$28 sps:$4 sm:$0xff]  }
 0x162   :  { %2971 = vmatprep.subr.bf16.mxu0 %v8680_v8  ;;  %7948 = vmatprep.subr.bf16.mxu1 %v8709_v9  ;;  %v8752_v8 = vld [vmem:[#allocation2 + $0x474] ss:$28 sps:$4 sm:$0xff]   ;;  %v8783_v9 = vld [vmem:[#allocation2 + $0x7c0] ss:$28 sps:$4 sm:$0xff]  }
 0x165   :  { %2972 = vmatpush1.bf16.msra.mxu0 %v8678_v11  ;;  %7949 = vmatpush3.bf16.msra.mxu1 %v8713_v14  ;;  %v8784_v11 = vld [vmem:[#allocation2 + $0x9b8] ss:$28 sps:$4 sm:$0xff]   ;;  %v8757_v14 = vld [vmem:[#allocation2 + $0x4ac] ss:$28 sps:$4 sm:$0xff]  }
 0x166   :  { %2973 = vmatprep.subr.bf16.mxu0 %v8683_v12  ;;  %7950 = vmatprep.subr.bf16.mxu1 %v8714_v16  ;;  %v8750_v12 = vld [vmem:[#allocation2 + $0x470] ss:$28 sps:$4 sm:$0xff]  }
 0x167   :  { %v8789_v16 = vld [vmem:[#allocation2 + $0x9f0] ss:$28 sps:$4 sm:$0xff]  }
 0x169   :  { %2974 = vmatpush1.bf16.msra.mxu0 %v8681_v17  ;;  %7951 = vmatpush3.bf16.msra.mxu1 %v8718_v20  ;;  %v8755_v17 = vld [vmem:[#allocation2 + $0x4a8] ss:$28 sps:$4 sm:$0xff]  }
 0x16a   :  { %2975 = vmatprep.subr.bf16.mxu0 %v8687_v18  ;;  %7952 = vmatprep.subr.bf16.mxu1 %v8719_v21  ;;  %v8793_v18 = vld [vmem:[#allocation2 + $0x830] ss:$28 sps:$4 sm:$0xff]   ;;  %v8762_v20 = vld [vmem:[#allocation2 + $0x4e4] ss:$28 sps:$4 sm:$0xff]  }
 0x16b   :  { %v8794_v21 = vld [vmem:[#allocation2 + $0xa28] ss:$28 sps:$4 sm:$0xff]  }
 0x16d   :  { %2976 = vmatpush1.bf16.msra.mxu0 %v8685_v22  ;;  %7953 = vmatpush3.bf16.msra.mxu1 %v8723_v24  ;;  %v8760_v22 = vld [vmem:[#allocation2 + $0x4e0] ss:$28 sps:$4 sm:$0xff]  }
 0x16e   :  { %2977 = vmatprep.subr.bf16.mxu0 %v8692_v23  ;;  %7960 = vmatprep.subr.bf16.mxu1 %v8724_v25  ;;  %v8798_v23 = vld [vmem:[#allocation2 + $0x868] ss:$28 sps:$4 sm:$0xff]   ;;  %v8767_v24 = vld [vmem:[#allocation2 + $0x51c] ss:$28 sps:$4 sm:$0xff]  }
 0x16f   :  { %v8799_v25 = vld [vmem:[#allocation2 + $0xa60] ss:$28 sps:$4 sm:$0xff]  }
 0x170   :  { %3158 = vmatmul.mubr.bf16.vlgmr.msra.gmra.mrb[4].mxu1 %v9777_v5 }
 0x171   :  { %2978 = vmatpush1.bf16.msra.mxu0 %v8690_v13  ;;  %7961 = vmatpush3.bf16.msra.mxu1 %v8728_v26  ;;  %v8765_v13 = vld [vmem:[#allocation2 + $0x518] ss:$28 sps:$4 sm:$0xff]   ;;  %v8803_v26 = vld [vmem:[#allocation2 + $0x8a0] ss:$28 sps:$4 sm:$0xff]  }
 0x172   :  { %2979 = vmatprep.subr.bf16.mxu0 %v8697_v28  ;;  %7962 = vmatprep.subr.bf16.mxu1 %v8729_v29  ;;  %v8772_v28 = vld [vmem:[#allocation2 + $0x554] ss:$28 sps:$4 sm:$0xff]  }
 0x173   :  { %3197 = vmatprep.mubr.bf16.mxu1 %v9788_v30  ;;  %v8770_v29 = vld [vmem:[#allocation2 + $0x550] ss:$28 sps:$4 sm:$0xff]  }
 0x175   :  { %2980 = vmatpush1.bf16.msra.mxu0 %v8695_v31  ;;  %7963 = vmatpush3.bf16.msra.mxu1 %v8733_v32  ;;  %v8807_v31 = vld [vmem:[#allocation2 + $0xa98] ss:$28 sps:$4 sm:$0xff]   ;;  %v8777_v32 = vld [vmem:[#allocation2 + $0x58c] ss:$28 sps:$4 sm:$0xff]  }
 0x176   :  { %2981 = vmatprep.subr.bf16.mxu0 %v8702_v33  ;;  %7964 = vmatprep.subr.bf16.mxu1 %v8734_v34  ;;  %v9656_v33 = vmov 0.0   ;;  %v8775_v34 = vld [vmem:[#allocation2 + $0x588] ss:$28 sps:$4 sm:$0xff]  }
 0x179   :  { %2982 = vmatpush1.bf16.msra.mxu0 %v8700_v35  ;;  %7965 = vmatpush3.bf16.msra.mxu1 %v8738_v36  ;;  %v8811_v35 = vld [vmem:[#allocation2 + $0xad0] ss:$28 sps:$4 sm:$0xff]   ;;  %v8782_v36 = vld [vmem:[#allocation2 + $0x5c4] ss:$28 sps:$4 sm:$0xff]  }
 0x17a   :  { %2983 = vmatprep.subr.bf16.mxu0 %v8707_v37  ;;  %7966 = vmatprep.subr.bf16.mxu1 %v8739_v38  ;;  %v8780_v37 = vld [vmem:[#allocation2 + $0x5c0] ss:$28 sps:$4 sm:$0xff]  }
 0x17b   :  { %v8787_v38 = vld [vmem:[#allocation2 + $0x5fc] ss:$28 sps:$4 sm:$0xff]  }
 0x17d   :  { %2984 = vmatpush1.bf16.msra.mxu0 %v8705_v39  ;;  %7967 = vmatpush3.bf16.msra.mxu1 %v8743_v40  ;;  %v8815_v39 = vld [vmem:[#allocation2 + $0xb08] ss:$28 sps:$4 sm:$0xff]   ;;  %v8785_v40 = vld [vmem:[#allocation2 + $0x5f8] ss:$28 sps:$4 sm:$0xff]  }
 0x17e   :  { %2985 = vmatprep.subr.bf16.mxu0 %v8712_v41  ;;  %7968 = vmatprep.subr.bf16.mxu1 %v8744_v42  ;;  %v8792_v41 = vld [vmem:[#allocation2 + $0x634] ss:$28 sps:$4 sm:$0xff]   ;;  %v8819_v42 = vld [vmem:[#allocation2 + $0xb40] ss:$28 sps:$4 sm:$0xff]  }
 0x181   :  { %2986 = vmatpush1.bf16.msra.mxu0 %v8710_v43  ;;  %7969 = vmatpush3.bf16.msra.mxu1 %v8748_v44  ;;  %v8790_v43 = vld [vmem:[#allocation2 + $0x630] ss:$28 sps:$4 sm:$0xff]  }
 0x182   :  { %2987 = vmatprep.subr.bf16.mxu0 %v8717_v45  ;;  %7970 = vmatprep.subr.bf16.mxu1 %v8749_v46  ;;  %v8797_v44 = vld [vmem:[#allocation2 + $0x66c] ss:$28 sps:$4 sm:$0xff]   ;;  %v8823_v45 = vld [vmem:[#allocation2 + $0xb78] ss:$28 sps:$4 sm:$0xff]  }
 0x183   :  { %v8795_v46 = vld [vmem:[#allocation2 + $0x668] ss:$28 sps:$4 sm:$0xff]  }
 0x185   :  { %2988 = vmatpush1.bf16.msra.mxu0 %v8715_v47  ;;  %7971 = vmatpush3.bf16.msra.mxu1 %v8753_v49  ;;  %v8802_v47 = vld [vmem:[#allocation2 + $0x6a4] ss:$28 sps:$4 sm:$0xff]   ;;  %v8827_v49 = vld [vmem:[#allocation2 + $0xbb0] ss:$28 sps:$4 sm:$0xff]  }
 0x186   :  { %2989 = vmatprep.subr.bf16.mxu0 %v8722_v50  ;;  %7972 = vmatprep.subr.bf16.mxu1 %v8754_v51  ;;  %v8800_v50 = vld [vmem:[#allocation2 + $0x6a0] ss:$28 sps:$4 sm:$0xff]  }
 0x187   :  { %v8806_v51 = vld [vmem:[#allocation2 + $0x6dc] ss:$28 sps:$4 sm:$0xff]  }
 0x189   :  { %2990 = vmatpush1.bf16.msra.mxu0 %v8720_v52  ;;  %7973 = vmatpush3.bf16.msra.mxu1 %v8758_v54  ;;  %v8831_v52 = vld [vmem:[#allocation2 + $0xbe8] ss:$28 sps:$4 sm:$0xff]   ;;  %v8810_v54 = vld [vmem:[#allocation2 + $0x714] ss:$28 sps:$4 sm:$0xff]  }
 0x18a   :  { %2991 = vmatprep.subr.bf16.mxu0 %v8727_v53  ;;  %7974 = vmatprep.subr.bf16.mxu1 %v8759_v55  ;;  %v8804_v53 = vld [vmem:[#allocation2 + $0x6d8] ss:$28 sps:$4 sm:$0xff]   ;;  %v8835_v55 = vld [vmem:[#allocation2 + $0xc20] ss:$28 sps:$4 sm:$0xff]  }
 0x18d   :  { %2992 = vmatpush1.bf16.msra.mxu0 %v8725_v56  ;;  %7975 = vmatpush3.bf16.msra.mxu1 %v8763_v58  ;;  %v8838_v56 = vld [vmem:[#allocation6 + $0x4] ss:$28 sps:$4 sm:$0xff]  }
 0x18e   :  { %3002 = vmatprep.subr.bf16.mxu0 %v8732_v57  ;;  %7982 = vmatprep.subr.bf16.mxu1 %v8764_v59  ;;  %v8808_v57 = vld [vmem:[#allocation2 + $0x710] ss:$28 sps:$4 sm:$0xff]   ;;  %v8836_v59 = vld [vmem:[#allocation6] ss:$28 sps:$4 sm:$0xff]  }
 0x18f   :  { %v8814_v58 = vld [vmem:[#allocation2 + $0x74c] ss:$28 sps:$4 sm:$0xff]  }
 0x190   :  { %2994 = vmatmul.mubr.bf16.vlgmr.msra.gmra.mrb[4].mxu0 %v9777_v5  ;;  %3198 = vmatmul.mubr.bf16.vlgmr.msra.gmra.mrb[8].mxu1 %v9794_v10  ;;  %v8779_v5 = vld [vmem:[#allocation2 + $0x980] ss:$28 sps:$4 sm:$0xff]  }
 0x191   :  { %3003 = vmatpush1.bf16.msra.mxu0 %v8730_v60  ;;  %7983 = vmatpush3.bf16.msra.mxu1 %v8768_v62  ;;  %v8844_v60 = vld [vmem:[#allocation6 + $0x3c] ss:$28 sps:$4 sm:$0xff]  }
 0x192   :  { %3004 = vmatprep.subr.bf16.mxu0 %v8737_v61  ;;  %7984 = vmatprep.subr.bf16.mxu1 %v8769_v63  ;;  %v8812_v61 = vld [vmem:[#allocation2 + $0x748] ss:$28 sps:$4 sm:$0xff]   ;;  %v9843_v63 = vld [vmem:[%s9986_s0 + $0x18] ss:$0 sps:$4 sm:$0xff]  }
 0x193   :  { %3237 = vmatprep.mubr.bf16.mxu1 %v9803_v15  ;;  %3034 = vmatprep.mubr.bf16.mxu0 %v9788_v30  ;;  %v8788_v30 = vld [vmem:[#allocation2 + $0x7f8] ss:$28 sps:$4 sm:$0xff]   ;;  %v8818_v62 = vld [vmem:[#allocation2 + $0x784] ss:$28 sps:$4 sm:$0xff]  }
 0x195   :  { %3005 = vmatpush1.bf16.msra.mxu0 %v8735_v0  ;;  %7985 = vmatpush3.bf16.msra.mxu1 %v8773_v2  ;;  %v8842_v0 = vld [vmem:[#allocation6 + $0x38] ss:$28 sps:$4 sm:$0xff]  }
 0x196   :  { %3006 = vmatprep.subr.bf16.mxu0 %v8742_v1  ;;  %7986 = vmatprep.subr.bf16.mxu1 %v8774_v3  ;;  %v8850_v1 = vld [vmem:[#allocation6 + $0x74] ss:$28 sps:$4 sm:$0xff]  }
 0x197   :  { %v8816_v2 = vld [vmem:[#allocation2 + $0x780] ss:$28 sps:$4 sm:$0xff]  }
 0x198   :  { %v8822_v3 = vld [vmem:[#allocation2 + $0x7bc] ss:$28 sps:$4 sm:$0xff]  }
 0x199   :  { %3007 = vmatpush1.bf16.msra.mxu0 %v8740_v4  ;;  %7987 = vmatpush3.bf16.msra.mxu1 %v8778_v7  ;;  %v8856_v4 = vld [vmem:[#allocation6 + $0xac] ss:$28 sps:$4 sm:$0xff]  }
 0x19a   :  { %3008 = vmatprep.subr.bf16.mxu0 %v8747_v6  ;;  %7988 = vmatprep.subr.bf16.mxu1 %v8779_v5  ;;  %v8820_v6 = vld [vmem:[#allocation2 + $0x7b8] ss:$28 sps:$4 sm:$0xff]   ;;  %v8854_v5 = vld [vmem:[#allocation6 + $0xa8] ss:$28 sps:$4 sm:$0xff]  }
 0x19b   :  { %v8826_v7 = vld [vmem:[#allocation2 + $0x7f4] ss:$28 sps:$4 sm:$0xff]  }
 0x19d   :  { %3009 = vmatpush1.bf16.msra.mxu0 %v8745_v48  ;;  %7989 = vmatpush3.bf16.msra.mxu1 %v8783_v9  ;;  %v8862_v48 = vld [vmem:[#allocation6 + $0xe4] ss:$28 sps:$4 sm:$0xff]  }
 0x19e   :  { %3010 = vmatprep.subr.bf16.mxu0 %v8752_v8  ;;  %7990 = vmatprep.subr.bf16.mxu1 %v8784_v11  ;;  %v8824_v8 = vld [vmem:[#allocation2 + $0x7f0] ss:$28 sps:$4 sm:$0xff]   ;;  %v8868_v11 = vld [vmem:[#allocation6 + $0x11c] ss:$28 sps:$4 sm:$0xff]  }
 0x19f   :  { %v8830_v9 = vld [vmem:[#allocation2 + $0x82c] ss:$28 sps:$4 sm:$0xff]  }
 0x1a1   :  { %3011 = vmatpush1.bf16.msra.mxu0 %v8750_v12  ;;  %7991 = vmatpush3.bf16.msra.mxu1 %v8788_v30  ;;  %v8828_v12 = vld [vmem:[#allocation2 + $0x828] ss:$28 sps:$4 sm:$0xff]   ;;  %v8866_v30 = vld [vmem:[#allocation6 + $0x118] ss:$28 sps:$4 sm:$0xff]  }
 0x1a2   :  { %3012 = vmatprep.subr.bf16.mxu0 %v8757_v14  ;;  %7992 = vmatprep.subr.bf16.mxu1 %v8789_v16  ;;  %v8834_v14 = vld [vmem:[#allocation2 + $0x864] ss:$28 sps:$4 sm:$0xff]   ;;  %v8874_v16 = vld [vmem:[#allocation6 + $0x154] ss:$28 sps:$4 sm:$0xff]  }
 0x1a5   :  { %3013 = vmatpush1.bf16.msra.mxu0 %v8755_v17  ;;  %7993 = vmatpush3.bf16.msra.mxu1 %v8793_v18  ;;  %v8832_v17 = vld [vmem:[#allocation2 + $0x860] ss:$28 sps:$4 sm:$0xff]  }
 0x1a6   :  { %3014 = vmatprep.subr.bf16.mxu0 %v8762_v20  ;;  %7994 = vmatprep.subr.bf16.mxu1 %v8794_v21  ;;  %v8841_v18 = vld [vmem:[#allocation2 + $0x89c] ss:$28 sps:$4 sm:$0xff]   ;;  %v8880_v21 = vld [vmem:[#allocation6 + $0x18c] ss:$28 sps:$4 sm:$0xff]  }
 0x1a7   :  { %v8872_v20 = vld [vmem:[#allocation6 + $0x150] ss:$28 sps:$4 sm:$0xff]  }
 0x1a9   :  { %3015 = vmatpush1.bf16.msra.mxu0 %v8760_v22  ;;  %7995 = vmatpush3.bf16.msra.mxu1 %v8798_v23  ;;  %v8839_v22 = vld [vmem:[#allocation2 + $0x898] ss:$28 sps:$4 sm:$0xff]   ;;  %v8878_v23 = vld [vmem:[#allocation6 + $0x188] ss:$28 sps:$4 sm:$0xff]  }
 0x1aa   :  { %3016 = vmatprep.subr.bf16.mxu0 %v8767_v24  ;;  %7996 = vmatprep.subr.bf16.mxu1 %v8799_v25  ;;  %v8847_v24 = vld [vmem:[#allocation2 + $0x8d4] ss:$28 sps:$4 sm:$0xff]   ;;  %v8886_v25 = vld [vmem:[#allocation6 + $0x1c4] ss:$28 sps:$4 sm:$0xff]  }
 0x1ad   :  { %3017 = vmatpush1.bf16.msra.mxu0 %v8765_v13  ;;  %7997 = vmatpush3.bf16.msra.mxu1 %v8803_v26  ;;  %v8845_v13 = vld [vmem:[#allocation2 + $0x8d0] ss:$28 sps:$4 sm:$0xff]   ;;  %v8884_v26 = vld [vmem:[#allocation6 + $0x1c0] ss:$28 sps:$4 sm:$0xff]  }
 0x1ae   :  { %3018 = vmatprep.subr.bf16.mxu0 %v8772_v28  ;;  %8163 = vmatprep.subr.bf16.mxu1 %v9656_v33  ;;  %v8853_v28 = vld [vmem:[#allocation2 + $0x90c] ss:$28 sps:$4 sm:$0xff]  }
 0x1b0   :  { %3238 = vmatmul.mubr.bf16.vlgmr.msra.gmra.mrb[12].mxu1 %v9811_v19 }
 0x1b1   :  { %3019 = vmatpush1.bf16.msra.mxu0 %v8770_v29  ;;  %8164 = vmatpush3.bf16.msra.mxu1 %v8807_v31  ;;  %v8892_v29 = vld [vmem:[#allocation6 + $0x1fc] ss:$28 sps:$4 sm:$0xff]  }
 0x1b2   :  { %3020 = vmatprep.subr.bf16.mxu0 %v8777_v32  ;;  %8165 = vmatprep.subr.bf16.mxu1 %v9656_v33  ;;  %v8851_v31 = vld [vmem:[#allocation2 + $0x908] ss:$28 sps:$4 sm:$0xff]  }
 0x1b3   :  { %8179 = vmatprep.mubr.msk.bf16.mxu1 %vm9657_vm0, %v9656_v33  ;;  %v8859_v32 = vld [vmem:[#allocation2 + $0x944] ss:$28 sps:$4 sm:$0xff]  }
 0x1b5   :  { %3021 = vmatpush1.bf16.msra.mxu0 %v8775_v34  ;;  %8166 = vmatpush3.bf16.msra.mxu1 %v8811_v35  ;;  %v8890_v34 = vld [vmem:[#allocation6 + $0x1f8] ss:$28 sps:$4 sm:$0xff]  }
 0x1b6   :  { %3022 = vmatprep.subr.bf16.mxu0 %v8782_v36  ;;  %8167 = vmatprep.subr.bf16.mxu1 %v9656_v33  ;;  %v8898_v35 = vld [vmem:[#allocation6 + $0x234] ss:$28 sps:$4 sm:$0xff]  }
 0x1b7   :  { %v8857_v36 = vld [vmem:[#allocation2 + $0x940] ss:$28 sps:$4 sm:$0xff]  }
 0x1b9   :  { %3023 = vmatpush1.bf16.msra.mxu0 %v8780_v37  ;;  %8168 = vmatpush3.bf16.msra.mxu1 %v8815_v39  ;;  %v8865_v37 = vld [vmem:[#allocation2 + $0x97c] ss:$28 sps:$4 sm:$0xff]   ;;  %v8904_v39 = vld [vmem:[#allocation6 + $0x26c] ss:$28 sps:$4 sm:$0xff]  }
 0x1ba   :  { %3024 = vmatprep.subr.bf16.mxu0 %v8787_v38  ;;  %8169 = vmatprep.subr.bf16.mxu1 %v9656_v33  ;;  %v8896_v38 = vld [vmem:[#allocation6 + $0x230] ss:$28 sps:$4 sm:$0xff]  }
 0x1bd   :  { %3025 = vmatpush1.bf16.msra.mxu0 %v8785_v40  ;;  %8170 = vmatpush3.bf16.msra.mxu1 %v8819_v42  ;;  %v8863_v40 = vld [vmem:[#allocation2 + $0x978] ss:$28 sps:$4 sm:$0xff]   ;;  %v8902_v42 = vld [vmem:[#allocation6 + $0x268] ss:$28 sps:$4 sm:$0xff]  }
 0x1be   :  { %3026 = vmatprep.subr.bf16.mxu0 %v8792_v41  ;;  %8171 = vmatprep.subr.bf16.mxu1 %v9656_v33  ;;  %v8871_v41 = vld [vmem:[#allocation2 + $0x9b4] ss:$28 sps:$4 sm:$0xff]  }
 0x1c1   :  { %3027 = vmatpush1.bf16.msra.mxu0 %v8790_v43  ;;  %8172 = vmatpush3.bf16.msra.mxu1 %v8823_v45  ;;  %v8910_v43 = vld [vmem:[#allocation6 + $0x2a4] ss:$28 sps:$4 sm:$0xff]  }
 0x1c2   :  { %3028 = vmatprep.subr.bf16.mxu0 %v8797_v44  ;;  %8173 = vmatprep.subr.bf16.mxu1 %v9656_v33  ;;  %v8869_v44 = vld [vmem:[#allocation2 + $0x9b0] ss:$28 sps:$4 sm:$0xff]  }
 0x1c3   :  { %v8877_v45 = vld [vmem:[#allocation2 + $0x9ec] ss:$28 sps:$4 sm:$0xff]  }
 0x1c5   :  { %3029 = vmatpush1.bf16.msra.mxu0 %v8795_v46  ;;  %8174 = vmatpush3.bf16.msra.mxu1 %v8827_v49  ;;  %v8908_v46 = vld [vmem:[#allocation6 + $0x2a0] ss:$28 sps:$4 sm:$0xff]  }
 0x1c6   :  { %3030 = vmatprep.subr.bf16.mxu0 %v8802_v47  ;;  %8175 = vmatprep.subr.bf16.mxu1 %v9656_v33  ;;  %v8916_v47 = vld [vmem:[#allocation6 + $0x2dc] ss:$28 sps:$4 sm:$0xff]  }
 0x1c7   :  { %v8875_v49 = vld [vmem:[#allocation2 + $0x9e8] ss:$28 sps:$4 sm:$0xff]  }
 0x1c9   :  { %3031 = vmatpush1.bf16.msra.mxu0 %v8800_v50  ;;  %8176 = vmatpush3.bf16.msra.mxu1 %v8831_v52  ;;  %v8883_v50 = vld [vmem:[#allocation2 + $0xa24] ss:$28 sps:$4 sm:$0xff]   ;;  %v8922_v52 = vld [vmem:[#allocation6 + $0x314] ss:$28 sps:$4 sm:$0xff]  }
 0x1ca   :  { %3032 = vmatprep.subr.bf16.mxu0 %v8806_v51  ;;  %8177 = vmatprep.subr.bf16.mxu1 %v9656_v33  ;;  %v8914_v51 = vld [vmem:[#allocation6 + $0x2d8] ss:$28 sps:$4 sm:$0xff]  }
 0x1cd   :  { %3033 = vmatpush1.bf16.msra.mxu0 %v8804_v53  ;;  %8178 = vmatpush3.bf16.msra.mxu1 %v8835_v55  ;;  %v8881_v53 = vld [vmem:[#allocation2 + $0xa20] ss:$28 sps:$4 sm:$0xff]   ;;  %v8920_v55 = vld [vmem:[#allocation6 + $0x310] ss:$28 sps:$4 sm:$0xff]  }
 0x1ce   :  { %3043 = vmatprep.subr.bf16.mxu0 %v8810_v54  ;;  %5800 = vmatprep.subr.bf16.mxu1 %v8838_v56  ;;  %v8889_v54 = vld [vmem:[#allocation2 + $0xa5c] ss:$28 sps:$4 sm:$0xff]   ;;  %v8928_v56 = vld [vmem:[#allocation6 + $0x34c] ss:$28 sps:$4 sm:$0xff]  }
 0x1d0   :  { %3035 = vmatmul.mubr.bf16.vlgmr.msra.gmra.mrb[4].mxu0 %v9794_v10  ;;  %8180 = vmatmul.mubr.bf16.vlgmr.msra.gmra.mrb[16].mxu1 %v9843_v63  ;;  %v8848_v10 = vld [vmem:[#allocation6 + $0x70] ss:$28 sps:$4 sm:$0xff]  }
 0x1d1   :  { %3044 = vmatpush1.bf16.msra.mxu0 %v8808_v57  ;;  %5801 = vmatpush1.bf16.msra.mxu1 %v8836_v59  ;;  %v8887_v57 = vld [vmem:[#allocation2 + $0xa58] ss:$28 sps:$4 sm:$0xff]   ;;  %v8926_v59 = vld [vmem:[#allocation6 + $0x348] ss:$28 sps:$4 sm:$0xff]  }
 0x1d2   :  { %3045 = vmatprep.subr.bf16.mxu0 %v8814_v58  ;;  %5802 = vmatprep.subr.bf16.mxu1 %v8844_v60  ;;  %v8895_v58 = vld [vmem:[#allocation2 + $0xa94] ss:$28 sps:$4 sm:$0xff]   ;;  %v8934_v60 = vld [vmem:[#allocation6 + $0x384] ss:$28 sps:$4 sm:$0xff]  }
 0x1d3   :  { %3075 = vmatprep.mubr.bf16.mxu0 %v9803_v15  ;;  %v8860_v15 = vld [vmem:[#allocation6 + $0xe0] ss:$28 sps:$4 sm:$0xff]  }
 0x1d5   :  { %3046 = vmatpush1.bf16.msra.mxu0 %v8812_v61  ;;  %5803 = vmatpush1.bf16.msra.mxu1 %v8842_v0  ;;  %v8893_v61 = vld [vmem:[#allocation2 + $0xa90] ss:$28 sps:$4 sm:$0xff]   ;;  %v8899_v0 = vld [vmem:[#allocation2 + $0xac8] ss:$28 sps:$4 sm:$0xff]  }
 0x1d6   :  { %3047 = vmatprep.subr.bf16.mxu0 %v8818_v62  ;;  %5804 = vmatprep.subr.bf16.mxu1 %v8850_v1  ;;  %v8901_v62 = vld [vmem:[#allocation2 + $0xacc] ss:$28 sps:$4 sm:$0xff]   ;;  %v8907_v1 = vld [vmem:[#allocation2 + $0xb04] ss:$28 sps:$4 sm:$0xff]  }
 0x1d9   :  { %3048 = vmatpush1.bf16.msra.mxu0 %v8816_v2  ;;  %5805 = vmatpush1.bf16.msra.mxu1 %v8848_v10  ;;  %v557_v2 = vlaneseq  ;;  %v8913_v10 = vld [vmem:[#allocation2 + $0xb3c] ss:$28 sps:$4 sm:$0xff]  }
 0x1da   :  { %3049 = vmatprep.subr.bf16.mxu0 %v8822_v3  ;;  %5806 = vmatprep.subr.bf16.mxu1 %v8856_v4  ;;  %v8905_v3 = vld [vmem:[#allocation2 + $0xb00] ss:$28 sps:$4 sm:$0xff]  }
 0x1db   :  { %v9849_v4 = vshrl.u32 %v557_v2, 7  ;;  %v8976_v2 = vld [vmem:[#allocation6 + $0x50c] ss:$28 sps:$4 sm:$0xff]  }
 0x1dd   :  { %3050 = vmatpush1.bf16.msra.mxu0 %v8820_v6  ;;  %5807 = vmatpush1.bf16.msra.mxu1 %v8854_v5  ;;  %v8911_v6 = vld [vmem:[#allocation2 + $0xb38] ss:$28 sps:$4 sm:$0xff]   ;;  %v8917_v5 = vld [vmem:[#allocation2 + $0xb70] ss:$28 sps:$4 sm:$0xff]  }
 0x1de   :  { %3051 = vmatprep.subr.bf16.mxu0 %v8826_v7  ;;  %5808 = vmatprep.subr.bf16.mxu1 %v8862_v48  ;;  %v8919_v7 = vld [vmem:[#allocation2 + $0xb74] ss:$28 sps:$4 sm:$0xff]   ;;  %v9851_v48 = vld [vmem:[#allocation4] sm:$0xff] }
 0x1e1   :  { %3052 = vmatpush1.bf16.msra.mxu0 %v8824_v8  ;;  %5809 = vmatpush1.bf16.msra.mxu1 %v8860_v15  ;;  %v563_v8 = vsub.s32 1, %v9849_v4  ;;  %v8925_v15 = vld [vmem:[#allocation2 + $0xbac] ss:$28 sps:$4 sm:$0xff]  }
 0x1e2   :  { %3053 = vmatprep.subr.bf16.mxu0 %v8830_v9  ;;  %5810 = vmatprep.subr.bf16.mxu1 %v8868_v11  ;;  %v571_v9 = vsub.s32 3, %v9849_v4 }
 0x1e5   :  { %3054 = vmatpush1.bf16.msra.mxu0 %v8828_v12  ;;  %5811 = vmatpush1.bf16.msra.mxu1 %v8866_v30  ;;  %v564_v12 = vrot.slane %v9851_v48, %v563_v8  ;;  %v8923_v30 = vld [vmem:[#allocation2 + $0xba8] ss:$28 sps:$4 sm:$0xff]  }
 0x1e6   :  { %3055 = vmatprep.subr.bf16.mxu0 %v8834_v14  ;;  %5812 = vmatprep.subr.bf16.mxu1 %v8874_v16  ;;  %v572_v14 = vrot.slane %v9851_v48, %v571_v9  ;;  %v8931_v16 = vld [vmem:[#allocation2 + $0xbe4] ss:$28 sps:$4 sm:$0xff]  }
 0x1e9   :  { %3056 = vmatpush1.bf16.msra.mxu0 %v8832_v17  ;;  %5813 = vmatpush1.bf16.msra.mxu1 %v8872_v20 }
 0x1ea   :  { %3057 = vmatprep.subr.bf16.mxu0 %v8841_v18  ;;  %5814 = vmatprep.subr.bf16.mxu1 %v8880_v21 }
 0x1ed   :  { %3058 = vmatpush1.bf16.msra.mxu0 %v8839_v22  ;;  %5815 = vmatpush1.bf16.msra.mxu1 %v8878_v23 }
 0x1ee   :  { %3059 = vmatprep.subr.bf16.mxu0 %v8847_v24  ;;  %5816 = vmatprep.subr.bf16.mxu1 %v8886_v25 }
 0x1f1   :  { %3060 = vmatpush1.bf16.msra.mxu0 %v8845_v13  ;;  %5817 = vmatpush1.bf16.msra.mxu1 %v8884_v26  ;;  %v8929_v26 = vld [vmem:[#allocation2 + $0xbe0] ss:$28 sps:$4 sm:$0xff]  }
 0x1f2   :  { %3061 = vmatprep.subr.bf16.mxu0 %v8853_v28  ;;  %5818 = vmatprep.subr.bf16.mxu1 %v8892_v29  ;;  %v8937_v28 = vld [vmem:[#allocation2 + $0xc1c] ss:$28 sps:$4 sm:$0xff]  }
 0x1f5   :  { %3062 = vmatpush1.bf16.msra.mxu0 %v8851_v31  ;;  %5819 = vmatpush1.bf16.msra.mxu1 %v8890_v34 }
 0x1f6   :  { %3063 = vmatprep.subr.bf16.mxu0 %v8859_v32  ;;  %5820 = vmatprep.subr.bf16.mxu1 %v8898_v35 }
 0x1f9   :  { %3064 = vmatpush1.bf16.msra.mxu0 %v8857_v36  ;;  %5821 = vmatpush1.bf16.msra.mxu1 %v8896_v38  ;;  %v8932_v36 = vld [vmem:[#allocation6 + $0x380] ss:$28 sps:$4 sm:$0xff]  }
 0x1fa   :  { %3065 = vmatprep.subr.bf16.mxu0 %v8865_v37  ;;  %5822 = vmatprep.subr.bf16.mxu1 %v8904_v39  ;;  %v8935_v37 = vld [vmem:[#allocation2 + $0xc18] ss:$28 sps:$4 sm:$0xff]   ;;  %v8940_v39 = vld [vmem:[#allocation6 + $0x3bc] ss:$28 sps:$4 sm:$0xff]  }
 0x1fd   :  { %3066 = vmatpush1.bf16.msra.mxu0 %v8863_v40  ;;  %5823 = vmatpush1.bf16.msra.mxu1 %v8902_v42  ;;  %v8943_v40 = vld [vmem:[#allocation6 + $0xc] ss:$28 sps:$4 sm:$0xff]   ;;  %v8938_v42 = vld [vmem:[#allocation6 + $0x3b8] ss:$28 sps:$4 sm:$0xff]  }
 0x1fe   :  { %3067 = vmatprep.subr.bf16.mxu0 %v8871_v41  ;;  %5824 = vmatprep.subr.bf16.mxu1 %v8910_v43  ;;  %v8941_v43 = vld [vmem:[#allocation6 + $0x8] ss:$28 sps:$4 sm:$0xff]  }
 0x201   :  { %3068 = vmatpush1.bf16.msra.mxu0 %v8869_v44  ;;  %5825 = vmatpush1.bf16.msra.mxu1 %v8908_v46  ;;  %v8949_v46 = vld [vmem:[#allocation6 + $0x44] ss:$28 sps:$4 sm:$0xff]  }
 0x202   :  { %3069 = vmatprep.subr.bf16.mxu0 %v8877_v45  ;;  %5826 = vmatprep.subr.bf16.mxu1 %v8916_v47  ;;  %v8946_v45 = vld [vmem:[#allocation6 + $0x3f4] ss:$28 sps:$4 sm:$0xff]  }
 0x203   :  { %v8944_v47 = vld [vmem:[#allocation6 + $0x3f0] ss:$28 sps:$4 sm:$0xff]  }
 0x205   :  { %3070 = vmatpush1.bf16.msra.mxu0 %v8875_v49  ;;  %5827 = vmatpush1.bf16.msra.mxu1 %v8914_v51  ;;  %v8947_v49 = vld [vmem:[#allocation6 + $0x40] ss:$28 sps:$4 sm:$0xff]  }
 0x206   :  { %3071 = vmatprep.subr.bf16.mxu0 %v8883_v50  ;;  %5828 = vmatprep.subr.bf16.mxu1 %v8922_v52  ;;  %v8952_v50 = vld [vmem:[#allocation6 + $0x42c] ss:$28 sps:$4 sm:$0xff]   ;;  %v8955_v51 = vld [vmem:[#allocation6 + $0x7c] ss:$28 sps:$4 sm:$0xff]  }
 0x207   :  { %v8950_v52 = vld [vmem:[#allocation6 + $0x428] ss:$28 sps:$4 sm:$0xff]  }
 0x209   :  { %3072 = vmatpush1.bf16.msra.mxu0 %v8881_v53  ;;  %5829 = vmatpush1.bf16.msra.mxu1 %v8920_v55  ;;  %v8953_v53 = vld [vmem:[#allocation6 + $0x78] ss:$28 sps:$4 sm:$0xff]  }
 0x20a   :  { %3073 = vmatprep.subr.bf16.mxu0 %v8889_v54  ;;  %5830 = vmatprep.subr.bf16.mxu1 %v8928_v56  ;;  %v8958_v54 = vld [vmem:[#allocation6 + $0x464] ss:$28 sps:$4 sm:$0xff]   ;;  %v8961_v55 = vld [vmem:[#allocation6 + $0xb4] ss:$28 sps:$4 sm:$0xff]  }
 0x20b   :  { %v8959_v56 = vld [vmem:[#allocation6 + $0xb0] ss:$28 sps:$4 sm:$0xff]  }
 0x20d   :  { %3074 = vmatpush1.bf16.msra.mxu0 %v8887_v57  ;;  %5831 = vmatpush1.bf16.msra.mxu1 %v8926_v59  ;;  %v8964_v57 = vld [vmem:[#allocation6 + $0x49c] ss:$28 sps:$4 sm:$0xff]  }
 0x20e   :  { %3084 = vmatprep.subr.bf16.mxu0 %v8895_v58  ;;  %5841 = vmatprep.subr.bf16.mxu1 %v8934_v60  ;;  %v8967_v58 = vld [vmem:[#allocation6 + $0xec] ss:$28 sps:$4 sm:$0xff]   ;;  %v8962_v59 = vld [vmem:[#allocation6 + $0x498] ss:$28 sps:$4 sm:$0xff]  }
 0x20f   :  { %v8965_v60 = vld [vmem:[#allocation6 + $0xe8] ss:$28 sps:$4 sm:$0xff]  }
 0x210   :  { %3076 = vmatmul.mubr.bf16.vlgmr.msra.gmra.mrb[4].mxu0 %v9811_v19  ;;  %v559_v19 = vsub.s32 0, %v9849_v4 }
 0x211   :  { %3085 = vmatpush1.bf16.msra.mxu0 %v8893_v61  ;;  %3116 = vmatprep.mubr.bf16.mxu0 %v9655_v27  ;;  %v8970_v61 = vld [vmem:[#allocation6 + $0x4d4] ss:$28 sps:$4 sm:$0xff]  }
 0x212   :  { %3086 = vmatprep.subr.bf16.mxu0 %v8901_v62  ;;  %v560_v11 = vrot.slane %v9851_v48, %v559_v19  ;;  %v8973_v62 = vld [vmem:[#allocation6 + $0x124] ss:$28 sps:$4 sm:$0xff]  }
 0x215   :  { %3087 = vmatpush1.bf16.msra.mxu0 %v8899_v0  ;;  %v8968_v0 = vld [vmem:[#allocation6 + $0x4d0] ss:$28 sps:$4 sm:$0xff]  }
 0x216   :  { %3088 = vmatprep.subr.bf16.mxu0 %v8907_v1  ;;  %v8971_v1 = vld [vmem:[#allocation6 + $0x120] ss:$28 sps:$4 sm:$0xff]  }
 0x219   :  { %3089 = vmatpush1.bf16.msra.mxu0 %v8905_v3  ;;  %v8979_v3 = vld [vmem:[#allocation6 + $0x15c] ss:$28 sps:$4 sm:$0xff]  }
 0x21a   :  { %3090 = vmatprep.subr.bf16.mxu0 %v8913_v10 }
 0x21d   :  { %3091 = vmatpush1.bf16.msra.mxu0 %v8911_v6 }
 0x21e   :  { %3092 = vmatprep.subr.bf16.mxu0 %v8919_v7  ;;  %v8974_v7 = vld [vmem:[#allocation6 + $0x508] ss:$28 sps:$4 sm:$0xff]  }
 0x221   :  { %3093 = vmatpush1.bf16.msra.mxu0 %v8917_v5  ;;  %v8977_v5 = vld [vmem:[#allocation6 + $0x158] ss:$28 sps:$4 sm:$0xff]  }
 0x222   :  { %3094 = vmatprep.subr.bf16.mxu0 %v8925_v15 }
 0x223   :  { %v2790_v17 = vpop.f32.mrb[0].mxu0  ;;  %v9865_v18 = vpop.f32.mrb[0].mxu1 }
 0x224   :  { %v8223_v20 = vadd.f32 %v2790_v17, %v560_v11  ;;  %v2792_v21 = vpop.f32.mrb[1].mxu0  ;;  %v2956_v22 = vpop.f32.mrb[1].mxu1  ;;  %v8983_v17 = vld [vmem:[#allocation6 + $0x190] ss:$28 sps:$4 sm:$0xff]  }
 0x225   :  { %v8224_v23 = vadd.f32 %v2792_v21, %v564_v12  ;;  %v8226_v24 = vadd.f32 %v2956_v22, %v572_v14  ;;  %v2794_v25 = vpop.f32.mrb[2].mxu0  ;;  %v2958_v13 = vpop.f32.mrb[2].mxu1  ;;  %3095 = vmatpush1.bf16.msra.mxu0 %v8923_v30  ;;  %v8982_v12 = vld [vmem:[#allocation6 + $0x544] ss:$28 sps:$4 sm:$0xff]   ;;  %v8985_v14 = vld [vmem:[#allocation6 + $0x194] ss:$28 sps:$4 sm:$0xff]  }
 0x226   :  { %v3285_v29 = vmax.f32 %v8223_v20, 0.0  ;;  %v2795_v31 = vpop.f32.mrb[3].mxu0  ;;  %v2959_v32 = vpop.f32.mrb[3].mxu1  ;;  %3096 = vmatprep.subr.bf16.mxu0 %v8931_v16  ;;  %v8980_v16 = vld [vmem:[#allocation6 + $0x540] ss:$28 sps:$4 sm:$0xff]  }
 0x227   :  { %v3286_v34 = vmax.f32 %v8224_v23, 0.0  ;;  %v3288_v35 = vmax.f32 %v8226_v24, 0.0  ;;  %v8988_v20 = vld [vmem:[#allocation6 + $0x57c] ss:$28 sps:$4 sm:$0xff]   ;;  %v8991_v21 = vld [vmem:[#allocation6 + $0x1cc] ss:$28 sps:$4 sm:$0xff]  }
 0x228   :  { %v9869_v41 = vpack.c.bf16 %v3285_v29, %v3285_v29  ;;  %v8986_v22 = vld [vmem:[#allocation6 + $0x578] ss:$28 sps:$4 sm:$0xff]   ;;  %v8989_v23 = vld [vmem:[#allocation6 + $0x1c8] ss:$28 sps:$4 sm:$0xff]   ;;  %v8992_v13 = vld [vmem:[#allocation6 + $0x5b0] ss:$28 sps:$4 sm:$0xff]  }
 0x229   :  { %v9867_v38 = vpack.c.bf16 %v3286_v34, %v3286_v34  ;;  %3097 = vmatpush1.bf16.msra.mxu0 %v8929_v26  ;;  %v9872_v44 = vpack.c.bf16 %v3288_v35, %v3288_v35  ;;  %v8994_v24 = vld [vmem:[#allocation6 + $0x5b4] ss:$28 sps:$4 sm:$0xff]   ;;  %v8997_v25 = vld [vmem:[#allocation6 + $0x204] ss:$28 sps:$4 sm:$0xff]   ;;  %v9003_v29 = vld [vmem:[#allocation6 + $0x23c] ss:$28 sps:$4 sm:$0xff]  }
 0x22a   :  { %3098 = vmatprep.subr.bf16.mxu0 %v8937_v28  ;;  %v8995_v26 = vld [vmem:[#allocation6 + $0x200] ss:$28 sps:$4 sm:$0xff]   ;;  %v9000_v28 = vld [vmem:[#allocation6 + $0x5ec] ss:$28 sps:$4 sm:$0xff]   ;;  %v9001_v32 = vld [vmem:[#allocation6 + $0x238] ss:$28 sps:$4 sm:$0xff]  }
 0x22b   :  { %5832 = vmatprep.mubr.bf16.mxu1 %v9867_v38  ;;  %v8998_v31 = vld [vmem:[#allocation6 + $0x5e8] ss:$28 sps:$4 sm:$0xff]   ;;  %v9009_v35 = vld [vmem:[#allocation6 + $0x274] ss:$28 sps:$4 sm:$0xff]  }
 0x22c   :  { %5833 = vmatmul.mubr.bf16.vlgmr.msra.gmra.mrb[20].mxu1 %v9869_v41  ;;  %v9006_v34 = vld [vmem:[#allocation6 + $0x624] ss:$28 sps:$4 sm:$0xff]  }
 0x22d   :  { %5842 = vmatpush1.bf16.msra.mxu1 %v8932_v36  ;;  %3099 = vmatpush1.bf16.msra.mxu0 %v8935_v37  ;;  %v9004_v36 = vld [vmem:[#allocation6 + $0x620] ss:$28 sps:$4 sm:$0xff]   ;;  %v9007_v37 = vld [vmem:[#allocation6 + $0x270] ss:$28 sps:$4 sm:$0xff]  }
 0x22e   :  { %5873 = vmatprep.mubr.bf16.mxu1 %v9872_v44  ;;  %5843 = vmatprep.subr.bf16.mxu1 %v8940_v39  ;;  %v9012_v39 = vld [vmem:[#allocation6 + $0x65c] ss:$28 sps:$4 sm:$0xff]  }
 0x22f   :  { %5964 = vmatprep.subr.bf16.mxu0 %v8943_v40  ;;  %v567_v40 = vsub.s32 2, %v9849_v4 }
 0x230   :  { %3117 = vmatmul.mubr.bf16.vlgmr.msra.gmra.mrb[4].mxu0 %v9843_v63  ;;  %v8956_v63 = vld [vmem:[#allocation6 + $0x460] ss:$28 sps:$4 sm:$0xff]  }
 0x231   :  { %5844 = vmatpush1.bf16.msra.mxu1 %v8938_v42  ;;  %5965 = vmatpush1.bf16.msra.mxu0 %v8941_v43  ;;  %v9015_v42 = vld [vmem:[#allocation6 + $0x2ac] ss:$28 sps:$4 sm:$0xff]   ;;  %v583_v43 = vsub.s32 6, %v9849_v4 }
 0x232   :  { %5996 = vmatprep.mubr.bf16.mxu0 %v9867_v38  ;;  %5845 = vmatprep.subr.bf16.mxu1 %v8946_v45  ;;  %v9010_v45 = vld [vmem:[#allocation6 + $0x658] ss:$28 sps:$4 sm:$0xff]  }
 0x233   :  { %5966 = vmatprep.subr.bf16.mxu0 %v8949_v46  ;;  %v9013_v46 = vld [vmem:[#allocation6 + $0x2a8] ss:$28 sps:$4 sm:$0xff]  }
 0x235   :  { %5846 = vmatpush1.bf16.msra.mxu1 %v8944_v47  ;;  %5967 = vmatpush1.bf16.msra.mxu0 %v8947_v49  ;;  %v9018_v47 = vld [vmem:[#allocation6 + $0x694] ss:$28 sps:$4 sm:$0xff]   ;;  %v568_v49 = vrot.slane %v9851_v48, %v567_v40 }
 0x236   :  { %5847 = vmatprep.subr.bf16.mxu1 %v8952_v50  ;;  %5968 = vmatprep.subr.bf16.mxu0 %v8955_v51  ;;  %v9021_v50 = vld [vmem:[#allocation6 + $0x2e4] ss:$28 sps:$4 sm:$0xff]   ;;  %v584_v51 = vrot.slane %v9851_v48, %v583_v43 }
 0x239   :  { %5848 = vmatpush1.bf16.msra.mxu1 %v8950_v52  ;;  %5969 = vmatpush1.bf16.msra.mxu0 %v8953_v53  ;;  %v9016_v52 = vld [vmem:[#allocation6 + $0x690] ss:$28 sps:$4 sm:$0xff]   ;;  %v9019_v53 = vld [vmem:[#allocation6 + $0x2e0] ss:$28 sps:$4 sm:$0xff]  }
 0x23a   :  { %5849 = vmatprep.subr.bf16.mxu1 %v8958_v54  ;;  %5970 = vmatprep.subr.bf16.mxu0 %v8961_v55  ;;  %v9024_v54 = vld [vmem:[#allocation6 + $0x6cc] ss:$28 sps:$4 sm:$0xff]   ;;  %v8225_v55 = vadd.f32 %v9865_v18, %v568_v49 }
 0x23b   :  { %v9028_v18 = vld [vmem:[#allocation6 + $0x350] ss:$28 sps:$4 sm:$0xff]  }
 0x23d   :  { %5850 = vmatpush1.bf16.msra.mxu1 %v8956_v63  ;;  %5971 = vmatpush1.bf16.msra.mxu0 %v8959_v56  ;;  %v9027_v63 = vld [vmem:[#allocation6 + $0x31c] ss:$28 sps:$4 sm:$0xff]   ;;  %v9022_v56 = vld [vmem:[#allocation6 + $0x6c8] ss:$28 sps:$4 sm:$0xff]  }
 0x23e   :  { %5851 = vmatprep.subr.bf16.mxu1 %v8964_v57  ;;  %5972 = vmatprep.subr.bf16.mxu0 %v8967_v58  ;;  %v9025_v57 = vld [vmem:[#allocation6 + $0x318] ss:$28 sps:$4 sm:$0xff]  }
 0x241   :  { %5852 = vmatpush1.bf16.msra.mxu1 %v8962_v59  ;;  %5973 = vmatpush1.bf16.msra.mxu0 %v8965_v60  ;;  %v9030_v60 = vld [vmem:[#allocation6 + $0x354] ss:$28 sps:$4 sm:$0xff]  }
 0x242   :  { %5853 = vmatprep.subr.bf16.mxu1 %v8970_v61  ;;  %5974 = vmatprep.subr.bf16.mxu0 %v8973_v62 }
 0x243   :  { %v7954_v10 = vpop.f32.mrb[4].mxu1 }
 0x244   :  { %v7955_v6 = vpop.f32.mrb[5].mxu1 }
 0x245   :  { %5854 = vmatpush1.bf16.msra.mxu1 %v8968_v0  ;;  %5975 = vmatpush1.bf16.msra.mxu0 %v8971_v1  ;;  %v9878_v15 = vadd.f32 %v7955_v6, %v7954_v10  ;;  %v7957_v11 = vpop.f32.mrb[6].mxu1  ;;  %v9081_v0 = vld [vmem:[#allocation6 + $0x704] ss:$28 sps:$4 sm:$0xff]   ;;  %v3287_v1 = vmax.f32 %v8225_v55, 0.0  ;;  %v9033_v6 = vld [vmem:[#allocation6 + $0x38c] ss:$28 sps:$4 sm:$0xff]  }
 0x246   :  { %5855 = vmatprep.subr.bf16.mxu1 %v8976_v2  ;;  %5976 = vmatprep.subr.bf16.mxu0 %v8979_v3  ;;  %v7958_v30 = vpop.f32.mrb[7].mxu1  ;;  %v9079_v10 = vld [vmem:[#allocation6 + $0x700] ss:$28 sps:$4 sm:$0xff]   ;;  %v9052_v55 = vld [vmem:[#allocation6 + $0x510] ss:$28 sps:$4 sm:$0xff]  }
 0x247   :  { %v3160_v58 = vadd.f32 %v9878_v15, %v584_v51  ;;  %v9031_v15 = vld [vmem:[#allocation6 + $0x388] ss:$28 sps:$4 sm:$0xff]   ;;  %v9034_v30 = vld [vmem:[#allocation6 + $0x3c0] ss:$28 sps:$4 sm:$0xff]  }
 0x248   :  { %v9036_v11 = vld [vmem:[#allocation6 + $0x3c4] ss:$28 sps:$4 sm:$0xff]  }
 0x249   :  { %5856 = vmatpush1.bf16.msra.mxu1 %v8974_v7  ;;  %5977 = vmatpush1.bf16.msra.mxu0 %v8977_v5  ;;  %v9087_v7 = vld [vmem:[#allocation6 + $0x73c] ss:$28 sps:$4 sm:$0xff]   ;;  %v9892_v5 = vpack.c.bf16 %v3287_v1, %v3287_v1  ;;  %v9147_v1 = vld [vmem:[#allocation6 + $0x96c] ss:$28 sps:$4 sm:$0xff]  }
 0x24a   :  { %5857 = vmatprep.subr.bf16.mxu1 %v8982_v12  ;;  %5978 = vmatprep.subr.bf16.mxu0 %v8985_v14  ;;  %v9085_v12 = vld [vmem:[#allocation6 + $0x738] ss:$28 sps:$4 sm:$0xff]  }
 0x24b   :  { %v9093_v14 = vld [vmem:[#allocation6 + $0x774] ss:$28 sps:$4 sm:$0xff]  }
 0x24d   :  { %5858 = vmatpush1.bf16.msra.mxu1 %v8980_v16  ;;  %5979 = vmatpush1.bf16.msra.mxu0 %v8983_v17  ;;  %v9039_v16 = vld [vmem:[#allocation6 + $0x3fc] ss:$28 sps:$4 sm:$0xff]   ;;  %v9091_v17 = vld [vmem:[#allocation6 + $0x770] ss:$28 sps:$4 sm:$0xff]  }
 0x24e   :  { %5859 = vmatprep.subr.bf16.mxu1 %v8988_v20  ;;  %5980 = vmatprep.subr.bf16.mxu0 %v8991_v21  ;;  %v9099_v20 = vld [vmem:[#allocation6 + $0x7ac] ss:$28 sps:$4 sm:$0xff]   ;;  %v9037_v21 = vld [vmem:[#allocation6 + $0x3f8] ss:$28 sps:$4 sm:$0xff]  }
 0x251   :  { %5860 = vmatpush1.bf16.msra.mxu1 %v8986_v22  ;;  %5981 = vmatpush1.bf16.msra.mxu0 %v8989_v23  ;;  %v9042_v22 = vld [vmem:[#allocation6 + $0x434] ss:$28 sps:$4 sm:$0xff]   ;;  %v9097_v23 = vld [vmem:[#allocation6 + $0x7a8] ss:$28 sps:$4 sm:$0xff]  }
 0x252   :  { %5861 = vmatprep.subr.bf16.mxu1 %v8994_v24  ;;  %5982 = vmatprep.subr.bf16.mxu0 %v8997_v25  ;;  %v9105_v24 = vld [vmem:[#allocation6 + $0x7e4] ss:$28 sps:$4 sm:$0xff]   ;;  %v9040_v25 = vld [vmem:[#allocation6 + $0x430] ss:$28 sps:$4 sm:$0xff]  }
 0x255   :  { %5862 = vmatpush1.bf16.msra.mxu1 %v8992_v13  ;;  %5983 = vmatpush1.bf16.msra.mxu0 %v8995_v26  ;;  %v9045_v13 = vld [vmem:[#allocation6 + $0x46c] ss:$28 sps:$4 sm:$0xff]   ;;  %v9103_v26 = vld [vmem:[#allocation6 + $0x7e0] ss:$28 sps:$4 sm:$0xff]  }
 0x256   :  { %5863 = vmatprep.subr.bf16.mxu1 %v9000_v28  ;;  %5984 = vmatprep.subr.bf16.mxu0 %v9003_v29  ;;  %v9111_v28 = vld [vmem:[#allocation6 + $0x81c] ss:$28 sps:$4 sm:$0xff]   ;;  %v9043_v29 = vld [vmem:[#allocation6 + $0x468] ss:$28 sps:$4 sm:$0xff]  }
 0x259   :  { %5864 = vmatpush1.bf16.msra.mxu1 %v8998_v31  ;;  %5985 = vmatpush1.bf16.msra.mxu0 %v9001_v32  ;;  %v9048_v31 = vld [vmem:[#allocation6 + $0x4a4] ss:$28 sps:$4 sm:$0xff]   ;;  %v9109_v32 = vld [vmem:[#allocation6 + $0x818] ss:$28 sps:$4 sm:$0xff]  }
 0x25a   :  { %5865 = vmatprep.subr.bf16.mxu1 %v9006_v34  ;;  %5986 = vmatprep.subr.bf16.mxu0 %v9009_v35  ;;  %v9117_v34 = vld [vmem:[#allocation6 + $0x854] ss:$28 sps:$4 sm:$0xff]   ;;  %v9046_v35 = vld [vmem:[#allocation6 + $0x4a0] ss:$28 sps:$4 sm:$0xff]  }
 0x25d   :  { %5866 = vmatpush1.bf16.msra.mxu1 %v9004_v36  ;;  %5987 = vmatpush1.bf16.msra.mxu0 %v9007_v37  ;;  %v9051_v36 = vld [vmem:[#allocation6 + $0x4dc] ss:$28 sps:$4 sm:$0xff]   ;;  %v9115_v37 = vld [vmem:[#allocation6 + $0x850] ss:$28 sps:$4 sm:$0xff]  }
 0x25e   :  { %5867 = vmatprep.subr.bf16.mxu1 %v9012_v39  ;;  %5988 = vmatprep.subr.bf16.mxu0 %v9015_v42  ;;  %v9123_v42 = vld [vmem:[#allocation6 + $0x88c] ss:$28 sps:$4 sm:$0xff]  }
 0x261   :  { %5868 = vmatpush1.bf16.msra.mxu1 %v9010_v45  ;;  %5989 = vmatpush1.bf16.msra.mxu0 %v9013_v46  ;;  %v9049_v46 = vld [vmem:[#allocation6 + $0x4d8] ss:$28 sps:$4 sm:$0xff]  }
 0x262   :  { %5869 = vmatprep.subr.bf16.mxu1 %v9018_v47  ;;  %5990 = vmatprep.subr.bf16.mxu0 %v9021_v50  ;;  %v9054_v50 = vld [vmem:[#allocation6 + $0x514] ss:$28 sps:$4 sm:$0xff]  }
 0x263   :  { %v7976_v59 = vpop.f32.mrb[8].mxu1 }
 0x264   :  { %v7977_v61 = vpop.f32.mrb[9].mxu1 }
 0x265   :  { %5870 = vmatpush1.bf16.msra.mxu1 %v9016_v52  ;;  %5991 = vmatpush1.bf16.msra.mxu0 %v9019_v53  ;;  %v7978_v48 = vadd.f32 %v7977_v61, %v7976_v59  ;;  %v7979_v62 = vpop.f32.mrb[10].mxu1  ;;  %v9121_v52 = vld [vmem:[#allocation6 + $0x888] ss:$28 sps:$4 sm:$0xff]   ;;  %v9141_v61 = vld [vmem:[#allocation6 + $0x934] ss:$28 sps:$4 sm:$0xff]  }
 0x266   :  { %5871 = vmatprep.subr.bf16.mxu1 %v9024_v54  ;;  %5992 = vmatprep.subr.bf16.mxu0 %v9027_v63  ;;  %v7980_v2 = vpop.f32.mrb[11].mxu1  ;;  %v9129_v54 = vld [vmem:[#allocation6 + $0x8c4] ss:$28 sps:$4 sm:$0xff]   ;;  %v9057_v63 = vld [vmem:[#allocation6 + $0x54c] ss:$28 sps:$4 sm:$0xff]  }
 0x267   :  { %v9890_v3 = vadd.f32 %v7978_v48, %v3160_v58  ;;  %v9055_v58 = vld [vmem:[#allocation6 + $0x548] ss:$28 sps:$4 sm:$0xff]   ;;  %v9058_v48 = vld [vmem:[#allocation6 + $0x580] ss:$28 sps:$4 sm:$0xff]   ;;  %v9061_v2 = vld [vmem:[#allocation6 + $0x5b8] ss:$28 sps:$4 sm:$0xff]  }
 0x268   :  { %v9060_v59 = vld [vmem:[#allocation6 + $0x584] ss:$28 sps:$4 sm:$0xff]   ;;  %v9063_v62 = vld [vmem:[#allocation6 + $0x5bc] ss:$28 sps:$4 sm:$0xff]  }
 0x269   :  { %5872 = vmatpush1.bf16.msra.mxu1 %v9022_v56  ;;  %5993 = vmatpush1.bf16.msra.mxu0 %v9025_v57  ;;  %v9127_v56 = vld [vmem:[#allocation6 + $0x8c0] ss:$28 sps:$4 sm:$0xff]  }
 0x26a   :  { %5994 = vmatprep.subr.bf16.mxu0 %v9030_v60  ;;  %5882 = vmatprep.subr.bf16.mxu1 %v9081_v0  ;;  %v9135_v57 = vld [vmem:[#allocation6 + $0x8fc] ss:$28 sps:$4 sm:$0xff]   ;;  %v9139_v0 = vld [vmem:[#allocation6 + $0x930] ss:$28 sps:$4 sm:$0xff]  }
 0x26b   :  { %v9133_v60 = vld [vmem:[#allocation6 + $0x8f8] ss:$28 sps:$4 sm:$0xff]  }
 0x26c   :  { %5874 = vmatmul.mubr.bf16.vlgmr.msra.gmra.mrb[20].mxu1 %v9892_v5 }
 0x26d   :  { %5995 = vmatpush1.bf16.msra.mxu0 %v9028_v18  ;;  %5883 = vmatpush1.bf16.msra.mxu1 %v9079_v10  ;;  %v9066_v18 = vld [vmem:[#allocation6 + $0x5f4] ss:$28 sps:$4 sm:$0xff]   ;;  %v9153_v10 = vld [vmem:[#allocation6 + $0x9a4] ss:$28 sps:$4 sm:$0xff]  }
 0x26e   :  { %6005 = vmatprep.subr.bf16.mxu0 %v9033_v6  ;;  %5884 = vmatprep.subr.bf16.mxu1 %v9087_v7  ;;  %v9064_v6 = vld [vmem:[#allocation6 + $0x5f0] ss:$28 sps:$4 sm:$0xff]  }
 0x26f   :  { %v9069_v7 = vld [vmem:[#allocation6 + $0x62c] ss:$28 sps:$4 sm:$0xff]  }
 0x270   :  { %5997 = vmatmul.mubr.bf16.vlgmr.msra.gmra.mrb[8].mxu0 %v9869_v41 }
 0x271   :  { %6006 = vmatpush1.bf16.msra.mxu0 %v9031_v15  ;;  %6037 = vmatprep.mubr.bf16.mxu0 %v9872_v44  ;;  %v9151_v15 = vld [vmem:[#allocation6 + $0x9a0] ss:$28 sps:$4 sm:$0xff]  }
 0x272   :  { %6007 = vmatprep.subr.bf16.mxu0 %v9036_v11  ;;  %5885 = vmatpush1.bf16.msra.mxu1 %v9085_v12  ;;  %v9159_v11 = vld [vmem:[#allocation6 + $0x9dc] ss:$28 sps:$4 sm:$0xff]   ;;  %v9067_v12 = vld [vmem:[#allocation6 + $0x628] ss:$28 sps:$4 sm:$0xff]  }
 0x273   :  { %5886 = vmatprep.subr.bf16.mxu1 %v9093_v14  ;;  %v9072_v14 = vld [vmem:[#allocation6 + $0x664] ss:$28 sps:$4 sm:$0xff]  }
 0x275   :  { %6008 = vmatpush1.bf16.msra.mxu0 %v9034_v30  ;;  %v9157_v30 = vld [vmem:[#allocation6 + $0x9d8] ss:$28 sps:$4 sm:$0xff]  }
 0x276   :  { %6009 = vmatprep.subr.bf16.mxu0 %v9039_v16  ;;  %5887 = vmatpush1.bf16.msra.mxu1 %v9091_v17  ;;  %v9165_v16 = vld [vmem:[#allocation6 + $0xa14] ss:$28 sps:$4 sm:$0xff]   ;;  %v9070_v17 = vld [vmem:[#allocation6 + $0x660] ss:$28 sps:$4 sm:$0xff]  }
 0x277   :  { %5888 = vmatprep.subr.bf16.mxu1 %v9099_v20  ;;  %v9075_v20 = vld [vmem:[#allocation6 + $0x69c] ss:$28 sps:$4 sm:$0xff]  }
 0x279   :  { %6010 = vmatpush1.bf16.msra.mxu0 %v9037_v21  ;;  %v9163_v21 = vld [vmem:[#allocation6 + $0xa10] ss:$28 sps:$4 sm:$0xff]  }
 0x27a   :  { %6011 = vmatprep.subr.bf16.mxu0 %v9042_v22  ;;  %5889 = vmatpush1.bf16.msra.mxu1 %v9097_v23  ;;  %v9171_v23 = vld [vmem:[#allocation6 + $0xa4c] ss:$28 sps:$4 sm:$0xff]  }
 0x27b   :  { %5890 = vmatprep.subr.bf16.mxu1 %v9105_v24 }
 0x27d   :  { %6012 = vmatpush1.bf16.msra.mxu0 %v9040_v25 }
 0x27e   :  { %6013 = vmatprep.subr.bf16.mxu0 %v9045_v13  ;;  %5891 = vmatpush1.bf16.msra.mxu1 %v9103_v26  ;;  %v9073_v13 = vld [vmem:[#allocation6 + $0x698] ss:$28 sps:$4 sm:$0xff]  }
 0x27f   :  { %5892 = vmatprep.subr.bf16.mxu1 %v9111_v28  ;;  %v9078_v28 = vld [vmem:[#allocation6 + $0x6d4] ss:$28 sps:$4 sm:$0xff]  }
 0x281   :  { %6014 = vmatpush1.bf16.msra.mxu0 %v9043_v29  ;;  %v9169_v29 = vld [vmem:[#allocation6 + $0xa48] ss:$28 sps:$4 sm:$0xff]  }
 0x282   :  { %6015 = vmatprep.subr.bf16.mxu0 %v9048_v31  ;;  %5893 = vmatpush1.bf16.msra.mxu1 %v9109_v32  ;;  %v9177_v32 = vld [vmem:[#allocation6 + $0xa84] ss:$28 sps:$4 sm:$0xff]  }
 0x283   :  { %v7998_v39 = vpop.f32.mrb[12].mxu1  ;;  %5894 = vmatprep.subr.bf16.mxu1 %v9117_v34  ;;  %v9076_v34 = vld [vmem:[#allocation6 + $0x6d0] ss:$28 sps:$4 sm:$0xff]  }
 0x284   :  { %v7999_v45 = vpop.f32.mrb[13].mxu1 }
 0x285   :  { %6016 = vmatpush1.bf16.msra.mxu0 %v9046_v35  ;;  %v8000_v47 = vadd.f32 %v7999_v45, %v7998_v39  ;;  %v8001_v49 = vpop.f32.mrb[14].mxu1  ;;  %v9084_v35 = vld [vmem:[#allocation6 + $0x70c] ss:$28 sps:$4 sm:$0xff]   ;;  %v9088_v39 = vld [vmem:[#allocation6 + $0x740] ss:$28 sps:$4 sm:$0xff]  }
 0x286   :  { %6017 = vmatprep.subr.bf16.mxu0 %v9051_v36  ;;  %v8002_v51 = vpop.f32.mrb[15].mxu1  ;;  %5895 = vmatpush1.bf16.msra.mxu1 %v9115_v37  ;;  %v9082_v36 = vld [vmem:[#allocation6 + $0x708] ss:$28 sps:$4 sm:$0xff]   ;;  %v9094_v45 = vld [vmem:[#allocation6 + $0x778] ss:$28 sps:$4 sm:$0xff]  }
 0x287   :  { %v3240_v53 = vadd.f32 %v8000_v47, %v9890_v3  ;;  %5896 = vmatprep.subr.bf16.mxu1 %v9123_v42  ;;  %v9145_v3 = vld [vmem:[#allocation6 + $0x968] ss:$28 sps:$4 sm:$0xff]   ;;  %v9096_v42 = vld [vmem:[#allocation6 + $0x77c] ss:$28 sps:$4 sm:$0xff]   ;;  %v9100_v47 = vld [vmem:[#allocation6 + $0x7b0] ss:$28 sps:$4 sm:$0xff]  }
 0x288   :  { %v9090_v37 = vld [vmem:[#allocation6 + $0x744] ss:$28 sps:$4 sm:$0xff]   ;;  %v9108_v49 = vld [vmem:[#allocation6 + $0x7ec] ss:$28 sps:$4 sm:$0xff]  }
 0x289   :  { %6018 = vmatpush1.bf16.msra.mxu0 %v9049_v46  ;;  %v9102_v46 = vld [vmem:[#allocation6 + $0x7b4] ss:$28 sps:$4 sm:$0xff]   ;;  %v9114_v51 = vld [vmem:[#allocation6 + $0x824] ss:$28 sps:$4 sm:$0xff]  }
 0x28a   :  { %6019 = vmatprep.subr.bf16.mxu0 %v9054_v50  ;;  %5897 = vmatpush1.bf16.msra.mxu1 %v9121_v52  ;;  %v9106_v50 = vld [vmem:[#allocation6 + $0x7e8] ss:$28 sps:$4 sm:$0xff]   ;;  %v9112_v52 = vld [vmem:[#allocation6 + $0x820] ss:$28 sps:$4 sm:$0xff]  }
 0x28b   :  { %5898 = vmatprep.subr.bf16.mxu1 %v9129_v54  ;;  %v9118_v54 = vld [vmem:[#allocation6 + $0x858] ss:$28 sps:$4 sm:$0xff]  }
 0x28d   :  { %6020 = vmatpush1.bf16.msra.mxu0 %v9052_v55  ;;  %v9126_v55 = vld [vmem:[#allocation6 + $0x894] ss:$28 sps:$4 sm:$0xff]  }
 0x28e   :  { %6021 = vmatprep.subr.bf16.mxu0 %v9057_v63  ;;  %5899 = vmatpush1.bf16.msra.mxu1 %v9127_v56  ;;  %v9124_v63 = vld [vmem:[#allocation6 + $0x890] ss:$28 sps:$4 sm:$0xff]  }
 0x28f   :  { %5900 = vmatprep.subr.bf16.mxu1 %v9135_v57  ;;  %v9132_v56 = vld [vmem:[#allocation6 + $0x8cc] ss:$28 sps:$4 sm:$0xff]  }
 0x290   :  { %v9130_v57 = vld [vmem:[#allocation6 + $0x8c8] ss:$28 sps:$4 sm:$0xff]  }
 0x291   :  { %6022 = vmatpush1.bf16.msra.mxu0 %v9055_v58  ;;  %v9138_v58 = vld [vmem:[#allocation6 + $0x904] ss:$28 sps:$4 sm:$0xff]  }
 0x292   :  { %6023 = vmatprep.subr.bf16.mxu0 %v9060_v59  ;;  %5901 = vmatpush1.bf16.msra.mxu1 %v9133_v60  ;;  %v9136_v59 = vld [vmem:[#allocation6 + $0x900] ss:$28 sps:$4 sm:$0xff]  }
 0x293   :  { %5902 = vmatprep.subr.bf16.mxu1 %v9141_v61  ;;  %v9144_v60 = vld [vmem:[#allocation6 + $0x93c] ss:$28 sps:$4 sm:$0xff]  }
 0x294   :  { %v9142_v61 = vld [vmem:[#allocation6 + $0x938] ss:$28 sps:$4 sm:$0xff]  }
 0x295   :  { %6024 = vmatpush1.bf16.msra.mxu0 %v9058_v48  ;;  %v9150_v48 = vld [vmem:[#allocation6 + $0x974] ss:$28 sps:$4 sm:$0xff]  }
 0x296   :  { %6025 = vmatprep.subr.bf16.mxu0 %v9063_v62  ;;  %5903 = vmatpush1.bf16.msra.mxu1 %v9139_v0  ;;  %v9148_v62 = vld [vmem:[#allocation6 + $0x970] ss:$28 sps:$4 sm:$0xff]  }
 0x297   :  { %5904 = vmatprep.subr.bf16.mxu1 %v9147_v1  ;;  %v9156_v0 = vld [vmem:[#allocation6 + $0x9ac] ss:$28 sps:$4 sm:$0xff]  }
 0x298   :  { %v9154_v1 = vld [vmem:[#allocation6 + $0x9a8] ss:$28 sps:$4 sm:$0xff]  }
 0x299   :  { %6026 = vmatpush1.bf16.msra.mxu0 %v9061_v2  ;;  %v9162_v2 = vld [vmem:[#allocation6 + $0x9e4] ss:$28 sps:$4 sm:$0xff]  }
 0x29a   :  { %6027 = vmatprep.subr.bf16.mxu0 %v9066_v18  ;;  %5905 = vmatpush1.bf16.msra.mxu1 %v9145_v3  ;;  %v9160_v18 = vld [vmem:[#allocation6 + $0x9e0] ss:$28 sps:$4 sm:$0xff]  }
 0x29b   :  { %5906 = vmatprep.subr.bf16.mxu1 %v9153_v10  ;;  %v9168_v3 = vld [vmem:[#allocation6 + $0xa1c] ss:$28 sps:$4 sm:$0xff]  }
 0x29c   :  { %v9166_v10 = vld [vmem:[#allocation6 + $0xa18] ss:$28 sps:$4 sm:$0xff]  }
 0x29d   :  { %6028 = vmatpush1.bf16.msra.mxu0 %v9064_v6  ;;  %v9174_v6 = vld [vmem:[#allocation6 + $0xa54] ss:$28 sps:$4 sm:$0xff]  }
 0x29e   :  { %6029 = vmatprep.subr.bf16.mxu0 %v9069_v7  ;;  %5907 = vmatpush1.bf16.msra.mxu1 %v9151_v15  ;;  %v9172_v7 = vld [vmem:[#allocation6 + $0xa50] ss:$28 sps:$4 sm:$0xff]  }
 0x29f   :  { %5908 = vmatprep.subr.bf16.mxu1 %v9159_v11  ;;  %v9180_v15 = vld [vmem:[#allocation6 + $0xa8c] ss:$28 sps:$4 sm:$0xff]   ;;  %v575_v11 = vsub.s32 4, %v9849_v4 }
 0x2a1   :  { %6030 = vmatpush1.bf16.msra.mxu0 %v9067_v12  ;;  %v579_v12 = vsub.s32 5, %v9849_v4 }
 0x2a2   :  { %6031 = vmatprep.subr.bf16.mxu0 %v9072_v14  ;;  %5909 = vmatpush1.bf16.msra.mxu1 %v9157_v30  ;;  %v9504_v14 = vld [vmem:[#allocation4] sm:$0xff] }
 0x2a3   :  { %v3279_v22 = vpop.f32.mrb[16].mxu1  ;;  %5910 = vmatprep.subr.bf16.mxu1 %v9165_v16  ;;  %v576_v30 = vrot.slane %v9504_v14, %v575_v11  ;;  %v580_v16 = vrot.slane %v9504_v14, %v579_v12  ;;  %v9230_v14 = vld [vmem:[#allocation6 + $0x4c] ss:$28 sps:$4 sm:$0xff]  }
 0x2a4   :  { %v9898_v24 = vadd.f32 %v3279_v22, %v3240_v53  ;;  %v8181_v25 = vpop.f32.mrb[17].mxu1  ;;  %v9120_v53 = vld [vmem:[#allocation6 + $0x85c] ss:$28 sps:$4 sm:$0xff]  }
 0x2a5   :  { %6032 = vmatpush1.bf16.msra.mxu0 %v9070_v17  ;;  %v3282_v26 = vpop.f32.mrb[18].mxu1 }
 0x2a6   :  { %6033 = vmatprep.subr.bf16.mxu0 %v9075_v20  ;;  %5911 = vmatpush1.bf16.msra.mxu1 %v9163_v21  ;;  %v8182_v31 = vpop.f32.mrb[19].mxu1 }
 0x2a7   :  { %5912 = vmatprep.subr.bf16.mxu1 %v9171_v23  ;;  %v9178_v31 = vld [vmem:[#allocation6 + $0xa88] ss:$28 sps:$4 sm:$0xff]  }
 0x2a9   :  { %6034 = vmatpush1.bf16.msra.mxu0 %v9073_v13 }
 0x2aa   :  { %6035 = vmatprep.subr.bf16.mxu0 %v9078_v28  ;;  %5913 = vmatpush1.bf16.msra.mxu1 %v9169_v29  ;;  %v9175_v29 = vld [vmem:[#allocation6 + $0xa80] ss:$28 sps:$4 sm:$0xff]  }
 0x2ab   :  { %5923 = vmatprep.subr.bf16.mxu1 %v9177_v32 }
 0x2ad   :  { %6036 = vmatpush1.bf16.msra.mxu0 %v9076_v34  ;;  %v9183_v34 = vld [vmem:[#allocation6 + $0xabc] ss:$28 sps:$4 sm:$0xff]  }
 0x2ae   :  { %6046 = vmatprep.subr.bf16.mxu0 %v9084_v35  ;;  %v9186_v35 = vld [vmem:[#allocation6 + $0xac4] ss:$28 sps:$4 sm:$0xff]  }
 0x2b0   :  { %6038 = vmatmul.mubr.bf16.vlgmr.msra.gmra.mrb[8].mxu0 %v9892_v5 }
 0x2b1   :  { %6047 = vmatpush1.bf16.msra.mxu0 %v9082_v36  ;;  %v9181_v36 = vld [vmem:[#allocation6 + $0xab8] ss:$28 sps:$4 sm:$0xff]  }
 0x2b2   :  { %6048 = vmatprep.subr.bf16.mxu0 %v9090_v37  ;;  %v9184_v37 = vld [vmem:[#allocation6 + $0xac0] ss:$28 sps:$4 sm:$0xff]  }
 0x2b5   :  { %6049 = vmatpush1.bf16.msra.mxu0 %v9088_v39  ;;  %v9189_v39 = vld [vmem:[#allocation6 + $0xaf4] ss:$28 sps:$4 sm:$0xff]  }
 0x2b6   :  { %6050 = vmatprep.subr.bf16.mxu0 %v9096_v42  ;;  %v9192_v42 = vld [vmem:[#allocation6 + $0xafc] ss:$28 sps:$4 sm:$0xff]  }
 0x2b9   :  { %6051 = vmatpush1.bf16.msra.mxu0 %v9094_v45  ;;  %v9187_v45 = vld [vmem:[#allocation6 + $0xaf0] ss:$28 sps:$4 sm:$0xff]  }
 0x2ba   :  { %6052 = vmatprep.subr.bf16.mxu0 %v9102_v46  ;;  %v9190_v46 = vld [vmem:[#allocation6 + $0xaf8] ss:$28 sps:$4 sm:$0xff]  }
 0x2bd   :  { %6053 = vmatpush1.bf16.msra.mxu0 %v9100_v47  ;;  %v9195_v47 = vld [vmem:[#allocation6 + $0xb2c] ss:$28 sps:$4 sm:$0xff]  }
 0x2be   :  { %6054 = vmatprep.subr.bf16.mxu0 %v9108_v49  ;;  %v9198_v49 = vld [vmem:[#allocation6 + $0xb34] ss:$28 sps:$4 sm:$0xff]  }
 0x2c1   :  { %6055 = vmatpush1.bf16.msra.mxu0 %v9106_v50  ;;  %v9193_v50 = vld [vmem:[#allocation6 + $0xb28] ss:$28 sps:$4 sm:$0xff]  }
 0x2c2   :  { %6056 = vmatprep.subr.bf16.mxu0 %v9114_v51  ;;  %v9196_v51 = vld [vmem:[#allocation6 + $0xb30] ss:$28 sps:$4 sm:$0xff]  }
 0x2c5   :  { %6057 = vmatpush1.bf16.msra.mxu0 %v9112_v52  ;;  %v9201_v52 = vld [vmem:[#allocation6 + $0xb64] ss:$28 sps:$4 sm:$0xff]  }
 0x2c6   :  { %6058 = vmatprep.subr.bf16.mxu0 %v9120_v53  ;;  %v9204_v53 = vld [vmem:[#allocation6 + $0xb6c] ss:$28 sps:$4 sm:$0xff]  }
 0x2c9   :  { %6059 = vmatpush1.bf16.msra.mxu0 %v9118_v54  ;;  %v9199_v54 = vld [vmem:[#allocation6 + $0xb60] ss:$28 sps:$4 sm:$0xff]  }
 0x2ca   :  { %6060 = vmatprep.subr.bf16.mxu0 %v9126_v55  ;;  %v9202_v55 = vld [vmem:[#allocation6 + $0xb68] ss:$28 sps:$4 sm:$0xff]  }
 0x2cd   :  { %6061 = vmatpush1.bf16.msra.mxu0 %v9124_v63  ;;  %v9207_v63 = vld [vmem:[#allocation6 + $0xb9c] ss:$28 sps:$4 sm:$0xff]  }
 0x2ce   :  { %6062 = vmatprep.subr.bf16.mxu0 %v9132_v56  ;;  %v9210_v56 = vld [vmem:[#allocation6 + $0xba4] ss:$28 sps:$4 sm:$0xff]  }
 0x2d1   :  { %6063 = vmatpush1.bf16.msra.mxu0 %v9130_v57  ;;  %v9205_v57 = vld [vmem:[#allocation6 + $0xb98] ss:$28 sps:$4 sm:$0xff]  }
 0x2d2   :  { %6064 = vmatprep.subr.bf16.mxu0 %v9138_v58  ;;  %v9208_v58 = vld [vmem:[#allocation6 + $0xba0] ss:$28 sps:$4 sm:$0xff]  }
 0x2d5   :  { %6065 = vmatpush1.bf16.msra.mxu0 %v9136_v59  ;;  %v9213_v59 = vld [vmem:[#allocation6 + $0xbd4] ss:$28 sps:$4 sm:$0xff]  }
 0x2d6   :  { %6066 = vmatprep.subr.bf16.mxu0 %v9144_v60  ;;  %v9216_v60 = vld [vmem:[#allocation6 + $0xbdc] ss:$28 sps:$4 sm:$0xff]  }
 0x2d9   :  { %6067 = vmatpush1.bf16.msra.mxu0 %v9142_v61  ;;  %v9211_v61 = vld [vmem:[#allocation6 + $0xbd0] ss:$28 sps:$4 sm:$0xff]  }
 0x2da   :  { %6068 = vmatprep.subr.bf16.mxu0 %v9150_v48  ;;  %v9214_v48 = vld [vmem:[#allocation6 + $0xbd8] ss:$28 sps:$4 sm:$0xff]  }
 0x2dd   :  { %6069 = vmatpush1.bf16.msra.mxu0 %v9148_v62  ;;  %v9219_v62 = vld [vmem:[#allocation6 + $0xc0c] ss:$28 sps:$4 sm:$0xff]  }
 0x2de   :  { %6070 = vmatprep.subr.bf16.mxu0 %v9156_v0  ;;  %v9222_v0 = vld [vmem:[#allocation6 + $0xc14] ss:$28 sps:$4 sm:$0xff]  }
 0x2e1   :  { %6071 = vmatpush1.bf16.msra.mxu0 %v9154_v1  ;;  %v9217_v1 = vld [vmem:[#allocation6 + $0xc08] ss:$28 sps:$4 sm:$0xff]  }
 0x2e2   :  { %6072 = vmatprep.subr.bf16.mxu0 %v9162_v2  ;;  %v9220_v2 = vld [vmem:[#allocation6 + $0xc10] ss:$28 sps:$4 sm:$0xff]  }
 0x2e5   :  { %6073 = vmatpush1.bf16.msra.mxu0 %v9160_v18  ;;  %v3291_v18 = vmax.f32 %v9898_v24, 0.0  ;;  %v9228_v24 = vld [vmem:[#allocation6 + $0x48] ss:$28 sps:$4 sm:$0xff]  }
 0x2e6   :  { %6074 = vmatprep.subr.bf16.mxu0 %v9168_v3  ;;  %v9225_v3 = vld [vmem:[#allocation6 + $0x14] ss:$28 sps:$4 sm:$0xff]  }
 0x2e9   :  { %6075 = vmatpush1.bf16.msra.mxu0 %v9166_v10  ;;  %v9226_v10 = vld [vmem:[#allocation6 + $0x1d8] ss:$28 sps:$4 sm:$0xff]  }
 0x2ea   :  { %6076 = vmatprep.subr.bf16.mxu0 %v9174_v6  ;;  %v9223_v6 = vld [vmem:[#allocation6 + $0x10] ss:$28 sps:$4 sm:$0xff]  }
 0x2ed   :  { %6077 = vmatpush1.bf16.msra.mxu0 %v9172_v7  ;;  %v9918_v7 = vpack.c.bf16 %v3291_v18, %v3291_v18  ;;  %v9282_v18 = vld [vmem:[#allocation6 + $0x440] ss:$28 sps:$4 sm:$0xff]  }
 0x2ee   :  { %6087 = vmatprep.subr.bf16.mxu0 %v9180_v15  ;;  %v9227_v15 = vld [vmem:[#allocation6 + $0x18] ss:$28 sps:$4 sm:$0xff]  }
 0x303   :  { %v3118_v17 = vpop.f32.mrb[4].mxu0 }
 0x304   :  { %v8227_v20 = vadd.f32 %v3118_v17, %v576_v30  ;;  %v3120_v21 = vpop.f32.mrb[5].mxu0  ;;  %v9231_v30 = vld [vmem:[#allocation6 + $0x210] ss:$28 sps:$4 sm:$0xff]   ;;  %v9235_v17 = vld [vmem:[#allocation6 + $0x84] ss:$28 sps:$4 sm:$0xff]  }
 0x305   :  { %v8228_v22 = vadd.f32 %v3120_v21, %v580_v16  ;;  %v3122_v23 = vpop.f32.mrb[6].mxu0  ;;  %v9232_v16 = vld [vmem:[#allocation6 + $0x50] ss:$28 sps:$4 sm:$0xff]   ;;  %v9233_v21 = vld [vmem:[#allocation6 + $0x80] ss:$28 sps:$4 sm:$0xff]  }
 0x306   :  { %v3289_v25 = vmax.f32 %v8227_v20, 0.0  ;;  %v3123_v13 = vpop.f32.mrb[7].mxu0  ;;  %v9236_v20 = vld [vmem:[#allocation6 + $0x248] ss:$28 sps:$4 sm:$0xff]   ;;  %v9240_v23 = vld [vmem:[#allocation6 + $0xbc] ss:$28 sps:$4 sm:$0xff]  }
 0x307   :  { %v3290_v26 = vmax.f32 %v8228_v22, 0.0  ;;  %v9237_v22 = vld [vmem:[#allocation6 + $0x88] ss:$28 sps:$4 sm:$0xff]   ;;  %v9238_v13 = vld [vmem:[#allocation6 + $0xb8] ss:$28 sps:$4 sm:$0xff]  }
 0x308   :  { %v9909_v32 = vpack.c.bf16 %v3289_v25, %v3289_v25  ;;  %v9241_v25 = vld [vmem:[#allocation6 + $0x280] ss:$28 sps:$4 sm:$0xff]  }
 0x309   :  { %v9907_v28 = vpack.c.bf16 %v3290_v26, %v3290_v26  ;;  %v9242_v26 = vld [vmem:[#allocation6 + $0xc0] ss:$28 sps:$4 sm:$0xff]  }
 0x30b   :  { %5914 = vmatprep.mubr.bf16.mxu1 %v9907_v28  ;;  %6078 = vmatprep.mubr.bf16.mxu0 %v9907_v28 }
 0x30c   :  { %5915 = vmatmul.mubr.bf16.vlgmr.msra.gmra.mrb[20].mxu1 %v9909_v32  ;;  %6079 = vmatmul.mubr.bf16.vlgmr.msra.gmra.mrb[8].mxu0 %v9909_v32 }
 0x30d   :  { %5924 = vmatpush1.bf16.msra.mxu1 %v9175_v29  ;;  %6088 = vmatpush1.bf16.msra.mxu0 %v9178_v31  ;;  %v9245_v29 = vld [vmem:[#allocation6 + $0xf4] ss:$28 sps:$4 sm:$0xff]  }
 0x30e   :  { %5925 = vmatprep.subr.bf16.mxu1 %v9183_v34  ;;  %6089 = vmatprep.subr.bf16.mxu0 %v9186_v35  ;;  %v9243_v31 = vld [vmem:[#allocation6 + $0xf0] ss:$28 sps:$4 sm:$0xff]   ;;  %v9247_v34 = vld [vmem:[#allocation6 + $0xf8] ss:$28 sps:$4 sm:$0xff]  }
 0x30f   :  { %5955 = vmatprep.mubr.bf16.mxu1 %v9655_v27  ;;  %6119 = vmatprep.mubr.bf16.mxu0 %v9655_v27  ;;  %v9250_v35 = vld [vmem:[#allocation6 + $0x12c] ss:$28 sps:$4 sm:$0xff]  }
 0x311   :  { %5926 = vmatpush1.bf16.msra.mxu1 %v9181_v36  ;;  %6090 = vmatpush1.bf16.msra.mxu0 %v9184_v37  ;;  %v9251_v36 = vld [vmem:[#allocation6 + $0x2f0] ss:$28 sps:$4 sm:$0xff]   ;;  %v9248_v37 = vld [vmem:[#allocation6 + $0x128] ss:$28 sps:$4 sm:$0xff]  }
 0x312   :  { %5927 = vmatprep.subr.bf16.mxu1 %v9189_v39  ;;  %6091 = vmatprep.subr.bf16.mxu0 %v9192_v42  ;;  %v9252_v39 = vld [vmem:[#allocation6 + $0x130] ss:$28 sps:$4 sm:$0xff]   ;;  %v9255_v42 = vld [vmem:[#allocation6 + $0x164] ss:$28 sps:$4 sm:$0xff]  }
 0x315   :  { %5928 = vmatpush1.bf16.msra.mxu1 %v9187_v45  ;;  %6092 = vmatpush1.bf16.msra.mxu0 %v9190_v46  ;;  %v9256_v45 = vld [vmem:[#allocation6 + $0x328] ss:$28 sps:$4 sm:$0xff]   ;;  %v9253_v46 = vld [vmem:[#allocation6 + $0x160] ss:$28 sps:$4 sm:$0xff]  }
 0x316   :  { %5929 = vmatprep.subr.bf16.mxu1 %v9195_v47  ;;  %6093 = vmatprep.subr.bf16.mxu0 %v9198_v49  ;;  %v9257_v47 = vld [vmem:[#allocation6 + $0x168] ss:$28 sps:$4 sm:$0xff]   ;;  %v9260_v49 = vld [vmem:[#allocation6 + $0x19c] ss:$28 sps:$4 sm:$0xff]  }
 0x319   :  { %5930 = vmatpush1.bf16.msra.mxu1 %v9193_v50  ;;  %6094 = vmatpush1.bf16.msra.mxu0 %v9196_v51  ;;  %v9261_v50 = vld [vmem:[#allocation6 + $0x360] ss:$28 sps:$4 sm:$0xff]   ;;  %v9258_v51 = vld [vmem:[#allocation6 + $0x198] ss:$28 sps:$4 sm:$0xff]  }
 0x31a   :  { %5931 = vmatprep.subr.bf16.mxu1 %v9201_v52  ;;  %6095 = vmatprep.subr.bf16.mxu0 %v9204_v53  ;;  %v9262_v52 = vld [vmem:[#allocation6 + $0x1a0] ss:$28 sps:$4 sm:$0xff]   ;;  %v9265_v53 = vld [vmem:[#allocation6 + $0x1d4] ss:$28 sps:$4 sm:$0xff]  }
 0x31d   :  { %5932 = vmatpush1.bf16.msra.mxu1 %v9199_v54  ;;  %6096 = vmatpush1.bf16.msra.mxu0 %v9202_v55  ;;  %v9266_v54 = vld [vmem:[#allocation6 + $0x558] ss:$28 sps:$4 sm:$0xff]   ;;  %v9263_v55 = vld [vmem:[#allocation6 + $0x1d0] ss:$28 sps:$4 sm:$0xff]  }
 0x31e   :  { %5933 = vmatprep.subr.bf16.mxu1 %v9207_v63  ;;  %6097 = vmatprep.subr.bf16.mxu0 %v9210_v56  ;;  %v9267_v63 = vld [vmem:[#allocation6 + $0x398] ss:$28 sps:$4 sm:$0xff]   ;;  %v9270_v56 = vld [vmem:[#allocation6 + $0x20c] ss:$28 sps:$4 sm:$0xff]  }
 0x321   :  { %5934 = vmatpush1.bf16.msra.mxu1 %v9205_v57  ;;  %6098 = vmatpush1.bf16.msra.mxu0 %v9208_v58  ;;  %v9271_v57 = vld [vmem:[#allocation6 + $0x590] ss:$28 sps:$4 sm:$0xff]   ;;  %v9268_v58 = vld [vmem:[#allocation6 + $0x208] ss:$28 sps:$4 sm:$0xff]  }
 0x322   :  { %5935 = vmatprep.subr.bf16.mxu1 %v9213_v59  ;;  %6099 = vmatprep.subr.bf16.mxu0 %v9216_v60  ;;  %v9272_v59 = vld [vmem:[#allocation6 + $0x3d0] ss:$28 sps:$4 sm:$0xff]   ;;  %v9275_v60 = vld [vmem:[#allocation6 + $0x244] ss:$28 sps:$4 sm:$0xff]  }
 0x325   :  { %5936 = vmatpush1.bf16.msra.mxu1 %v9211_v61  ;;  %6100 = vmatpush1.bf16.msra.mxu0 %v9214_v48  ;;  %v9276_v61 = vld [vmem:[#allocation6 + $0x5c8] ss:$28 sps:$4 sm:$0xff]   ;;  %v9273_v48 = vld [vmem:[#allocation6 + $0x240] ss:$28 sps:$4 sm:$0xff]  }
 0x326   :  { %5937 = vmatprep.subr.bf16.mxu1 %v9219_v62  ;;  %6101 = vmatprep.subr.bf16.mxu0 %v9222_v0  ;;  %v9277_v62 = vld [vmem:[#allocation6 + $0x408] ss:$28 sps:$4 sm:$0xff]   ;;  %v9280_v0 = vld [vmem:[#allocation6 + $0x27c] ss:$28 sps:$4 sm:$0xff]  }
 0x329   :  { %5938 = vmatpush1.bf16.msra.mxu1 %v9217_v1  ;;  %6102 = vmatpush1.bf16.msra.mxu0 %v9220_v2  ;;  %v9281_v1 = vld [vmem:[#allocation6 + $0x600] ss:$28 sps:$4 sm:$0xff]   ;;  %v9278_v2 = vld [vmem:[#allocation6 + $0x278] ss:$28 sps:$4 sm:$0xff]  }
 0x32a   :  { %6128 = vmatprep.subr.bf16.mxu1 %v9225_v3  ;;  %8013 = vmatprep.subr.bf16.mxu0 %v9226_v10  ;;  %v9285_v3 = vld [vmem:[#allocation6 + $0x2b4] ss:$28 sps:$4 sm:$0xff]  }
 0x32b   :  { %v9286_v10 = vld [vmem:[#allocation6 + $0x638] ss:$28 sps:$4 sm:$0xff]  }
 0x32c   :  { %5956 = vmatmul.mubr.bf16.vlgmr.msra.gmra.mrb[20].mxu1 %v9918_v7  ;;  %6120 = vmatmul.mubr.bf16.vlgmr.msra.gmra.mrb[8].mxu0 %v9918_v7 }
 0x32d   :  { %6129 = vmatpush1.bf16.msra.mxu1 %v9223_v6  ;;  %6160 = vmatprep.mubr.bf16.mxu1 %v9867_v38  ;;  %v9283_v6 = vld [vmem:[#allocation6 + $0x2b0] ss:$28 sps:$4 sm:$0xff]  }
 0x32e   :  { %8014 = vmatpush3.bf16.msra.mxu0 %v9227_v15  ;;  %6324 = vmatprep.mubr.bf16.mxu0 %v9867_v38  ;;  %v9246_v38 = vld [vmem:[#allocation6 + $0x2b8] ss:$28 sps:$4 sm:$0xff]  }
 0x32f   :  { %6130 = vmatprep.subr.bf16.mxu1 %v9230_v14  ;;  %8015 = vmatprep.subr.bf16.mxu0 %v9231_v30  ;;  %v9287_v15 = vld [vmem:[#allocation6 + $0x478] ss:$28 sps:$4 sm:$0xff]   ;;  %v9290_v14 = vld [vmem:[#allocation6 + $0x2ec] ss:$28 sps:$4 sm:$0xff]  }
 0x330   :  { %v9291_v30 = vld [vmem:[#allocation6 + $0x670] ss:$28 sps:$4 sm:$0xff]  }
 0x331   :  { %6131 = vmatpush1.bf16.msra.mxu1 %v9228_v24  ;;  %v9288_v24 = vld [vmem:[#allocation6 + $0x2e8] ss:$28 sps:$4 sm:$0xff]  }
 0x332   :  { %8016 = vmatpush3.bf16.msra.mxu0 %v9232_v16  ;;  %6132 = vmatprep.subr.bf16.mxu1 %v9235_v17  ;;  %v9292_v16 = vld [vmem:[#allocation6 + $0x4b0] ss:$28 sps:$4 sm:$0xff]   ;;  %v9295_v17 = vld [vmem:[#allocation6 + $0x324] ss:$28 sps:$4 sm:$0xff]  }
 0x333   :  { %8017 = vmatprep.subr.bf16.mxu0 %v9236_v20  ;;  %v9296_v20 = vld [vmem:[#allocation6 + $0x6a8] ss:$28 sps:$4 sm:$0xff]  }
 0x335   :  { %6133 = vmatpush1.bf16.msra.mxu1 %v9233_v21  ;;  %v9293_v21 = vld [vmem:[#allocation6 + $0x320] ss:$28 sps:$4 sm:$0xff]  }
 0x336   :  { %8018 = vmatpush3.bf16.msra.mxu0 %v9237_v22  ;;  %6134 = vmatprep.subr.bf16.mxu1 %v9240_v23  ;;  %v9297_v22 = vld [vmem:[#allocation6 + $0x4e8] ss:$28 sps:$4 sm:$0xff]   ;;  %v9300_v23 = vld [vmem:[#allocation6 + $0x35c] ss:$28 sps:$4 sm:$0xff]  }
 0x337   :  { %8019 = vmatprep.subr.bf16.mxu0 %v9241_v25  ;;  %v9301_v25 = vld [vmem:[#allocation6 + $0x6e0] ss:$28 sps:$4 sm:$0xff]  }
 0x339   :  { %6135 = vmatpush1.bf16.msra.mxu1 %v9238_v13  ;;  %v9298_v13 = vld [vmem:[#allocation6 + $0x358] ss:$28 sps:$4 sm:$0xff]  }
 0x33a   :  { %8020 = vmatpush3.bf16.msra.mxu0 %v9242_v26  ;;  %6136 = vmatprep.subr.bf16.mxu1 %v9245_v29  ;;  %v9302_v26 = vld [vmem:[#allocation6 + $0x520] ss:$28 sps:$4 sm:$0xff]   ;;  %v9305_v29 = vld [vmem:[#allocation6 + $0x394] ss:$28 sps:$4 sm:$0xff]  }
 0x33b   :  { %8021 = vmatprep.subr.bf16.mxu0 %v9246_v38  ;;  %v9306_v38 = vld [vmem:[#allocation6 + $0x8d8] ss:$28 sps:$4 sm:$0xff]  }
 0x33d   :  { %6137 = vmatpush1.bf16.msra.mxu1 %v9243_v31  ;;  %v9303_v31 = vld [vmem:[#allocation6 + $0x390] ss:$28 sps:$4 sm:$0xff]  }
 0x33e   :  { %8022 = vmatpush3.bf16.msra.mxu0 %v9247_v34  ;;  %6138 = vmatprep.subr.bf16.mxu1 %v9250_v35  ;;  %v9307_v34 = vld [vmem:[#allocation6 + $0x718] ss:$28 sps:$4 sm:$0xff]   ;;  %v9310_v35 = vld [vmem:[#allocation6 + $0x3cc] ss:$28 sps:$4 sm:$0xff]  }
 0x33f   :  { %8023 = vmatprep.subr.bf16.mxu0 %v9251_v36  ;;  %v9311_v36 = vld [vmem:[#allocation6 + $0x910] ss:$28 sps:$4 sm:$0xff]  }
 0x341   :  { %6139 = vmatpush1.bf16.msra.mxu1 %v9248_v37  ;;  %v9308_v37 = vld [vmem:[#allocation6 + $0x3c8] ss:$28 sps:$4 sm:$0xff]  }
 0x342   :  { %8024 = vmatpush3.bf16.msra.mxu0 %v9252_v39  ;;  %6140 = vmatprep.subr.bf16.mxu1 %v9255_v42  ;;  %v9312_v39 = vld [vmem:[#allocation6 + $0x750] ss:$28 sps:$4 sm:$0xff]   ;;  %v9315_v42 = vld [vmem:[#allocation6 + $0x404] ss:$28 sps:$4 sm:$0xff]  }
 0x343   :  { %8025 = vmatprep.subr.bf16.mxu0 %v9256_v45  ;;  %v9316_v45 = vld [vmem:[#allocation6 + $0x948] ss:$28 sps:$4 sm:$0xff]  }
 0x345   :  { %6141 = vmatpush1.bf16.msra.mxu1 %v9253_v46  ;;  %v9313_v46 = vld [vmem:[#allocation6 + $0x400] ss:$28 sps:$4 sm:$0xff]  }
 0x346   :  { %8026 = vmatpush3.bf16.msra.mxu0 %v9257_v47  ;;  %6142 = vmatprep.subr.bf16.mxu1 %v9260_v49  ;;  %v9320_v47 = vld [vmem:[#allocation6 + $0x43c] ss:$28 sps:$4 sm:$0xff]  }
 0x347   :  { %8027 = vmatprep.subr.bf16.mxu0 %v9261_v50  ;;  %v9321_v49 = vld [vmem:[#allocation6 + $0x980] ss:$28 sps:$4 sm:$0xff]   ;;  %v9318_v50 = vld [vmem:[#allocation6 + $0x438] ss:$28 sps:$4 sm:$0xff]  }
 0x349   :  { %6143 = vmatpush1.bf16.msra.mxu1 %v9258_v51  ;;  %v9325_v51 = vld [vmem:[#allocation6 + $0x474] ss:$28 sps:$4 sm:$0xff]  }
 0x34a   :  { %8028 = vmatpush3.bf16.msra.mxu0 %v9262_v52  ;;  %6144 = vmatprep.subr.bf16.mxu1 %v9265_v53  ;;  %v9326_v52 = vld [vmem:[#allocation6 + $0x9b8] ss:$28 sps:$4 sm:$0xff]   ;;  %v9323_v53 = vld [vmem:[#allocation6 + $0x470] ss:$28 sps:$4 sm:$0xff]  }
 0x34b   :  { %8035 = vmatprep.subr.bf16.mxu0 %v9266_v54  ;;  %v9327_v54 = vld [vmem:[#allocation6 + $0x7f8] ss:$28 sps:$4 sm:$0xff]  }
 0x34d   :  { %6325 = vmatmul.mubr.bf16.vlgmr.msra.gmra.mrb[12].mxu0 %v9869_v41  ;;  %6145 = vmatpush1.bf16.msra.mxu1 %v9263_v55  ;;  %v9330_v55 = vld [vmem:[#allocation6 + $0x4ac] ss:$28 sps:$4 sm:$0xff]  }
 0x34e   :  { %8036 = vmatpush3.bf16.msra.mxu0 %v9267_v63  ;;  %6364 = vmatprep.mubr.bf16.mxu0 %v9872_v44  ;;  %v9331_v63 = vld [vmem:[#allocation6 + $0x9f0] ss:$28 sps:$4 sm:$0xff]  }
 0x34f   :  { %6146 = vmatprep.subr.bf16.mxu1 %v9270_v56  ;;  %8037 = vmatprep.subr.bf16.mxu0 %v9271_v57  ;;  %v9328_v56 = vld [vmem:[#allocation6 + $0x4a8] ss:$28 sps:$4 sm:$0xff]   ;;  %v9332_v57 = vld [vmem:[#allocation6 + $0x830] ss:$28 sps:$4 sm:$0xff]  }
 0x351   :  { %6147 = vmatpush1.bf16.msra.mxu1 %v9268_v58  ;;  %v9335_v58 = vld [vmem:[#allocation6 + $0x4e4] ss:$28 sps:$4 sm:$0xff]  }
 0x352   :  { %8038 = vmatpush3.bf16.msra.mxu0 %v9272_v59  ;;  %6148 = vmatprep.subr.bf16.mxu1 %v9275_v60  ;;  %v9336_v59 = vld [vmem:[#allocation6 + $0xa28] ss:$28 sps:$4 sm:$0xff]   ;;  %v9333_v60 = vld [vmem:[#allocation6 + $0x4e0] ss:$28 sps:$4 sm:$0xff]  }
 0x353   :  { %8039 = vmatprep.subr.bf16.mxu0 %v9276_v61  ;;  %v9337_v61 = vld [vmem:[#allocation6 + $0x868] ss:$28 sps:$4 sm:$0xff]  }
 0x355   :  { %6149 = vmatpush1.bf16.msra.mxu1 %v9273_v48  ;;  %v9340_v48 = vld [vmem:[#allocation6 + $0x51c] ss:$28 sps:$4 sm:$0xff]  }
 0x356   :  { %8040 = vmatpush3.bf16.msra.mxu0 %v9277_v62  ;;  %6150 = vmatprep.subr.bf16.mxu1 %v9280_v0  ;;  %v9341_v62 = vld [vmem:[#allocation6 + $0xa60] ss:$28 sps:$4 sm:$0xff]   ;;  %v9338_v0 = vld [vmem:[#allocation6 + $0x518] ss:$28 sps:$4 sm:$0xff]  }
 0x357   :  { %8041 = vmatprep.subr.bf16.mxu0 %v9281_v1  ;;  %v9342_v1 = vld [vmem:[#allocation6 + $0x8a0] ss:$28 sps:$4 sm:$0xff]  }
 0x359   :  { %6151 = vmatpush1.bf16.msra.mxu1 %v9278_v2  ;;  %v9345_v2 = vld [vmem:[#allocation6 + $0x554] ss:$28 sps:$4 sm:$0xff]  }
 0x35a   :  { %8042 = vmatpush3.bf16.msra.mxu0 %v9282_v18  ;;  %6152 = vmatprep.subr.bf16.mxu1 %v9285_v3  ;;  %v9343_v18 = vld [vmem:[#allocation6 + $0x550] ss:$28 sps:$4 sm:$0xff]   ;;  %v9346_v3 = vld [vmem:[#allocation6 + $0xa98] ss:$28 sps:$4 sm:$0xff]  }
 0x35b   :  { %8043 = vmatprep.subr.bf16.mxu0 %v9286_v10  ;;  %v9349_v10 = vld [vmem:[#allocation6 + $0x58c] ss:$28 sps:$4 sm:$0xff]  }
 0x35d   :  { %6153 = vmatpush1.bf16.msra.mxu1 %v9283_v6  ;;  %v9347_v6 = vld [vmem:[#allocation6 + $0x588] ss:$28 sps:$4 sm:$0xff]  }
 0x35e   :  { %8044 = vmatpush3.bf16.msra.mxu0 %v9287_v15  ;;  %6154 = vmatprep.subr.bf16.mxu1 %v9290_v14  ;;  %v9350_v15 = vld [vmem:[#allocation6 + $0xad0] ss:$28 sps:$4 sm:$0xff]   ;;  %v9353_v14 = vld [vmem:[#allocation6 + $0x5c4] ss:$28 sps:$4 sm:$0xff]  }
 0x35f   :  { %8045 = vmatprep.subr.bf16.mxu0 %v9291_v30  ;;  %v9351_v30 = vld [vmem:[#allocation6 + $0x5c0] ss:$28 sps:$4 sm:$0xff]  }
 0x361   :  { %6155 = vmatpush1.bf16.msra.mxu1 %v9288_v24  ;;  %v9354_v24 = vld [vmem:[#allocation6 + $0xb08] ss:$28 sps:$4 sm:$0xff]  }
 0x362   :  { %8046 = vmatpush3.bf16.msra.mxu0 %v9292_v16  ;;  %6156 = vmatprep.subr.bf16.mxu1 %v9295_v17  ;;  %v9357_v16 = vld [vmem:[#allocation6 + $0x5fc] ss:$28 sps:$4 sm:$0xff]  }
 0x363   :  { %8047 = vmatprep.subr.bf16.mxu0 %v9296_v20  ;;  %v9355_v17 = vld [vmem:[#allocation6 + $0x5f8] ss:$28 sps:$4 sm:$0xff]   ;;  %v9358_v20 = vld [vmem:[#allocation6 + $0xb40] ss:$28 sps:$4 sm:$0xff]  }
 0x365   :  { %6157 = vmatpush1.bf16.msra.mxu1 %v9293_v21  ;;  %v9361_v21 = vld [vmem:[#allocation6 + $0x634] ss:$28 sps:$4 sm:$0xff]  }
 0x366   :  { %8048 = vmatpush3.bf16.msra.mxu0 %v9297_v22  ;;  %6158 = vmatprep.subr.bf16.mxu1 %v9300_v23  ;;  %v9359_v22 = vld [vmem:[#allocation6 + $0x630] ss:$28 sps:$4 sm:$0xff]   ;;  %v9362_v23 = vld [vmem:[#allocation6 + $0xb78] ss:$28 sps:$4 sm:$0xff]  }
 0x367   :  { %8049 = vmatprep.subr.bf16.mxu0 %v9301_v25  ;;  %v9365_v25 = vld [vmem:[#allocation6 + $0x66c] ss:$28 sps:$4 sm:$0xff]  }
 0x369   :  { %6159 = vmatpush1.bf16.msra.mxu1 %v9298_v13  ;;  %v9363_v13 = vld [vmem:[#allocation6 + $0x668] ss:$28 sps:$4 sm:$0xff]  }
 0x36a   :  { %8050 = vmatpush3.bf16.msra.mxu0 %v9302_v26  ;;  %6169 = vmatprep.subr.bf16.mxu1 %v9305_v29  ;;  %v9366_v26 = vld [vmem:[#allocation6 + $0xbb0] ss:$28 sps:$4 sm:$0xff]   ;;  %v9369_v29 = vld [vmem:[#allocation6 + $0x6a4] ss:$28 sps:$4 sm:$0xff]  }
 0x36b   :  { %8057 = vmatprep.subr.bf16.mxu0 %v9306_v38  ;;  %v9367_v38 = vld [vmem:[#allocation6 + $0x6a0] ss:$28 sps:$4 sm:$0xff]  }
 0x36c   :  { %6161 = vmatmul.mubr.bf16.vlgmr.msra.gmra.mrb[24].mxu1 %v9869_v41  ;;  %v9317_v41 = vld [vmem:[#allocation6 + $0x788] ss:$28 sps:$4 sm:$0xff]  }
 0x36d   :  { %6365 = vmatmul.mubr.bf16.vlgmr.msra.gmra.mrb[16].mxu0 %v9892_v5  ;;  %6170 = vmatpush1.bf16.msra.mxu1 %v9303_v31  ;;  %v9370_v31 = vld [vmem:[#allocation6 + $0xbe8] ss:$28 sps:$4 sm:$0xff]  }
 0x36e   :  { %6201 = vmatprep.mubr.bf16.mxu1 %v9872_v44  ;;  %8058 = vmatpush3.bf16.msra.mxu0 %v9307_v34  ;;  %v9322_v44 = vld [vmem:[#allocation6 + $0x7c0] ss:$28 sps:$4 sm:$0xff]  }
 0x36f   :  { %6404 = vmatprep.mubr.bf16.mxu0 %v9907_v28  ;;  %6171 = vmatprep.subr.bf16.mxu1 %v9310_v35  ;;  %v9373_v34 = vld [vmem:[#allocation6 + $0x6dc] ss:$28 sps:$4 sm:$0xff]  }
 0x370   :  { %8059 = vmatprep.subr.bf16.mxu0 %v9311_v36  ;;  %v9371_v35 = vld [vmem:[#allocation6 + $0x6d8] ss:$28 sps:$4 sm:$0xff]   ;;  %v9374_v36 = vld [vmem:[#allocation6 + $0xc20] ss:$28 sps:$4 sm:$0xff]  }
 0x371   :  { %6172 = vmatpush1.bf16.msra.mxu1 %v9308_v37  ;;  %v9377_v37 = vld [vmem:[#allocation6 + $0x714] ss:$28 sps:$4 sm:$0xff]  }
 0x372   :  { %8060 = vmatpush3.bf16.msra.mxu0 %v9312_v39  ;;  %6173 = vmatprep.subr.bf16.mxu1 %v9315_v42  ;;  %v9423_v39 = vld [vmem:[#allocation9 + $0x40] sm:$0xff]  }
 0x373   :  { %8061 = vmatprep.subr.bf16.mxu0 %v9316_v45  ;;  %v9375_v42 = vld [vmem:[#allocation6 + $0x710] ss:$28 sps:$4 sm:$0xff]  }
 0x374   :  { %v9380_v45 = vld [vmem:[#allocation6 + $0x74c] ss:$28 sps:$4 sm:$0xff]  }
 0x375   :  { %6174 = vmatpush1.bf16.msra.mxu1 %v9313_v46  ;;  %v9424_v46 = vld [vmem:[#allocation9] sm:$0xff]  }
 0x376   :  { %8062 = vmatpush3.bf16.msra.mxu0 %v9317_v41  ;;  %6175 = vmatprep.subr.bf16.mxu1 %v9320_v47  ;;  %v9428_v41 = vld [vmem:[#allocation9 + $0x48] sm:$0xff]   ;;  %v9378_v47 = vld [vmem:[#allocation6 + $0x748] ss:$28 sps:$4 sm:$0xff]  }
 0x377   :  { %8063 = vmatprep.subr.bf16.mxu0 %v9321_v49  ;;  %v9383_v49 = vld [vmem:[#allocation6 + $0x784] ss:$28 sps:$4 sm:$0xff]  }
 0x379   :  { %6176 = vmatpush1.bf16.msra.mxu1 %v9318_v50  ;;  %v9429_v50 = vld [vmem:[#allocation9 + $0x8] sm:$0xff]  }
 0x37a   :  { %8064 = vmatpush3.bf16.msra.mxu0 %v9322_v44  ;;  %6177 = vmatprep.subr.bf16.mxu1 %v9325_v51  ;;  %v9433_v44 = vld [vmem:[#allocation9 + $0x50] sm:$0xff]  }
 0x37b   :  { %8065 = vmatprep.subr.bf16.mxu0 %v9326_v52  ;;  %v9381_v51 = vld [vmem:[#allocation6 + $0x780] ss:$28 sps:$4 sm:$0xff]  }
 0x37c   :  { %v9386_v52 = vld [vmem:[#allocation6 + $0x7bc] ss:$28 sps:$4 sm:$0xff]  }
 0x37d   :  { %6178 = vmatpush1.bf16.msra.mxu1 %v9323_v53  ;;  %v9434_v53 = vld [vmem:[#allocation9 + $0x10] sm:$0xff]  }
 0x37e   :  { %8066 = vmatpush3.bf16.msra.mxu0 %v9327_v54  ;;  %6179 = vmatprep.subr.bf16.mxu1 %v9330_v55  ;;  %v9384_v54 = vld [vmem:[#allocation6 + $0x7b8] ss:$28 sps:$4 sm:$0xff]  }
 0x37f   :  { %8067 = vmatprep.subr.bf16.mxu0 %v9331_v63  ;;  %v9389_v55 = vld [vmem:[#allocation6 + $0x7f4] ss:$28 sps:$4 sm:$0xff]   ;;  %v9443_v63 = vld [vmem:[#allocation9 + $0x60] sm:$0xff]  }
 0x381   :  { %6180 = vmatpush1.bf16.msra.mxu1 %v9328_v56  ;;  %v9387_v56 = vld [vmem:[#allocation6 + $0x7f0] ss:$28 sps:$4 sm:$0xff]  }
 0x382   :  { %8068 = vmatpush3.bf16.msra.mxu0 %v9332_v57  ;;  %6181 = vmatprep.subr.bf16.mxu1 %v9335_v58  ;;  %v9392_v57 = vld [vmem:[#allocation6 + $0x82c] ss:$28 sps:$4 sm:$0xff]  }
 0x383   :  { %8069 = vmatprep.subr.bf16.mxu0 %v9336_v59  ;;  %v9444_v58 = vld [vmem:[#allocation9 + $0x20] sm:$0xff]   ;;  %v9448_v59 = vld [vmem:[#allocation9 + $0x68] sm:$0xff]  }
 0x385   :  { %6182 = vmatpush1.bf16.msra.mxu1 %v9333_v60  ;;  %v9390_v60 = vld [vmem:[#allocation6 + $0x828] ss:$28 sps:$4 sm:$0xff]  }
 0x386   :  { %8070 = vmatpush3.bf16.msra.mxu0 %v9337_v61  ;;  %6183 = vmatprep.subr.bf16.mxu1 %v9340_v48  ;;  %v9395_v61 = vld [vmem:[#allocation6 + $0x864] ss:$28 sps:$4 sm:$0xff]   ;;  %v9449_v48 = vld [vmem:[#allocation9 + $0x28] sm:$0xff]  }
 0x387   :  { %8071 = vmatprep.subr.bf16.mxu0 %v9341_v62  ;;  %v9453_v62 = vld [vmem:[#allocation9 + $0x70] sm:$0xff]  }
 0x389   :  { %6184 = vmatpush1.bf16.msra.mxu1 %v9338_v0  ;;  %v9393_v0 = vld [vmem:[#allocation6 + $0x860] ss:$28 sps:$4 sm:$0xff]  }
 0x38a   :  { %8072 = vmatpush3.bf16.msra.mxu0 %v9342_v1  ;;  %6185 = vmatprep.subr.bf16.mxu1 %v9345_v2  ;;  %v9398_v1 = vld [vmem:[#allocation6 + $0x89c] ss:$28 sps:$4 sm:$0xff]  }
 0x38b   :  { %8183 = vmatprep.subr.bf16.mxu0 %v9656_v33  ;;  %v9454_v2 = vld [vmem:[#allocation9 + $0x30] sm:$0xff]  }
 0x38d   :  { %6405 = vmatmul.mubr.bf16.vlgmr.msra.gmra.mrb[20].mxu0 %v9909_v32  ;;  %6186 = vmatpush1.bf16.msra.mxu1 %v9343_v18  ;;  %v9458_v18 = vld [vmem:[#allocation9 + $0x78] sm:$0xff]  }
 0x38e   :  { %8184 = vmatpush3.bf16.msra.mxu0 %v9346_v3  ;;  %6187 = vmatprep.subr.bf16.mxu1 %v9349_v10  ;;  %v9396_v3 = vld [vmem:[#allocation6 + $0x898] ss:$28 sps:$4 sm:$0xff]  }
 0x38f   :  { %8185 = vmatprep.subr.bf16.mxu0 %v9656_v33  ;;  %8199 = vmatprep.mubr.msk.bf16.mxu0 %vm9657_vm0, %v9656_v33  ;;  %v9401_v10 = vld [vmem:[#allocation6 + $0x8d4] ss:$28 sps:$4 sm:$0xff]  }
 0x391   :  { %6188 = vmatpush1.bf16.msra.mxu1 %v9347_v6  ;;  %v9459_v6 = vld [vmem:[#allocation9 + $0x38] sm:$0xff]  }
 0x392   :  { %8186 = vmatpush3.bf16.msra.mxu0 %v9350_v15  ;;  %6189 = vmatprep.subr.bf16.mxu1 %v9353_v14  ;;  %v9399_v15 = vld [vmem:[#allocation6 + $0x8d0] ss:$28 sps:$4 sm:$0xff]  }
 0x393   :  { %8187 = vmatprep.subr.bf16.mxu0 %v9656_v33  ;;  %v9404_v14 = vld [vmem:[#allocation6 + $0x90c] ss:$28 sps:$4 sm:$0xff]  }
 0x395   :  { %6190 = vmatpush1.bf16.msra.mxu1 %v9351_v30  ;;  %v9402_v30 = vld [vmem:[#allocation6 + $0x908] ss:$28 sps:$4 sm:$0xff]  }
 0x396   :  { %8188 = vmatpush3.bf16.msra.mxu0 %v9354_v24  ;;  %6191 = vmatprep.subr.bf16.mxu1 %v9357_v16  ;;  %v9407_v24 = vld [vmem:[#allocation6 + $0x944] ss:$28 sps:$4 sm:$0xff]  }
 0x397   :  { %8189 = vmatprep.subr.bf16.mxu0 %v9656_v33  ;;  %v9405_v16 = vld [vmem:[#allocation6 + $0x940] ss:$28 sps:$4 sm:$0xff]  }
 0x399   :  { %6192 = vmatpush1.bf16.msra.mxu1 %v9355_v17  ;;  %v9410_v17 = vld [vmem:[#allocation6 + $0x97c] ss:$28 sps:$4 sm:$0xff]  }
 0x39a   :  { %8190 = vmatpush3.bf16.msra.mxu0 %v9358_v20  ;;  %6193 = vmatprep.subr.bf16.mxu1 %v9361_v21  ;;  %v9408_v20 = vld [vmem:[#allocation6 + $0x978] ss:$28 sps:$4 sm:$0xff]  }
 0x39b   :  { %8191 = vmatprep.subr.bf16.mxu0 %v9656_v33  ;;  %v9413_v21 = vld [vmem:[#allocation6 + $0x9b4] ss:$28 sps:$4 sm:$0xff]  }
 0x39d   :  { %6194 = vmatpush1.bf16.msra.mxu1 %v9359_v22  ;;  %v9411_v22 = vld [vmem:[#allocation6 + $0x9b0] ss:$28 sps:$4 sm:$0xff]  }
 0x39e   :  { %8192 = vmatpush3.bf16.msra.mxu0 %v9362_v23  ;;  %6195 = vmatprep.subr.bf16.mxu1 %v9365_v25  ;;  %v9416_v23 = vld [vmem:[#allocation6 + $0x9ec] ss:$28 sps:$4 sm:$0xff]  }
 0x39f   :  { %8193 = vmatprep.subr.bf16.mxu0 %v9656_v33  ;;  %v9414_v25 = vld [vmem:[#allocation6 + $0x9e8] ss:$28 sps:$4 sm:$0xff]  }
 0x3a1   :  { %6196 = vmatpush1.bf16.msra.mxu1 %v9363_v13  ;;  %v9419_v13 = vld [vmem:[#allocation6 + $0xa24] ss:$28 sps:$4 sm:$0xff]  }
 0x3a2   :  { %8194 = vmatpush3.bf16.msra.mxu0 %v9366_v26  ;;  %6197 = vmatprep.subr.bf16.mxu1 %v9369_v29  ;;  %v9417_v26 = vld [vmem:[#allocation6 + $0xa20] ss:$28 sps:$4 sm:$0xff]  }
 0x3a3   :  { %8195 = vmatprep.subr.bf16.mxu0 %v9656_v33  ;;  %v9422_v29 = vld [vmem:[#allocation6 + $0xa5c] ss:$28 sps:$4 sm:$0xff]  }
 0x3a5   :  { %6198 = vmatpush1.bf16.msra.mxu1 %v9367_v38  ;;  %v9420_v38 = vld [vmem:[#allocation6 + $0xa58] ss:$28 sps:$4 sm:$0xff]  }
 0x3a6   :  { %8196 = vmatpush3.bf16.msra.mxu0 %v9370_v31  ;;  %6199 = vmatprep.subr.bf16.mxu1 %v9373_v34  ;;  %v9427_v31 = vld [vmem:[#allocation6 + $0xa94] ss:$28 sps:$4 sm:$0xff]  }
 0x3a7   :  { %8197 = vmatprep.subr.bf16.mxu0 %v9656_v33  ;;  %v9425_v34 = vld [vmem:[#allocation6 + $0xa90] ss:$28 sps:$4 sm:$0xff]  }
 0x3a9   :  { %6200 = vmatpush1.bf16.msra.mxu1 %v9371_v35  ;;  %v9432_v35 = vld [vmem:[#allocation6 + $0xacc] ss:$28 sps:$4 sm:$0xff]  }
 0x3aa   :  { %8198 = vmatpush3.bf16.msra.mxu0 %v9374_v36  ;;  %6210 = vmatprep.subr.bf16.mxu1 %v9377_v37  ;;  %v9430_v36 = vld [vmem:[#allocation6 + $0xac8] ss:$28 sps:$4 sm:$0xff]  }
 0x3ab   :  { %8088 = vmatprep.subr.bf16.mxu0 %v9423_v39  ;;  %v9437_v37 = vld [vmem:[#allocation6 + $0xb04] ss:$28 sps:$4 sm:$0xff]  }
 0x3ac   :  { %6202 = vmatmul.mubr.bf16.vlgmr.msra.gmra.mrb[24].mxu1 %v9892_v5  ;;  %v9438_v5 = vld [vmem:[#allocation9 + $0x58] sm:$0xff]  }
 0x3ad   :  { %8200 = vmatmul.mubr.bf16.vlgmr.msra.gmra.mrb[24].mxu0 %v9918_v7  ;;  %6211 = vmatpush1.bf16.msra.mxu1 %v9375_v42  ;;  %v9435_v39 = vld [vmem:[#allocation6 + $0xb00] ss:$28 sps:$4 sm:$0xff]  }
 0x3ae   :  { %6242 = vmatprep.mubr.bf16.mxu1 %v9907_v28  ;;  %6212 = vmatprep.subr.bf16.mxu1 %v9380_v45  ;;  %v9439_v28 = vld [vmem:[#allocation9 + $0x18] sm:$0xff]   ;;  %v9442_v42 = vld [vmem:[#allocation6 + $0xb3c] ss:$28 sps:$4 sm:$0xff]  }
 0x3af   :  { %8089 = vmatpush3.bf16.msra.mxu0 %v9424_v46  ;;  %v9440_v45 = vld [vmem:[#allocation6 + $0xb38] ss:$28 sps:$4 sm:$0xff]  }
 0x3b0   :  { %8090 = vmatprep.subr.bf16.mxu0 %v9428_v41  ;;  %v9447_v46 = vld [vmem:[#allocation6 + $0xb74] ss:$28 sps:$4 sm:$0xff]  }
 0x3b1   :  { %6213 = vmatpush1.bf16.msra.mxu1 %v9378_v47  ;;  %v9445_v41 = vld [vmem:[#allocation6 + $0xb70] ss:$28 sps:$4 sm:$0xff]   ;;  %v9946_v47 = vld [vmem:[#allocation7] sm:$0xff] }
 0x3b2   :  { %6214 = vmatprep.subr.bf16.mxu1 %v9383_v49  ;;  %v3756_v49 = vrot.slane %v9946_v47, %v563_v8 }
 0x3b3   :  { %8091 = vmatpush3.bf16.msra.mxu0 %v9429_v50  ;;  %v9450_v50 = vld [vmem:[#allocation6 + $0xba8] ss:$28 sps:$4 sm:$0xff]  }
 0x3b4   :  { %8092 = vmatprep.subr.bf16.mxu0 %v9433_v44  ;;  %v9457_v44 = vld [vmem:[#allocation6 + $0xbe4] ss:$28 sps:$4 sm:$0xff]  }
 0x3b5   :  { %6215 = vmatpush1.bf16.msra.mxu1 %v9381_v51 }
 0x3b6   :  { %6216 = vmatprep.subr.bf16.mxu1 %v9386_v52 }
 0x3b7   :  { %8093 = vmatpush3.bf16.msra.mxu0 %v9434_v53  ;;  %v3764_v53 = vrot.slane %v9946_v47, %v571_v9  ;;  %v9463_v9 = vld [vmem:[#allocation9 + $0xc0] sm:$0xff]  }
 0x3b8   :  { %8094 = vmatprep.subr.bf16.mxu0 %v9438_v5 }
 0x3b9   :  { %6217 = vmatpush1.bf16.msra.mxu1 %v9384_v54 }
 0x3ba   :  { %6218 = vmatprep.subr.bf16.mxu1 %v9389_v55 }
 0x3bb   :  { %8095 = vmatpush3.bf16.msra.mxu0 %v9439_v28 }
 0x3bc   :  { %8096 = vmatprep.subr.bf16.mxu0 %v9443_v63 }
 0x3bd   :  { %6219 = vmatpush1.bf16.msra.mxu1 %v9387_v56  ;;  %v9455_v56 = vld [vmem:[#allocation6 + $0xbe0] ss:$28 sps:$4 sm:$0xff]  }
 0x3be   :  { %6220 = vmatprep.subr.bf16.mxu1 %v9392_v57 }
 0x3bf   :  { %8097 = vmatpush3.bf16.msra.mxu0 %v9444_v58 }
 0x3c0   :  { %8098 = vmatprep.subr.bf16.mxu0 %v9448_v59  ;;  %v9462_v59 = vld [vmem:[#allocation6 + $0xc1c] ss:$28 sps:$4 sm:$0xff]  }
 0x3c1   :  { %6221 = vmatpush1.bf16.msra.mxu1 %v9390_v60 }
 0x3c2   :  { %6222 = vmatprep.subr.bf16.mxu1 %v9395_v61 }
 0x3c3   :  { %8099 = vmatpush3.bf16.msra.mxu0 %v9449_v48 }
 0x3c4   :  { %8100 = vmatprep.subr.bf16.mxu0 %v9453_v62  ;;  %v9460_v62 = vld [vmem:[#allocation6 + $0xc18] ss:$28 sps:$4 sm:$0xff]  }
 0x3c5   :  { %6223 = vmatpush1.bf16.msra.mxu1 %v9393_v0 }
 0x3c6   :  { %6224 = vmatprep.subr.bf16.mxu1 %v9398_v1 }
 0x3c7   :  { %8101 = vmatpush3.bf16.msra.mxu0 %v9454_v2  ;;  %v9487_v2 = vld [vmem:[#allocation9 + $0x140] sm:$0xff]  }
 0x3c8   :  { %8102 = vmatprep.subr.bf16.mxu0 %v9458_v18  ;;  %v9488_v18 = vld [vmem:[#allocation9 + $0x100] sm:$0xff]  }
 0x3c9   :  { %6225 = vmatpush1.bf16.msra.mxu1 %v9396_v3  ;;  %v9489_v3 = vld [vmem:[#allocation9 + $0x148] sm:$0xff]  }
 0x3ca   :  { %6226 = vmatprep.subr.bf16.mxu1 %v9401_v10  ;;  %v9464_v10 = vld [vmem:[#allocation9 + $0x80] sm:$0xff]  }
 0x3cb   :  { %8103 = vmatpush3.bf16.msra.mxu0 %v9459_v6  ;;  %v9465_v6 = vld [vmem:[#allocation9 + $0xc8] sm:$0xff]  }
 0x3cc   :  { %8132 = vmatprep.subr.bf16.mxu0 %v9487_v2 }
 0x3cd   :  { %6227 = vmatpush1.bf16.msra.mxu1 %v9399_v15  ;;  %v9490_v15 = vld [vmem:[#allocation9 + $0x108] sm:$0xff]  }
 0x3ce   :  { %6228 = vmatprep.subr.bf16.mxu1 %v9404_v14 }
 0x3d1   :  { %6229 = vmatpush1.bf16.msra.mxu1 %v9402_v30  ;;  %v9491_v30 = vld [vmem:[#allocation9 + $0x150] sm:$0xff]  }
 0x3d2   :  { %6230 = vmatprep.subr.bf16.mxu1 %v9407_v24  ;;  %v9466_v24 = vld [vmem:[#allocation9 + $0x88] sm:$0xff]  }
 0x3d5   :  { %6231 = vmatpush1.bf16.msra.mxu1 %v9405_v16  ;;  %v9467_v16 = vld [vmem:[#allocation9 + $0xd0] sm:$0xff]  }
 0x3d6   :  { %6232 = vmatprep.subr.bf16.mxu1 %v9410_v17  ;;  %v9492_v17 = vld [vmem:[#allocation9 + $0x110] sm:$0xff]  }
 0x3d9   :  { %6233 = vmatpush1.bf16.msra.mxu1 %v9408_v20  ;;  %v9493_v20 = vld [vmem:[#allocation9 + $0x158] sm:$0xff]  }
 0x3da   :  { %6234 = vmatprep.subr.bf16.mxu1 %v9413_v21  ;;  %v9468_v21 = vld [vmem:[#allocation9 + $0x90] sm:$0xff]  }
 0x3dd   :  { %6235 = vmatpush1.bf16.msra.mxu1 %v9411_v22  ;;  %v9469_v22 = vld [vmem:[#allocation9 + $0xd8] sm:$0xff]  }
 0x3de   :  { %6236 = vmatprep.subr.bf16.mxu1 %v9416_v23  ;;  %v9494_v23 = vld [vmem:[#allocation9 + $0x118] sm:$0xff]  }
 0x3e1   :  { %6237 = vmatpush1.bf16.msra.mxu1 %v9414_v25  ;;  %v9495_v25 = vld [vmem:[#allocation9 + $0x160] sm:$0xff]  }
 0x3e2   :  { %6238 = vmatprep.subr.bf16.mxu1 %v9419_v13  ;;  %v9470_v13 = vld [vmem:[#allocation9 + $0x98] sm:$0xff]  }
 0x3e5   :  { %6239 = vmatpush1.bf16.msra.mxu1 %v9417_v26  ;;  %v9496_v26 = vld [vmem:[#allocation9 + $0x120] sm:$0xff]  }
 0x3e6   :  { %6240 = vmatprep.subr.bf16.mxu1 %v9422_v29  ;;  %v9472_v29 = vld [vmem:[#allocation9 + $0xa0] sm:$0xff]  }
 0x3e9   :  { %6241 = vmatpush1.bf16.msra.mxu1 %v9420_v38  ;;  %v9473_v38 = vld [vmem:[#allocation9 + $0xe8] sm:$0xff]  }
 0x3ea   :  { %6251 = vmatprep.subr.bf16.mxu1 %v9427_v31  ;;  %v9474_v31 = vld [vmem:[#allocation9 + $0xa8] sm:$0xff]  }
 0x3ec   :  { %6243 = vmatmul.mubr.bf16.vlgmr.msra.gmra.mrb[24].mxu1 %v9909_v32  ;;  %v9452_v32 = vld [vmem:[#allocation6 + $0xbac] ss:$28 sps:$4 sm:$0xff]  }
 0x3ed   :  { %6252 = vmatpush1.bf16.msra.mxu1 %v9425_v34  ;;  %6283 = vmatprep.mubr.bf16.mxu1 %v9655_v27  ;;  %v3752_v27 = vrot.slane %v9946_v47, %v559_v19  ;;  %v3760_v34 = vrot.slane %v9946_v47, %v567_v40 }
 0x3ee   :  { %6253 = vmatprep.subr.bf16.mxu1 %v9432_v35  ;;  %v9475_v35 = vld [vmem:[#allocation9 + $0xf0] sm:$0xff]  }
 0x3f1   :  { %6254 = vmatpush1.bf16.msra.mxu1 %v9430_v36 }
 0x3f2   :  { %6255 = vmatprep.subr.bf16.mxu1 %v9437_v37 }
 0x3f5   :  { %6256 = vmatpush1.bf16.msra.mxu1 %v9435_v39  ;;  %v9476_v39 = vld [vmem:[#allocation9 + $0xb0] sm:$0xff]  }
 0x3f6   :  { %6257 = vmatprep.subr.bf16.mxu1 %v9442_v42 }
 0x3f9   :  { %6258 = vmatpush1.bf16.msra.mxu1 %v9440_v45 }
 0x3fa   :  { %6259 = vmatprep.subr.bf16.mxu1 %v9447_v46 }
 0x3fd   :  { %6260 = vmatpush1.bf16.msra.mxu1 %v9445_v41  ;;  %v9477_v41 = vld [vmem:[#allocation9 + $0xf8] sm:$0xff]  }
 0x3fe   :  { %6261 = vmatprep.subr.bf16.mxu1 %v9452_v32 }
 0x3ff   :  { %v5957_v51 = vpop.f32.mrb[20].mxu1  ;;  %v9954_v52 = vpop.f32.mrb[8].mxu0 }
 0x400   :  { %v8229_v5 = vadd.f32 %v5957_v51, %v3752_v27  ;;  %v5959_v54 = vpop.f32.mrb[21].mxu1  ;;  %v6123_v55 = vpop.f32.mrb[9].mxu0  ;;  %v8231_v42 = vadd.f32 %v9954_v52, %v3760_v34  ;;  %v9478_v27 = vld [vmem:[#allocation9 + $0xb8] sm:$0xff]   ;;  %v9481_v51 = vld [vmem:[#allocation9 + $0x190] sm:$0xff]  }
 0x401   :  { %v8230_v28 = vadd.f32 %v5959_v54, %v3756_v49  ;;  %v5961_v19 = vpop.f32.mrb[22].mxu1  ;;  %v6125_v63 = vpop.f32.mrb[10].mxu0  ;;  %6262 = vmatpush1.bf16.msra.mxu1 %v9450_v50  ;;  %v8232_v61 = vadd.f32 %v6123_v55, %v3764_v53  ;;  %v9479_v50 = vld [vmem:[#allocation9 + $0x180] sm:$0xff]   ;;  %v9482_v52 = vld [vmem:[#allocation9 + $0x198] sm:$0xff]   ;;  %v3776_v54 = vrot.slane %v9946_v47, %v583_v43  ;;  %v9498_v43 = vld [vmem:[#allocation9 + $0x128] sm:$0xff]  }
 0x402   :  { %v6452_v57 = vmax.f32 %v8229_v5, 0.0  ;;  %v5962_v8 = vpop.f32.mrb[23].mxu1  ;;  %v6126_v58 = vpop.f32.mrb[11].mxu0  ;;  %6263 = vmatprep.subr.bf16.mxu1 %v9457_v44  ;;  %v6454_v49 = vmax.f32 %v8231_v42, 0.0  ;;  %v9480_v44 = vld [vmem:[#allocation9 + $0x188] sm:$0xff]   ;;  %v9483_v53 = vld [vmem:[#allocation9 + $0x1a0] sm:$0xff]  }
 0x403   :  { %v6453_v60 = vmax.f32 %v8230_v28, 0.0  ;;  %v6455_v1 = vmax.f32 %v8232_v61, 0.0  ;;  %v9484_v5 = vld [vmem:[#allocation9 + $0x1a8] sm:$0xff]   ;;  %v9485_v19 = vld [vmem:[#allocation9 + $0x1b0] sm:$0xff]  }
 0x404   :  { %v6459_v0 = vpack.c.bf16 %v6452_v57, %v6452_v57  ;;  %v6461_v40 = vpack.c.bf16 %v6454_v49, %v6454_v49 }
 0x405   :  { %v6460_v48 = vpack.c.bf16 %v6453_v60, %v6453_v60  ;;  %6264 = vmatpush1.bf16.msra.mxu1 %v9455_v56  ;;  %v6462_v14 = vpack.c.bf16 %v6455_v1, %v6455_v1  ;;  %v9497_v60 = vld [vmem:[#allocation9 + $0x168] sm:$0xff]  }
 0x406   :  { %6265 = vmatprep.subr.bf16.mxu1 %v9462_v59  ;;  %v9486_v59 = vld [vmem:[#allocation9 + $0x1b8] sm:$0xff]  }
 0x407   :  { %6953 = vmatprep.mubr.bf16.mxu0 %v6460_v48  ;;  %v9499_v48 = vld [vmem:[#allocation9 + $0x170] sm:$0xff]  }
 0x408   :  { %6954 = vmatmul.mubr.bf16.vlgmr.msra.gmra.mrb[28].mxu0 %v6459_v0  ;;  %v9500_v0 = vld [vmem:[#allocation9 + $0x130] sm:$0xff]  }
 0x409   :  { %6266 = vmatpush1.bf16.msra.mxu1 %v9460_v62  ;;  %8133 = vmatpush3.bf16.msra.mxu0 %v9488_v18 }
 0x40a   :  { %8110 = vmatprep.subr.bf16.mxu1 %v9463_v9  ;;  %8134 = vmatprep.subr.bf16.mxu0 %v9489_v3  ;;  %v9501_v3 = vld [vmem:[#allocation9 + $0x178] sm:$0xff]  }
 0x40c   :  { %6284 = vmatmul.mubr.bf16.vlgmr.msra.gmra.mrb[24].mxu1 %v9918_v7  ;;  %v9471_v7 = vld [vmem:[#allocation9 + $0xe0] sm:$0xff]  }
 0x40d   :  { %8111 = vmatpush3.bf16.msra.mxu1 %v9464_v10  ;;  %6993 = vmatprep.mubr.bf16.mxu1 %v6462_v14  ;;  %v9502_v10 = vld [vmem:[#allocation9 + $0x138] sm:$0xff]  }
 0x40e   :  { %8112 = vmatprep.subr.bf16.mxu1 %v9465_v6  ;;  %8135 = vmatpush3.bf16.msra.mxu0 %v9490_v15 }
 0x40f   :  { %8136 = vmatprep.subr.bf16.mxu0 %v9491_v30 }
 0x411   :  { %8113 = vmatpush3.bf16.msra.mxu1 %v9466_v24 }
 0x412   :  { %8114 = vmatprep.subr.bf16.mxu1 %v9467_v16  ;;  %8137 = vmatpush3.bf16.msra.mxu0 %v9492_v17 }
 0x413   :  { %8138 = vmatprep.subr.bf16.mxu0 %v9493_v20 }
 0x415   :  { %8115 = vmatpush3.bf16.msra.mxu1 %v9468_v21  ;;  %v3768_v21 = vrot.slane %v9946_v47, %v575_v11  ;;  %v7881_v11 = vld [vmem:[#allocation10] ss:$0 sm:$0xff] }
 0x416   :  { %8116 = vmatprep.subr.bf16.mxu1 %v9469_v22  ;;  %8139 = vmatpush3.bf16.msra.mxu0 %v9494_v23 }
 0x417   :  { %8140 = vmatprep.subr.bf16.mxu0 %v9495_v25  ;;  %v3772_v25 = vrot.slane %v9946_v47, %v579_v12 }
 0x419   :  { %8117 = vmatpush3.bf16.msra.mxu1 %v9470_v13 }
 0x41a   :  { %8118 = vmatprep.subr.bf16.mxu1 %v9471_v7  ;;  %8141 = vmatpush3.bf16.msra.mxu0 %v9496_v26 }
 0x41b   :  { %8142 = vmatprep.subr.bf16.mxu0 %v9497_v60 }
 0x41d   :  { %8119 = vmatpush3.bf16.msra.mxu1 %v9472_v29 }
 0x41e   :  { %8120 = vmatprep.subr.bf16.mxu1 %v9473_v38  ;;  %8143 = vmatpush3.bf16.msra.mxu0 %v9498_v43 }
 0x41f   :  { %8144 = vmatprep.subr.bf16.mxu0 %v9499_v48 }
 0x420   :  { %v8029_v36 = vpop.f32.mrb[12].mxu0 }
 0x421   :  { %v8030_v37 = vpop.f32.mrb[13].mxu0  ;;  %8121 = vmatpush3.bf16.msra.mxu1 %v9474_v31 }
 0x422   :  { %v8031_v45 = vadd.f32 %v8030_v37, %v8029_v36  ;;  %v8032_v46 = vpop.f32.mrb[14].mxu0  ;;  %8122 = vmatprep.subr.bf16.mxu1 %v9475_v35  ;;  %8145 = vmatpush3.bf16.msra.mxu0 %v9500_v0 }
 0x423   :  { %v8033_v32 = vpop.f32.mrb[15].mxu0  ;;  %8146 = vmatprep.subr.bf16.mxu0 %v9501_v3 }
 0x424   :  { %v6327_v63 = vadd.f32 %v8031_v45, %v3776_v54 }
 0x425   :  { %8123 = vmatpush3.bf16.msra.mxu1 %v9476_v39 }
 0x426   :  { %8124 = vmatprep.subr.bf16.mxu1 %v9477_v41  ;;  %8147 = vmatpush3.bf16.msra.mxu0 %v9502_v10 }
 0x429   :  { %8125 = vmatpush3.bf16.msra.mxu1 %v9478_v27 }
 0x42a   :  { %8203 = vmatprep.subr.bf16.mxu1 %v9656_v33 }
 0x42c   :  { %6994 = vmatmul.mubr.bf16.vlgmr.msra.gmra.mrb[28].mxu1 %v6461_v40 }
 0x42d   :  { %8204 = vmatpush3.bf16.msra.mxu1 %v9479_v50  ;;  %8219 = vmatprep.mubr.msk.bf16.mxu1 %vm9657_vm0, %v9656_v33 }
 0x42e   :  { %8205 = vmatprep.subr.bf16.mxu1 %v9656_v33 }
 0x431   :  { %8206 = vmatpush3.bf16.msra.mxu1 %v9480_v44 }
 0x432   :  { %8207 = vmatprep.subr.bf16.mxu1 %v9656_v33 }
 0x435   :  { %8208 = vmatpush3.bf16.msra.mxu1 %v9481_v51 }
 0x436   :  { %8209 = vmatprep.subr.bf16.mxu1 %v9656_v33 }
 0x439   :  { %8210 = vmatpush3.bf16.msra.mxu1 %v9482_v52 }
 0x43a   :  { %8211 = vmatprep.subr.bf16.mxu1 %v9656_v33 }
 0x43d   :  { %8212 = vmatpush3.bf16.msra.mxu1 %v9483_v53 }
 0x43e   :  { %8213 = vmatprep.subr.bf16.mxu1 %v9656_v33 }
 0x440   :  { %v8051_v55 = vpop.f32.mrb[16].mxu0 }
 0x441   :  { %v8052_v28 = vpop.f32.mrb[17].mxu0  ;;  %8214 = vmatpush3.bf16.msra.mxu1 %v9484_v5 }
 0x442   :  { %v8053_v56 = vadd.f32 %v8052_v28, %v8051_v55  ;;  %v8054_v57 = vpop.f32.mrb[18].mxu0  ;;  %8215 = vmatprep.subr.bf16.mxu1 %v9656_v33 }
 0x443   :  { %v8055_v8 = vpop.f32.mrb[19].mxu0 }
 0x444   :  { %v6367_v58 = vadd.f32 %v8053_v56, %v6327_v63 }
 0x445   :  { %8216 = vmatpush3.bf16.msra.mxu1 %v9485_v19 }
 0x446   :  { %8217 = vmatprep.subr.bf16.mxu1 %v9656_v33 }
 0x449   :  { %8218 = vmatpush3.bf16.msra.mxu1 %v9486_v59 }
 0x460   :  { %v8073_v61 = vpop.f32.mrb[20].mxu0 }
 0x461   :  { %v8074_v62 = vpop.f32.mrb[21].mxu0 }
 0x462   :  { %v8075_v9 = vadd.f32 %v8074_v62, %v8073_v61  ;;  %v8076_v1 = vpop.f32.mrb[22].mxu0 }
 0x463   :  { %v8077_v2 = vpop.f32.mrb[23].mxu0 }
 0x464   :  { %v6407_v18 = vadd.f32 %v8075_v9, %v6367_v58 }
 0x480   :  { %v6446_v33 = vpop.f32.mrb[24].mxu0 }
 0x481   :  { %v6447_v6 = vadd.f32 %v6446_v33, %v6407_v18  ;;  %v8201_v15 = vpop.f32.mrb[25].mxu0 }
 0x482   :  { %v6449_v14 = vpop.f32.mrb[26].mxu0 }
 0x483   :  { %v6458_v30 = vmax.f32 %v6447_v6, 0.0  ;;  %v8202_v24 = vpop.f32.mrb[27].mxu0 }
 0x485   :  { %v6465_v16 = vpack.c.bf16 %v6458_v30, %v6458_v30 }
 0x487   :  { %8220 = vmatmul.mubr.bf16.vlgmr.msra.gmra.mrb[32].mxu1 %v6465_v16 }
 0x4db   :  { %v8104_v17 = vpop.f32.mrb[28].mxu0 }
 0x4dc   :  { %v8105_v20 = vpop.f32.mrb[29].mxu0 }
 0x4dd   :  { %v8106_v22 = vadd.f32 %v8105_v20, %v8104_v17  ;;  %v8107_v23 = vpop.f32.mrb[30].mxu0 }
 0x4de   :  { %v8108_v13 = vpop.f32.mrb[31].mxu0 }
 0x4df   :  { %v6285_v7 = vpop.f32.mrb[24].mxu1  ;;  %v6956_v46 = vadd.f32 %v8106_v22, %v7881_v11 }
 0x4e0   :  { %v8233_v26 = vadd.f32 %v6285_v7, %v3768_v21  ;;  %v6287_v29 = vpop.f32.mrb[25].mxu1 }
 0x4e1   :  { %v8234_v38 = vadd.f32 %v6287_v29, %v3772_v25  ;;  %v6289_v31 = vpop.f32.mrb[26].mxu1 }
 0x4e2   :  { %v6456_v34 = vmax.f32 %v8233_v26, 0.0  ;;  %v6290_v35 = vpop.f32.mrb[27].mxu1 }
 0x4e3   :  { %v6457_v36 = vmax.f32 %v8234_v38, 0.0 }
 0x4e4   :  { %v6463_v39 = vpack.c.bf16 %v6456_v34, %v6456_v34 }
 0x4e5   :  { %v6464_v37 = vpack.c.bf16 %v6457_v36, %v6457_v36 }
 0x4e7   :  { %7033 = vmatprep.mubr.bf16.mxu0 %v6464_v37 }
 0x4e8   :  { %7034 = vmatmul.mubr.bf16.vlgmr.msra.gmra.mrb[32].mxu0 %v6463_v39 }
 0x4ff   :  { %v8126_v42 = vpop.f32.mrb[28].mxu1 }
 0x500   :  { %v8127_v45 = vpop.f32.mrb[29].mxu1 }
 0x501   :  { %v8128_v4 = vadd.f32 %v8127_v45, %v8126_v42  ;;  %v8129_v41 = vpop.f32.mrb[30].mxu1 }
 0x502   :  { %v8130_v12 = vpop.f32.mrb[31].mxu1 }
 0x503   :  { %v6996_v47 = vadd.f32 %v8128_v4, %v6956_v46 }
 0x55a   :  { %v7075_v32 = vpop.f32.mrb[32].mxu1 }
 0x55b   :  { %v8221_v27 = vpop.f32.mrb[33].mxu1 }
 0x55c   :  { %v7078_v49 = vpop.f32.mrb[34].mxu1 }
 0x55d   :  { %v8222_v50 = vpop.f32.mrb[35].mxu1 }
 0x5bb   :  { %v8148_v40 = vpop.f32.mrb[32].mxu0 }
 0x5bc   :  { %v8149_v44 = vpop.f32.mrb[33].mxu0 }
 0x5bd   :  { %v8150_v51 = vadd.f32 %v8149_v44, %v8148_v40  ;;  %v8151_v52 = vpop.f32.mrb[34].mxu0 }
 0x5be   :  { %v8152_v53 = vpop.f32.mrb[35].mxu0 }
 0x5bf   :  { %v7036_v5 = vadd.f32 %v8150_v51, %v6996_v47 }
 0x5c1   :  { %v7076_v54 = vadd.f32 %v7075_v32, %v7036_v5 }
 0x5c3   :  { %7081 = vst [vmem:[%s9993_s7] sm:$0xff] %v7076_v54 }
 0x5c4   :  { %7086 = vsyncpa [#allocation3], 1 }
 0x5c5   :  { %7087 = vsyncpa [#allocation5], 1 }
 0x5c6   :  { %7088 = vsyncpa [#allocation8], 1 }
 0x5c7   :  { %7089 = vsyncpa [#allocation11], 1 }

</bundles_post_ra>
